<compile_context>
chip_gen: v6e
topology: v6e:2x2x1
jax: 0.10.0
libtpu: 0.0.40
codegen_flags: <defaults>
</compile_context>

<pallas_src>
import functools

import jax
import jax.numpy as jnp
from jax import lax
from jax.experimental import pallas as pl
from jax.experimental.pallas import tpu as pltpu

EXPANSION = 4
BN_EPS = 1e-5
LANE = 128           # channel dims are zero-padded to a multiple of the lane width


def _round_up(n, m):
    return ((n + m - 1) // m) * m


# ----------------------------- fused Pallas kernel ----------------------------

def _fused_block_kernel(x_ref, w1_ref, w2_ref, w3_ref, b1_ref, b2_ref, b3_ref,
                        o_ref, h1p_ref, *, stride, has_sc_conv):
    """One full bottleneck block for ONE image; everything stays in VMEM.

    x_ref  : (1, H, W, Cpi)      bf16  input tile (channels zero-padded to 128)
    w1_ref : (Cpi, Cpm)          bf16  1x1 conv1, BN1 scale folded in
    w2_ref : (9, Cpm, Cpm)       bf16  3x3 conv2 (tap-major ky*3+kx), BN2 scale folded
    w3_ref : (Cpm[+Cpi], Cpo)    bf16  1x1 conv3 [stacked with projection shortcut]
    b*_ref : (1, C)              f32   folded BN biases (b3 includes shortcut bias)
    o_ref  : (1, Ho, Wo, Cpo)    bf16
    h1p_ref: (H+2, W+2, Cpm)     bf16  zero-halo padded conv1 output (scratch)
    """
    _, H, W, Cpi = x_ref.shape
    Cpm = w1_ref.shape[1]
    Cpo = w3_ref.shape[1]
    Ho = (H - 1) // stride + 1
    Wo = (W - 1) // stride + 1

    x = x_ref[0]                                               # (H, W, Cpi) bf16

    # ---- conv1 (1x1, BN scale pre-folded) + bias + relu ---------------------------
    h1 = jnp.dot(x.reshape(H * W, Cpi), w1_ref[...],
                 preferred_element_type=jnp.float32)
    h1 = jnp.maximum(h1 + b1_ref[...], 0.0)

    # Interior is fully overwritten each step; only the 1-px halo is re-zeroed
    # (cheap and correct even when the batch axis is split across TensorCores).
    h1p_ref[1:H + 1, 1:W + 1, :] = h1.astype(h1p_ref.dtype).reshape(H, W, Cpm)
    zrow = jnp.zeros((1, W + 2, Cpm), h1p_ref.dtype)
    zcol = jnp.zeros((H, 1, Cpm), h1p_ref.dtype)
    h1p_ref[0:1, :, :] = zrow
    h1p_ref[H + 1:H + 2, :, :] = zrow
    h1p_ref[1:H + 1, 0:1, :] = zcol
    h1p_ref[1:H + 1, W + 1:W + 2, :] = zcol

    # ---- conv2 (3x3, stride, pad=1): implicit GEMM over 9 taps --------------------
    # Functional f32 accumulator: first tap initializes it, remaining 8 accumulate
    # back-to-back (no zero-store / VMEM scratch round-trips).
    acc = None
    for ky in range(3):
        for kx in range(3):
            if stride == 1:
                tap = h1p_ref[ky:ky + Ho, kx:kx + Wo, :]
            else:
                tap = h1p_ref[pl.ds(ky, Ho, stride), pl.ds(kx, Wo, stride), :]
            d = jnp.dot(tap.reshape(Ho * Wo, Cpm), w2_ref[ky * 3 + kx],
                        preferred_element_type=jnp.float32)
            acc = d if acc is None else acc + d
    h2 = jnp.maximum(acc + b2_ref[...], 0.0).astype(jnp.bfloat16)

    # ---- conv3 (1x1) [+ projection shortcut fused into one K=Cpm+Cpi matmul] ------
    if has_sc_conv:
        if stride == 1:
            xs = x
        else:
            xs = x_ref[0, pl.ds(0, Ho, stride), pl.ds(0, Wo, stride), :]
        lhs = jnp.concatenate([h2, xs.reshape(Ho * Wo, Cpi)], axis=1)
        y = jnp.dot(lhs, w3_ref[...], preferred_element_type=jnp.float32)
        y = y + b3_ref[...]
    else:
        y = jnp.dot(h2, w3_ref[...], preferred_element_type=jnp.float32)
        y = y + b3_ref[...]
        # TODO(synk): identity residual is added from the bf16-cast input; keep an f32
        # copy of x if bit-closer parity with the f32 PyTorch add is ever required.
        y = y + x.reshape(Ho * Wo, Cpo).astype(jnp.float32)

    o_ref[0] = jnp.maximum(y, 0.0).reshape(Ho, Wo, Cpo).astype(o_ref.dtype)


def _fused_block_call(x_p, prep, *, stride, out_dtype=jnp.bfloat16):
    """pallas_call wrapper: grid over images, weights resident, batch axis parallel."""
    N, H, W, Cpi = x_p.shape
    Cpm = prep["w1"].shape[1]
    K3, Cpo = prep["w3"].shape
    has_sc_conv = (K3 != Cpm)          # projection shortcut was stacked into w3
    Ho = (H - 1) // stride + 1
    Wo = (W - 1) // stride + 1

    in_specs = [
        pl.BlockSpec((1, H, W, Cpi), lambda n: (n, 0, 0, 0)),   # per-image pixel slab
        pl.BlockSpec((Cpi, Cpm), lambda n: (0, 0)),             # weights stay resident
        pl.BlockSpec((9, Cpm, Cpm), lambda n: (0, 0, 0)),
        pl.BlockSpec((K3, Cpo), lambda n: (0, 0)),
        pl.BlockSpec((1, Cpm), lambda n: (0, 0)),               # folded BN biases
        pl.BlockSpec((1, Cpm), lambda n: (0, 0)),
        pl.BlockSpec((1, Cpo), lambda n: (0, 0)),
    ]
    args = [x_p, prep["w1"], prep["w2"], prep["w3"],
            prep["b1"], prep["b2"], prep["b3"]]

    # Explicit VMEM budget from the real per-step footprint (with headroom).
    obpe = jnp.dtype(out_dtype).itemsize
    vmem = (2 * (H * W * Cpi * 2)                                # 2x input tile (bf16)
            + 2 * (Ho * Wo * Cpo * obpe)                         # 2x output tile
            + 2 * ((Cpi * Cpm + 9 * Cpm * Cpm + K3 * Cpo) * 2
                   + (2 * Cpm + Cpo) * 4)                        # weights / biases
            + (H + 2) * (W + 2) * Cpm * 2                        # h1p scratch
            + Ho * Wo * (Cpm + Cpo) * 4)                         # live f32 accumulators
    vmem_limit = int(min(max(2 * vmem + (16 << 20), 32 << 20), 120 << 20))

    kern = functools.partial(_fused_block_kernel, stride=stride,
                             has_sc_conv=has_sc_conv)
    return pl.pallas_call(
        kern,
        out_shape=jax.ShapeDtypeStruct((N, Ho, Wo, Cpo), out_dtype),
        grid_spec=pltpu.PrefetchScalarGridSpec(
            num_scalar_prefetch=0,
            grid=(N,),
            in_specs=in_specs,
            out_specs=pl.BlockSpec((1, Ho, Wo, Cpo), lambda n: (n, 0, 0, 0)),
            scratch_shapes=[pltpu.VMEM((H + 2, W + 2, Cpm), jnp.bfloat16)],
        ),
        compiler_params=pltpu.CompilerParams(
            dimension_semantics=("parallel",),      # v7x: images split across both TCs
            vmem_limit_bytes=vmem_limit),
    )(*args)


# ------------------------------ parameter prep --------------------------------

def bn_fuse(gamma, beta, mean, var, eps=BN_EPS):
    scale = gamma / jnp.sqrt(var + eps)
    bias = beta - mean * scale
    return scale, bias


def prepare_params(params, in_planes, planes, stride=1):
    """One-time prep: BN folding INTO the weights, transposes, lane padding,
    conv3+shortcut weight stacking.  All hoisted out of the forward path."""
    out_c = planes * EXPANSION
    cpi = _round_up(in_planes, LANE)
    cpm = _round_up(planes, LANE)
    cpo = _round_up(out_c, LANE)
    has_sc_conv = (stride != 1) or (in_planes != out_c)

    def pad2(w, r, c):
        return jnp.pad(w, ((0, r - w.shape[0]), (0, c - w.shape[1])))

    def pad_bias(b, cp):
        return jnp.pad(b, (0, cp - b.shape[0])).reshape(1, cp).astype(jnp.float32)

    s1, b1 = bn_fuse(*params["bn1"])
    s2, b2 = bn_fuse(*params["bn2"])
    s3, b3 = bn_fuse(*params["bn3"])

    # conv1: fold s1 per output channel, transpose to (in, out), pad to lanes.
    w1 = params["w1"].reshape(planes, in_planes) * s1[:, None]
    w1 = pad2(w1.T, cpi, cpm)

    # conv2: fold s2 per output channel, (O,I,3,3) -> (ky*3+kx, I, O), pad.
    w2 = params["w2"] * s2[:, None, None, None]
    w2 = jnp.transpose(w2, (2, 3, 1, 0)).reshape(9, planes, planes)
    w2 = jnp.pad(w2, ((0, 0), (0, cpm - planes), (0, cpm - planes)))

    # conv3: fold s3.  If the shortcut is a projection, stack [w3; ws] along K so the
    # kernel does conv3 + shortcut as ONE K=(cpm+cpi) matmul; sum the two biases.
    w3 = params["w3"].reshape(out_c, planes) * s3[:, None]
    w3 = pad2(w3.T, cpm, cpo)
    b3_full = b3
    if has_sc_conv:
        ss, bs = bn_fuse(*params["bns"])
        ws = params["ws"].reshape(out_c, in_planes) * ss[:, None]
        ws = pad2(ws.T, cpi, cpo)
        w3 = jnp.concatenate([w3, ws], axis=0)          # (cpm + cpi, cpo)
        b3_full = b3 + bs

    return {
        "w1": w1.astype(jnp.bfloat16),
        "w2": w2.astype(jnp.bfloat16),
        "w3": w3.astype(jnp.bfloat16),
        "b1": pad_bias(b1, cpm),
        "b2": pad_bias(b2, cpm),
        "b3": pad_bias(b3_full, cpo),
    }


# ------------------------------ forward wrappers --------------------------------

@functools.partial(jax.jit, static_argnames=("stride",))
def basic_block_forward_nhwc(x_nhwc_padded, prep, *, stride=1):
    """Network-internal entry: NHWC, channel-padded, bf16 in -> bf16 out (padded).
    Use this inside a model so NCHW transposes / channel padding happen once at the
    model boundary instead of per block."""
    return _fused_block_call(x_nhwc_padded, prep, stride=stride)


@functools.partial(jax.jit, static_argnames=("stride", "planes"))
def basic_block_forward(x_nchw, prep, *, stride, planes):
    """PyTorch-compatible wrapper: NCHW f32 in / NCHW f32 out."""
    out_c = planes * EXPANSION
    c_in = x_nchw.shape[1]
    cpi = prep["w1"].shape[0]

    x = jnp.transpose(x_nchw, (0, 2, 3, 1))
    x = jnp.pad(x, ((0, 0), (0, 0), (0, 0), (0, cpi - c_in))).astype(jnp.bfloat16)

    out = _fused_block_call(x, prep, stride=stride)
    out = out[..., :out_c].astype(jnp.float32)           # drop lane padding
    return jnp.transpose(out, (0, 3, 1, 2))              # back to NCHW


# --------------------------- pure-JAX reference --------------------------------

def ref_forward(x_nchw, params, stride):
    def conv(x, w, st=1, pad=0):
        return lax.conv_general_dilated(
            x, w, (st, st), [(pad, pad), (pad, pad)],
            dimension_numbers=("NCHW", "OIHW", "NCHW"))

    def bn(x, p):
        s, b = bn_fuse(*p)
        return x * s[None, :, None, None] + b[None, :, None, None]

    out = jax.nn.relu(bn(conv(x_nchw, params["w1"]), params["bn1"]))
    out = jax.nn.relu(bn(conv(out, params["w2"], stride, 1), params["bn2"]))
    out = bn(conv(out, params["w3"]), params["bn3"])
    in_c = x_nchw.shape[1]
    out_c = params["w3"].shape[0]
    if stride != 1 or in_c != out_c:
        sc = bn(conv(x_nchw, params["ws"], stride), params["bns"])
    else:
        sc = x_nchw
    return jax.nn.relu(out + sc)


# ------------------------------- param init ------------------------------------

def make_bn_params(key, c):
    k1, k2, k3, k4 = jax.random.split(key, 4)
    gamma = jax.random.uniform(k1, (c,), jnp.float32, 0.5, 1.5)
    beta = 0.1 * jax.random.normal(k2, (c,), jnp.float32)
    mean = 0.1 * jax.random.normal(k3, (c,), jnp.float32)
    var = jax.random.uniform(k4, (c,), jnp.float32, 0.5, 1.5)
    return (gamma, beta, mean, var)


def make_params(key, in_planes, planes):
    out_c = planes * EXPANSION
    keys = jax.random.split(key, 8)
    return {
        "w1": 0.1 * jax.random.normal(keys[0], (planes, in_planes, 1, 1), jnp.float32),
        "bn1": make_bn_params(keys[1], planes),
        "w2": 0.1 * jax.random.normal(keys[2], (planes, planes, 3, 3), jnp.float32),
        "bn2": make_bn_params(keys[3], planes),
        "w3": 0.1 * jax.random.normal(keys[4], (out_c, planes, 1, 1), jnp.float32),
        "bn3": make_bn_params(keys[5], out_c),
        "ws": 0.1 * jax.random.normal(keys[6], (out_c, in_planes, 1, 1), jnp.float32),
        "bns": make_bn_params(keys[7], out_c),
    }


# ---------------------------------- main ----------------------------------------

if __name__ == "__main__":
    key = jax.random.PRNGKey(0)
    k_x1, k_p1, k_x2, k_p2 = jax.random.split(key, 4)
    N, H, W = 2, 16, 16

    def check(x, params, planes, stride):
        prep = prepare_params(params, x.shape[1], planes, stride)
        out = jax.block_until_ready(
            basic_block_forward(x, prep, stride=stride, planes=planes))
        ref = jax.block_until_ready(ref_forward(x, params, stride))
        assert out.shape == ref.shape == (x.shape[0], planes * EXPANSION,
                                          (H - 1) // stride + 1,
                                          (W - 1) // stride + 1)
        err = float(jnp.max(jnp.abs(out - ref)))
        rel = float(jnp.linalg.norm(out - ref) / jnp.linalg.norm(ref))
        # bf16 matmul operands + bf16 output vs f32 reference -> loose but bug-catching
        assert err < 2.5e-1 and rel < 3e-2, (err, rel)

    # Config 1: projection shortcut active (in_planes != planes*4), stride=1.
    in_planes, planes = 8, 4
    x1 = jax.random.normal(k_x1, (N, in_planes, H, W), jnp.float32)
    check(x1, make_params(k_p1, in_planes, planes), planes, stride=1)

    # Config 2: identity shortcut (in_planes == planes*4), stride=1.
    in_planes2, planes2 = 16, 4
    x2 = jax.random.normal(k_x2, (N, in_planes2, H, W), jnp.float32)
    check(x2, make_params(k_p2, in_planes2, planes2), planes2, stride=1)

    print("KERNEL_OK")
</pallas_src>

<mosaic_0001>
module attributes {stable_mosaic.version = 11 : i64} {
  func.func @_fused_block_kernel(%arg0: i32, %arg1: memref<1x16x16x128xbf16, #tpu.memory_space<vmem>>, %arg2: memref<128x128xbf16, #tpu.memory_space<vmem>>, %arg3: memref<9x128x128xbf16, #tpu.memory_space<vmem>>, %arg4: memref<256x128xbf16, #tpu.memory_space<vmem>>, %arg5: memref<1x128xf32, #tpu.memory_space<vmem>>, %arg6: memref<1x128xf32, #tpu.memory_space<vmem>>, %arg7: memref<1x128xf32, #tpu.memory_space<vmem>>, %arg8: memref<1x16x16x128xbf16, #tpu.memory_space<vmem>>, %arg9: memref<18x18x128xbf16, #tpu.memory_space<vmem>>) attributes {dimension_semantics = [#tpu.dimension_semantics<parallel>], iteration_bounds = array<i64: 2>, scalar_prefetch = 0 : i64, scratch_operands = 1 : i64, tpu.core_type = #tpu.core_type<tc>, window_params = [{transform_indices = @transform_0, window_bounds = array<i64: 1, 16, 16, 128>}, {pipeline_mode = #tpu.pipeline_mode<synchronous>, transform_indices = @transform_1, window_bounds = array<i64: 128, 128>}, {pipeline_mode = #tpu.pipeline_mode<synchronous>, transform_indices = @transform_2, window_bounds = array<i64: 9, 128, 128>}, {pipeline_mode = #tpu.pipeline_mode<synchronous>, transform_indices = @transform_3, window_bounds = array<i64: 256, 128>}, {pipeline_mode = #tpu.pipeline_mode<synchronous>, transform_indices = @transform_4, window_bounds = array<i64: 1, 128>}, {pipeline_mode = #tpu.pipeline_mode<synchronous>, transform_indices = @transform_5, window_bounds = array<i64: 1, 128>}, {pipeline_mode = #tpu.pipeline_mode<synchronous>, transform_indices = @transform_6, window_bounds = array<i64: 1, 128>}, {transform_indices = @transform_7, window_bounds = array<i64: 1, 16, 16, 128>}]} {
    %c0 = arith.constant 0 : index
    %c0_0 = arith.constant 0 : index
    %c0_1 = arith.constant 0 : index
    %c0_2 = arith.constant 0 : index
    %0 = vector.load %arg1[%c0, %c0_0, %c0_1, %c0_2] : memref<1x16x16x128xbf16, #tpu.memory_space<vmem>>, vector<1x16x16x128xbf16>
    %1 = vector.shape_cast %0 : vector<1x16x16x128xbf16> to vector<16x16x128xbf16>
    %2 = vector.shape_cast %1 : vector<16x16x128xbf16> to vector<256x128xbf16>
    %c0_3 = arith.constant 0 : index
    %c0_4 = arith.constant 0 : index
    %3 = vector.load %arg2[%c0_3, %c0_4] : memref<128x128xbf16, #tpu.memory_space<vmem>>, vector<128x128xbf16>
    %cst = arith.constant dense<0.000000e+00> : vector<256x128xf32>
    %4 = tpu.matmul %2, %3, %cst {dimension_numbers = #tpu.dot_dimension_numbers<[1], [0], [0], [1], [0, 0, 1, 1], [], []>} : vector<256x128xbf16>, vector<128x128xbf16>, vector<256x128xf32> -> vector<256x128xf32>
    %c0_5 = arith.constant 0 : index
    %c0_6 = arith.constant 0 : index
    %5 = vector.load %arg5[%c0_5, %c0_6] : memref<1x128xf32, #tpu.memory_space<vmem>>, vector<1x128xf32>
    %6 = vector.broadcast %5 : vector<1x128xf32> to vector<256x128xf32>
    %7 = arith.addf %4, %6 : vector<256x128xf32>
    %cst_7 = arith.constant 0.000000e+00 : f32
    %8 = vector.broadcast %cst_7 : f32 to vector<256x128xf32>
    %9 = arith.maximumf %7, %8 : vector<256x128xf32>
    %10 = arith.truncf %9 : vector<256x128xf32> to vector<256x128xbf16>
    %11 = vector.shape_cast %10 : vector<256x128xbf16> to vector<16x16x128xbf16>
    %c1 = arith.constant 1 : index
    %c1_8 = arith.constant 1 : index
    %c0_9 = arith.constant 0 : index
    %12 = vector.load %arg9[%c1, %c1_8, %c0_9] : memref<18x18x128xbf16, #tpu.memory_space<vmem>>, vector<16x16x128xbf16>
    tpu.vector_store %arg9[%c1, %c1_8, %c0_9], %11 {strides = array<i32>} : memref<18x18x128xbf16, #tpu.memory_space<vmem>>, vector<16x16x128xbf16>,
    %cst_10 = arith.constant 0.000000e+00 : bf16
    %13 = vector.broadcast %cst_10 : bf16 to vector<1x18x128xbf16>
    %cst_11 = arith.constant 0.000000e+00 : bf16
    %14 = vector.broadcast %cst_11 : bf16 to vector<16x1x128xbf16>
    %c0_12 = arith.constant 0 : index
    %c0_13 = arith.constant 0 : index
    %c0_14 = arith.constant 0 : index
    %15 = vector.load %arg9[%c0_12, %c0_13, %c0_14] : memref<18x18x128xbf16, #tpu.memory_space<vmem>>, vector<1x18x128xbf16>
    tpu.vector_store %arg9[%c0_12, %c0_13, %c0_14], %13 {strides = array<i32>} : memref<18x18x128xbf16, #tpu.memory_space<vmem>>, vector<1x18x128xbf16>,
    %c17 = arith.constant 17 : index
    %c0_15 = arith.constant 0 : index
    %c0_16 = arith.constant 0 : index
    %16 = vector.load %arg9[%c17, %c0_15, %c0_16] : memref<18x18x128xbf16, #tpu.memory_space<vmem>>, vector<1x18x128xbf16>
    tpu.vector_store %arg9[%c17, %c0_15, %c0_16], %13 {strides = array<i32>} : memref<18x18x128xbf16, #tpu.memory_space<vmem>>, vector<1x18x128xbf16>,
    %c1_17 = arith.constant 1 : index
    %c0_18 = arith.constant 0 : index
    %c0_19 = arith.constant 0 : index
    %17 = vector.load %arg9[%c1_17, %c0_18, %c0_19] : memref<18x18x128xbf16, #tpu.memory_space<vmem>>, vector<16x1x128xbf16>
    tpu.vector_store %arg9[%c1_17, %c0_18, %c0_19], %14 {strides = array<i32>} : memref<18x18x128xbf16, #tpu.memory_space<vmem>>, vector<16x1x128xbf16>,
    %c1_20 = arith.constant 1 : index
    %c17_21 = arith.constant 17 : index
    %c0_22 = arith.constant 0 : index
    %18 = vector.load %arg9[%c1_20, %c17_21, %c0_22] : memref<18x18x128xbf16, #tpu.memory_space<vmem>>, vector<16x1x128xbf16>
    tpu.vector_store %arg9[%c1_20, %c17_21, %c0_22], %14 {strides = array<i32>} : memref<18x18x128xbf16, #tpu.memory_space<vmem>>, vector<16x1x128xbf16>,
    %c0_23 = arith.constant 0 : index
    %c0_24 = arith.constant 0 : index
    %c0_25 = arith.constant 0 : index
    %19 = vector.load %arg9[%c0_23, %c0_24, %c0_25] : memref<18x18x128xbf16, #tpu.memory_space<vmem>>, vector<16x16x128xbf16>
    %20 = vector.shape_cast %19 : vector<16x16x128xbf16> to vector<256x128xbf16>
    %c0_26 = arith.constant 0 : index
    %c0_27 = arith.constant 0 : index
    %c0_28 = arith.constant 0 : index
    %21 = vector.load %arg3[%c0_26, %c0_27, %c0_28] : memref<9x128x128xbf16, #tpu.memory_space<vmem>>, vector<1x128x128xbf16>
    %22 = vector.shape_cast %21 : vector<1x128x128xbf16> to vector<128x128xbf16>
    %cst_29 = arith.constant dense<0.000000e+00> : vector<256x128xf32>
    %23 = tpu.matmul %20, %22, %cst_29 {dimension_numbers = #tpu.dot_dimension_numbers<[1], [0], [0], [1], [0, 0, 1, 1], [], []>} : vector<256x128xbf16>, vector<128x128xbf16>, vector<256x128xf32> -> vector<256x128xf32>
    %c0_30 = arith.constant 0 : index
    %c1_31 = arith.constant 1 : index
    %c0_32 = arith.constant 0 : index
    %24 = vector.load %arg9[%c0_30, %c1_31, %c0_32] : memref<18x18x128xbf16, #tpu.memory_space<vmem>>, vector<16x16x128xbf16>
    %25 = vector.shape_cast %24 : vector<16x16x128xbf16> to vector<256x128xbf16>
    %c1_33 = arith.constant 1 : index
    %c0_34 = arith.constant 0 : index
    %c0_35 = arith.constant 0 : index
    %26 = vector.load %arg3[%c1_33, %c0_34, %c0_35] : memref<9x128x128xbf16, #tpu.memory_space<vmem>>, vector<1x128x128xbf16>
    %27 = vector.shape_cast %26 : vector<1x128x128xbf16> to vector<128x128xbf16>
    %cst_36 = arith.constant dense<0.000000e+00> : vector<256x128xf32>
    %28 = tpu.matmul %25, %27, %cst_36 {dimension_numbers = #tpu.dot_dimension_numbers<[1], [0], [0], [1], [0, 0, 1, 1], [], []>} : vector<256x128xbf16>, vector<128x128xbf16>, vector<256x128xf32> -> vector<256x128xf32>
    %29 = arith.addf %23, %28 : vector<256x128xf32>
    %c0_37 = arith.constant 0 : index
    %c2 = arith.constant 2 : index
    %c0_38 = arith.constant 0 : index
    %30 = vector.load %arg9[%c0_37, %c2, %c0_38] : memref<18x18x128xbf16, #tpu.memory_space<vmem>>, vector<16x16x128xbf16>
    %31 = vector.shape_cast %30 : vector<16x16x128xbf16> to vector<256x128xbf16>
    %c2_39 = arith.constant 2 : index
    %c0_40 = arith.constant 0 : index
    %c0_41 = arith.constant 0 : index
    %32 = vector.load %arg3[%c2_39, %c0_40, %c0_41] : memref<9x128x128xbf16, #tpu.memory_space<vmem>>, vector<1x128x128xbf16>
    %33 = vector.shape_cast %32 : vector<1x128x128xbf16> to vector<128x128xbf16>
    %cst_42 = arith.constant dense<0.000000e+00> : vector<256x128xf32>
    %34 = tpu.matmul %31, %33, %cst_42 {dimension_numbers = #tpu.dot_dimension_numbers<[1], [0], [0], [1], [0, 0, 1, 1], [], []>} : vector<256x128xbf16>, vector<128x128xbf16>, vector<256x128xf32> -> vector<256x128xf32>
    %35 = arith.addf %29, %34 : vector<256x128xf32>
    %c1_43 = arith.constant 1 : index
    %c0_44 = arith.constant 0 : index
    %c0_45 = arith.constant 0 : index
    %36 = vector.load %arg9[%c1_43, %c0_44, %c0_45] : memref<18x18x128xbf16, #tpu.memory_space<vmem>>, vector<16x16x128xbf16>
    %37 = vector.shape_cast %36 : vector<16x16x128xbf16> to vector<256x128xbf16>
    %c3 = arith.constant 3 : index
    %c0_46 = arith.constant 0 : index
    %c0_47 = arith.constant 0 : index
    %38 = vector.load %arg3[%c3, %c0_46, %c0_47] : memref<9x128x128xbf16, #tpu.memory_space<vmem>>, vector<1x128x128xbf16>
    %39 = vector.shape_cast %38 : vector<1x128x128xbf16> to vector<128x128xbf16>
    %cst_48 = arith.constant dense<0.000000e+00> : vector<256x128xf32>
    %40 = tpu.matmul %37, %39, %cst_48 {dimension_numbers = #tpu.dot_dimension_numbers<[1], [0], [0], [1], [0, 0, 1, 1], [], []>} : vector<256x128xbf16>, vector<128x128xbf16>, vector<256x128xf32> -> vector<256x128xf32>
    %41 = arith.addf %35, %40 : vector<256x128xf32>
    %c1_49 = arith.constant 1 : index
    %c1_50 = arith.constant 1 : index
    %c0_51 = arith.constant 0 : index
    %42 = vector.load %arg9[%c1_49, %c1_50, %c0_51] : memref<18x18x128xbf16, #tpu.memory_space<vmem>>, vector<16x16x128xbf16>
    %43 = vector.shape_cast %42 : vector<16x16x128xbf16> to vector<256x128xbf16>
    %c4 = arith.constant 4 : index
    %c0_52 = arith.constant 0 : index
    %c0_53 = arith.constant 0 : index
    %44 = vector.load %arg3[%c4, %c0_52, %c0_53] : memref<9x128x128xbf16, #tpu.memory_space<vmem>>, vector<1x128x128xbf16>
    %45 = vector.shape_cast %44 : vector<1x128x128xbf16> to vector<128x128xbf16>
    %cst_54 = arith.constant dense<0.000000e+00> : vector<256x128xf32>
    %46 = tpu.matmul %43, %45, %cst_54 {dimension_numbers = #tpu.dot_dimension_numbers<[1], [0], [0], [1], [0, 0, 1, 1], [], []>} : vector<256x128xbf16>, vector<128x128xbf16>, vector<256x128xf32> -> vector<256x128xf32>
    %47 = arith.addf %41, %46 : vector<256x128xf32>
    %c1_55 = arith.constant 1 : index
    %c2_56 = arith.constant 2 : index
    %c0_57 = arith.constant 0 : index
    %48 = vector.load %arg9[%c1_55, %c2_56, %c0_57] : memref<18x18x128xbf16, #tpu.memory_space<vmem>>, vector<16x16x128xbf16>
    %49 = vector.shape_cast %48 : vector<16x16x128xbf16> to vector<256x128xbf16>
    %c5 = arith.constant 5 : index
    %c0_58 = arith.constant 0 : index
    %c0_59 = arith.constant 0 : index
    %50 = vector.load %arg3[%c5, %c0_58, %c0_59] : memref<9x128x128xbf16, #tpu.memory_space<vmem>>, vector<1x128x128xbf16>
    %51 = vector.shape_cast %50 : vector<1x128x128xbf16> to vector<128x128xbf16>
    %cst_60 = arith.constant dense<0.000000e+00> : vector<256x128xf32>
    %52 = tpu.matmul %49, %51, %cst_60 {dimension_numbers = #tpu.dot_dimension_numbers<[1], [0], [0], [1], [0, 0, 1, 1], [], []>} : vector<256x128xbf16>, vector<128x128xbf16>, vector<256x128xf32> -> vector<256x128xf32>
    %53 = arith.addf %47, %52 : vector<256x128xf32>
    %c2_61 = arith.constant 2 : index
    %c0_62 = arith.constant 0 : index
    %c0_63 = arith.constant 0 : index
    %54 = vector.load %arg9[%c2_61, %c0_62, %c0_63] : memref<18x18x128xbf16, #tpu.memory_space<vmem>>, vector<16x16x128xbf16>
    %55 = vector.shape_cast %54 : vector<16x16x128xbf16> to vector<256x128xbf16>
    %c6 = arith.constant 6 : index
    %c0_64 = arith.constant 0 : index
    %c0_65 = arith.constant 0 : index
    %56 = vector.load %arg3[%c6, %c0_64, %c0_65] : memref<9x128x128xbf16, #tpu.memory_space<vmem>>, vector<1x128x128xbf16>
    %57 = vector.shape_cast %56 : vector<1x128x128xbf16> to vector<128x128xbf16>
    %cst_66 = arith.constant dense<0.000000e+00> : vector<256x128xf32>
    %58 = tpu.matmul %55, %57, %cst_66 {dimension_numbers = #tpu.dot_dimension_numbers<[1], [0], [0], [1], [0, 0, 1, 1], [], []>} : vector<256x128xbf16>, vector<128x128xbf16>, vector<256x128xf32> -> vector<256x128xf32>
    %59 = arith.addf %53, %58 : vector<256x128xf32>
    %c2_67 = arith.constant 2 : index
    %c1_68 = arith.constant 1 : index
    %c0_69 = arith.constant 0 : index
    %60 = vector.load %arg9[%c2_67, %c1_68, %c0_69] : memref<18x18x128xbf16, #tpu.memory_space<vmem>>, vector<16x16x128xbf16>
    %61 = vector.shape_cast %60 : vector<16x16x128xbf16> to vector<256x128xbf16>
    %c7 = arith.constant 7 : index
    %c0_70 = arith.constant 0 : index
    %c0_71 = arith.constant 0 : index
    %62 = vector.load %arg3[%c7, %c0_70, %c0_71] : memref<9x128x128xbf16, #tpu.memory_space<vmem>>, vector<1x128x128xbf16>
    %63 = vector.shape_cast %62 : vector<1x128x128xbf16> to vector<128x128xbf16>
    %cst_72 = arith.constant dense<0.000000e+00> : vector<256x128xf32>
    %64 = tpu.matmul %61, %63, %cst_72 {dimension_numbers = #tpu.dot_dimension_numbers<[1], [0], [0], [1], [0, 0, 1, 1], [], []>} : vector<256x128xbf16>, vector<128x128xbf16>, vector<256x128xf32> -> vector<256x128xf32>
    %65 = arith.addf %59, %64 : vector<256x128xf32>
    %c2_73 = arith.constant 2 : index
    %c2_74 = arith.constant 2 : index
    %c0_75 = arith.constant 0 : index
    %66 = vector.load %arg9[%c2_73, %c2_74, %c0_75] : memref<18x18x128xbf16, #tpu.memory_space<vmem>>, vector<16x16x128xbf16>
    %67 = vector.shape_cast %66 : vector<16x16x128xbf16> to vector<256x128xbf16>
    %c8 = arith.constant 8 : index
    %c0_76 = arith.constant 0 : index
    %c0_77 = arith.constant 0 : index
    %68 = vector.load %arg3[%c8, %c0_76, %c0_77] : memref<9x128x128xbf16, #tpu.memory_space<vmem>>, vector<1x128x128xbf16>
    %69 = vector.shape_cast %68 : vector<1x128x128xbf16> to vector<128x128xbf16>
    %cst_78 = arith.constant dense<0.000000e+00> : vector<256x128xf32>
    %70 = tpu.matmul %67, %69, %cst_78 {dimension_numbers = #tpu.dot_dimension_numbers<[1], [0], [0], [1], [0, 0, 1, 1], [], []>} : vector<256x128xbf16>, vector<128x128xbf16>, vector<256x128xf32> -> vector<256x128xf32>
    %71 = arith.addf %65, %70 : vector<256x128xf32>
    %c0_79 = arith.constant 0 : index
    %c0_80 = arith.constant 0 : index
    %72 = vector.load %arg6[%c0_79, %c0_80] : memref<1x128xf32, #tpu.memory_space<vmem>>, vector<1x128xf32>
    %73 = vector.broadcast %72 : vector<1x128xf32> to vector<256x128xf32>
    %74 = arith.addf %71, %73 : vector<256x128xf32>
    %cst_81 = arith.constant 0.000000e+00 : f32
    %75 = vector.broadcast %cst_81 : f32 to vector<256x128xf32>
    %76 = arith.maximumf %74, %75 : vector<256x128xf32>
    %77 = arith.truncf %76 : vector<256x128xf32> to vector<256x128xbf16>
    %78 = vector.shape_cast %1 : vector<16x16x128xbf16> to vector<256x128xbf16>
    %79 = tpu.concatenate %77, %78 in 1 : vector<256x128xbf16>, vector<256x128xbf16> -> vector<256x256xbf16>
    %c0_82 = arith.constant 0 : index
    %c0_83 = arith.constant 0 : index
    %80 = vector.load %arg4[%c0_82, %c0_83] : memref<256x128xbf16, #tpu.memory_space<vmem>>, vector<256x128xbf16>
    %cst_84 = arith.constant dense<0.000000e+00> : vector<256x128xf32>
    %81 = tpu.matmul %79, %80, %cst_84 {dimension_numbers = #tpu.dot_dimension_numbers<[1], [0], [0], [1], [0, 0, 1, 1], [], []>} : vector<256x256xbf16>, vector<256x128xbf16>, vector<256x128xf32> -> vector<256x128xf32>
    %c0_85 = arith.constant 0 : index
    %c0_86 = arith.constant 0 : index
    %82 = vector.load %arg7[%c0_85, %c0_86] : memref<1x128xf32, #tpu.memory_space<vmem>>, vector<1x128xf32>
    %83 = vector.broadcast %82 : vector<1x128xf32> to vector<256x128xf32>
    %84 = arith.addf %81, %83 : vector<256x128xf32>
    %cst_87 = arith.constant 0.000000e+00 : f32
    %85 = vector.broadcast %cst_87 : f32 to vector<256x128xf32>
    %86 = arith.maximumf %84, %85 : vector<256x128xf32>
    %87 = vector.shape_cast %86 : vector<256x128xf32> to vector<16x16x128xf32>
    %88 = arith.truncf %87 : vector<16x16x128xf32> to vector<16x16x128xbf16>
    %c0_88 = arith.constant 0 : index
    %c0_89 = arith.constant 0 : index
    %c0_90 = arith.constant 0 : index
    %c0_91 = arith.constant 0 : index
    %89 = vector.load %arg8[%c0_88, %c0_89, %c0_90, %c0_91] : memref<1x16x16x128xbf16, #tpu.memory_space<vmem>>, vector<1x16x16x128xbf16>
    %90 = vector.shape_cast %89 : vector<1x16x16x128xbf16> to vector<16x16x128xbf16>
    %91 = vector.shape_cast %88 : vector<16x16x128xbf16> to vector<1x16x16x128xbf16>
    tpu.vector_store %arg8[%c0_88, %c0_89, %c0_90, %c0_91], %91 {strides = array<i32>} : memref<1x16x16x128xbf16, #tpu.memory_space<vmem>>, vector<1x16x16x128xbf16>,
    return
  }
  func.func @transform_0(%arg0: i32) -> (i32, i32, i32, i32) {
    %c0_i32 = arith.constant 0 : i32
    %c0_i32_0 = arith.constant 0 : i32
    %c0_i32_1 = arith.constant 0 : i32
    %c0_i32_2 = arith.constant 0 : i32
    return %arg0, %c0_i32, %c0_i32_0, %c0_i32_1 : i32, i32, i32, i32
  }
  func.func @transform_1(%arg0: i32) -> (i32, i32) {
    %c0_i32 = arith.constant 0 : i32
    %c0_i32_0 = arith.constant 0 : i32
    %c0_i32_1 = arith.constant 0 : i32
    return %c0_i32, %c0_i32_0 : i32, i32
  }
  func.func @transform_2(%arg0: i32) -> (i32, i32, i32) {
    %c0_i32 = arith.constant 0 : i32
    %c0_i32_0 = arith.constant 0 : i32
    %c0_i32_1 = arith.constant 0 : i32
    %c0_i32_2 = arith.constant 0 : i32
    return %c0_i32, %c0_i32_0, %c0_i32_1 : i32, i32, i32
  }
  func.func @transform_3(%arg0: i32) -> (i32, i32) {
    %c0_i32 = arith.constant 0 : i32
    %c0_i32_0 = arith.constant 0 : i32
    %c0_i32_1 = arith.constant 0 : i32
    return %c0_i32, %c0_i32_0 : i32, i32
  }
  func.func @transform_4(%arg0: i32) -> (i32, i32) {
    %c0_i32 = arith.constant 0 : i32
    %c0_i32_0 = arith.constant 0 : i32
    %c0_i32_1 = arith.constant 0 : i32
    return %c0_i32, %c0_i32_0 : i32, i32
  }
  func.func @transform_5(%arg0: i32) -> (i32, i32) {
    %c0_i32 = arith.constant 0 : i32
    %c0_i32_0 = arith.constant 0 : i32
    %c0_i32_1 = arith.constant 0 : i32
    return %c0_i32, %c0_i32_0 : i32, i32
  }
  func.func @transform_6(%arg0: i32) -> (i32, i32) {
    %c0_i32 = arith.constant 0 : i32
    %c0_i32_0 = arith.constant 0 : i32
    %c0_i32_1 = arith.constant 0 : i32
    return %c0_i32, %c0_i32_0 : i32, i32
  }
  func.func @transform_7(%arg0: i32) -> (i32, i32, i32, i32) {
    %c0_i32 = arith.constant 0 : i32
    %c0_i32_0 = arith.constant 0 : i32
    %c0_i32_1 = arith.constant 0 : i32
    %c0_i32_2 = arith.constant 0 : i32
    return %arg0, %c0_i32, %c0_i32_0, %c0_i32_1 : i32, i32, i32, i32
  }
}

</mosaic_0001>

<bundles_post_ra>
// kernel: basic_block_forward.1
= control target key start
LH: loop header
LB: loop body
LE: loop exit
PB: predicated region body
PF: predicated region fallthrough
CT: control target
= control target key end

     0   :  { %s8496_s24 = smov 0   ;;  %s11298_s0 = inlined_call_operand.vmem [shape: bf16[2,16,16,128], index: 0, kind: input, shape index: {}]   ;;  %s11299_s1 = inlined_call_operand.vmem [shape: bf16[128,128], index: 1, kind: input, shape index: {}]   ;;  %s11300_s2 = inlined_call_operand.vmem [shape: bf16[9,128,128], index: 2, kind: input, shape index: {}]   ;;  %s11301_s3 = inlined_call_operand.vmem [shape: bf16[256,128], index: 3, kind: input, shape index: {}]   ;;  %s11302_s4 = inlined_call_operand.vmem [shape: f32[1,128], index: 4, kind: input, shape index: {}]   ;;  %s11303_s5 = inlined_call_operand.vmem [shape: f32[1,128], index: 5, kind: input, shape index: {}]   ;;  %s11304_s6 = inlined_call_operand.vmem [shape: f32[1,128], index: 6, kind: input, shape index: {}]   ;;  %s11305_s7 = inlined_call_operand.vmem [shape: bf16[2,16,16,128], index: 7, kind: output, shape index: {}]  }
   0x1 LB: > { %s6751_s25 = sadd.s32 4294967295, %s8453_s24   ;;  %p6755_p0 = scmp.ge.s32.totalorder %s8453_s24, 1  ;;  %s8453_s24 = sphi %s8496_s24, %s17_s24  }
   0x2   : > { %p237_p1 = scmp.lt.s32.totalorder %s8453_s24, 3 }
   0x4   : > { %p238_p2 = pnand %p6755_p0, %p237_p1 }
   0x6   : > { %241 = sbr.rel (%p238_p2) target bundleno = 1144 (0x478), region = 48 }
   0xb   : > { %v8263_v0 = vld [vmem:[%s11299_s1 + $0x38] sm:$0xff]   ;;  %p269_p3 = scmp.lt.s32.totalorder %s6751_s25, 1  ;;  %v8264_v1 = vld [vmem:[%s11299_s1 + $0x30] sm:$0xff]   ;;  %v8265_v2 = vld [vmem:[%s11299_s1 + $0x28] sm:$0xff]   ;;  %v8455_v37 = vmov 0   ;;  %vm1092_vm3 = vcmask 1043456  }
   0xc   : > { %7774 = vmatprep.subr.bf16.mxu1 %v8263_v0  ;;  %v8266_v3 = vld [vmem:[%s11299_s1 + $0x20] sm:$0xff]   ;;  %v8267_v5 = vld [vmem:[%s11299_s1 + $0x18] sm:$0xff]   ;;  %v8268_v6 = vld [vmem:[%s11299_s1 + $0x10] sm:$0xff]   ;;  %1209 = vst [vmem:[#allocation2] sm:$0xf] %v8455_v37  ;;  %vm1099_vm6 = vcmask 1040384  }
   0xd   : > { %s11417_s25 = smov (!%p269_p3, %s6751_s25), 1  ;;  %7775 = vmatpush3.bf16.msra.mxu1 %v8263_v0  ;;  %v8269_v7 = vld [vmem:[%s11299_s1 + $0x8] sm:$0xff]   ;;  %v8270_v8 = vld [vmem:[%s11299_s1] sm:$0xff]   ;;  %v8287_v9 = vld [vmem:[%s11300_s2 + $0x78] sm:$0xff]   ;;  %1210 = vst [vmem:[#allocation2 + $0x4] sm:$0xf] %v8455_v37 }
   0xe   : > { %7776 = vmatprep.subr.bf16.mxu1 %v8264_v1  ;;  %s7261_s9 = sshll.u32 %s11417_s25, 7  ;;  %v8288_v12 = vld [vmem:[%s11300_s2 + $0x70] sm:$0xff]   ;;  %v8289_v13 = vld [vmem:[%s11300_s2 + $0x68] sm:$0xff]   ;;  %v8291_v27 = vld [vmem:[%s11300_s2 + $0x38] sm:$0xff]   ;;  %1211 = vst [vmem:[#allocation2 + $0x8] sm:$0x1] %v8455_v37 }
   0xf   : > { %s8521_s12 = scalar_lea.vmem %s11298_s0, %s7261_s9  ;;  %7870 = vmatprep.subr.bf16.mxu0 %v8291_v27  ;;  %v8292_v28 = vld [vmem:[%s11300_s2 + $0x30] sm:$0xff]   ;;  %v8294_v29 = vld [vmem:[%s11300_s2 + $0x28] sm:$0xff]   ;;  %v8295_v30 = vld [vmem:[%s11300_s2 + $0x20] sm:$0xff]   ;;  %1213 = vst [vmem:[#allocation2 + $0xcc] sm:$0xf] %v8455_v37  ;;  %vm2407_vm12 = vcmask 1042432   ;;  %s11247_s18 = scalar_lea.vmem %s11305_s7, %s7261_s9 }
  0x10   : > { %v8271_v4 = vld [vmem:[%s8521_s12] sm:$0xff]   ;;  %v8272_v10 = vld [vmem:[%s8521_s12 + $0x8] sm:$0xff]   ;;  %v8273_v11 = vld [vmem:[%s8521_s12 + $0x10] sm:$0xff]   ;;  %7871 = vmatpush3.bf16.msra.mxu0 %v8291_v27  ;;  %1214 = vst [vmem:[#allocation2 + $0xd0] sm:$0xf] %v8455_v37  ;;  %vm2408_vm13 = vcmask 1046532  }
  0x11   : > { %7777 = vmatpush3.bf16.msra.mxu1 %v8264_v1  ;;  %7790 = vmatprep.mubr.bf16.mxu1 %v8271_v4  ;;  %v8274_v14 = vld [vmem:[%s8521_s12 + $0x18] sm:$0xff]   ;;  %v8275_v15 = vld [vmem:[%s8521_s12 + $0x20] sm:$0xff]   ;;  %v8276_v16 = vld [vmem:[%s8521_s12 + $0x28] sm:$0xff]   ;;  %1215 = vst [vmem:[#allocation2 + $0xd4] sm:$0x1] %v8455_v37 }
  0x12   : > { %7778 = vmatprep.subr.bf16.mxu1 %v8265_v2  ;;  %v8277_v17 = vld [vmem:[%s8521_s12 + $0x30] sm:$0xff]   ;;  %v8278_v18 = vld [vmem:[%s8521_s12 + $0x38] sm:$0xff]   ;;  %v8279_v19 = vld [vmem:[%s8521_s12 + $0x40] sm:$0xff]   ;;  %7872 = vmatprep.subr.bf16.mxu0 %v8292_v28  ;;  %vm1377_vm0 = vsmask.f32 3328 }
  0x13   : > { %v8280_v20 = vld [vmem:[%s8521_s12 + $0x48] sm:$0xff]   ;;  %v8281_v21 = vld [vmem:[%s8521_s12 + $0x50] sm:$0xff]   ;;  %v8282_v22 = vld [vmem:[%s8521_s12 + $0x58] sm:$0xff]   ;;  %vm1378_vm1 = vsmask.f32 7440 }
  0x14   : > { %v8283_v23 = vld [vmem:[%s8521_s12 + $0x60] sm:$0xff]   ;;  %v8284_v24 = vld [vmem:[%s8521_s12 + $0x68] sm:$0xff]   ;;  %v8285_v25 = vld [vmem:[%s8521_s12 + $0x70] sm:$0xff]   ;;  %7873 = vmatpush3.bf16.msra.mxu0 %v8292_v28  ;;  %vm1093_vm4 = vsmask.f32 7938 }
  0x15   : > { %7779 = vmatpush3.bf16.msra.mxu1 %v8265_v2  ;;  %v8286_v26 = vld [vmem:[%s8521_s12 + $0x78] sm:$0xff]   ;;  %7874 = vmatprep.subr.bf16.mxu0 %v8294_v29  ;;  %v8290_v32 = vld [vmem:[%s11300_s2 + $0x60] sm:$0xff]   ;;  %v8298_v34 = vld [vmem:[%s11300_s2 + $0x10] sm:$0xff]   ;;  %vm768_vm5 = vsmask.f32 256 }
  0x16   : > { %7780 = vmatprep.subr.bf16.mxu1 %v8266_v3  ;;  %v8297_v31 = vld [vmem:[%s11300_s2 + $0x18] sm:$0xff]   ;;  %v8300_v35 = vld [vmem:[%s11300_s2 + $0x8] sm:$0xff]   ;;  %v8296_v36 = vld [vmem:[%s11300_s2 + $0x50] sm:$0xff]   ;;  %vm769_vm8 = vsmask.f32 4368 }
  0x17   : > { %v8293_v33 = vld [vmem:[%s11300_s2 + $0x58] sm:$0xff]   ;;  %v8301_v38 = vld [vmem:[%s11300_s2] sm:$0xff]   ;;  %v8299_v39 = vld [vmem:[%s11300_s2 + $0x48] sm:$0xff]  }
  0x18   : > { %7875 = vmatpush3.bf16.msra.mxu0 %v8294_v29  ;;  %v1313_v40 = vld [vmem:[#allocation2] sm:$0xf]  ;;  %v8599_v41 = vld [vmem:[#allocation2 + $0x4] sm:$0xf]  ;;  %v1361_v53 = vld [vmem:[#allocation2 + $0x8] sm:$0x1] }
  0x19   : > { %7781 = vmatpush3.bf16.msra.mxu1 %v8266_v3  ;;  %7876 = vmatprep.subr.bf16.mxu0 %v8295_v30  ;;  %v6857_v42 = vcombine.low %v1313_v40, %v8599_v41  ;;  %v8303_v43 = vld [vmem:[%s11300_s2 + $0x40] sm:$0xff]   ;;  %v1381_v44 = vshrl.u32 %v1313_v40, 16  ;;  %v1384_v45 = vshll.u32 %v1313_v40, 16  ;;  %v1390_v48 = vshll.u32 %v8599_v41, 16  ;;  %vm8607_vm2 = vmor %vm1377_vm0, %vm1378_vm1  ;;  %v8618_v63 = vld [vmem:[%s11300_s2 + $0xb8] sm:$0xff]  }
  0x1a   : > { %7782 = vmatprep.subr.bf16.mxu1 %v8267_v5  ;;  %v1394_v49 = vshrl.u32 %v8599_v41, 16  ;;  %v1400_v56 = vshll.u32 %v1361_v53, 16  ;;  %v8624_v0 = vld [vmem:[%s11302_s4] ss:$0 sm:$0xff]  ;;  %vm8637_vm7 = vmand %vm1092_vm3, %vm1093_vm4 }
  0x1b   : > { %7886 = vmatprep.mubr.bf16.mxu0 %v6857_v42  ;;  %v1383_v46 = vrot.slane %v1381_v44, 4  ;;  %v1386_v47 = vrot.slane %v1384_v45, 5  ;;  %v1392_v51 = vrot.slane %v1390_v48, 5  ;;  %vm8646_vm9 = vmand %vm1099_vm6, %vm768_vm5  ;;  %v1108_v44 = vld [vmem:[#allocation2 + $0x20] sm:$0x1] }
  0x1c   : > { %7877 = vmatpush3.bf16.msra.mxu0 %v8295_v30  ;;  %v1396_v52 = vrot.slane %v1394_v49, 4  ;;  %v1402_v59 = vrot.slane %v1400_v56, 5  ;;  %vm8654_vm10 = vmor %vm768_vm5, %vm769_vm8 }
  0x1d   : > { %7783 = vmatpush3.bf16.msra.mxu1 %v8267_v5  ;;  %7878 = vmatprep.subr.bf16.mxu0 %v8297_v31  ;;  %v1387_v50 = vor.u32 %v1386_v47, %v1383_v46  ;;  %vm8678_vm11 = vmand %vm1099_vm6, %vm1093_vm4 }
  0x1e   : > { %7784 = vmatprep.subr.bf16.mxu1 %v8268_v6  ;;  %v1397_v55 = vor.u32 %v1396_v52, %v1392_v51  ;;  %vm9250_vm14 = vmor %vm2407_vm12, %vm2408_vm13 }
  0x1f   : > { %v1388_v54 = vrot.slane %v1387_v50, 4 }
  0x20   : > { %7879 = vmatpush3.bf16.msra.mxu0 %v8297_v31  ;;  %v1398_v58 = vrot.slane %v1397_v55, 4  ;;  %v1095_v31 = vld [vmem:[#allocation2 + $0xc] sm:$0xf] }
  0x21   : > { %7785 = vmatpush3.bf16.msra.mxu1 %v8268_v6  ;;  %7880 = vmatprep.subr.bf16.mxu0 %v8298_v34  ;;  %v1393_v60 = vsel %vm8607_vm2, %v1388_v54, %v1392_v51 }
  0x22   : > { %7786 = vmatprep.subr.bf16.mxu1 %v8269_v7  ;;  %v1403_v61 = vsel %vm8607_vm2, %v1398_v58, %v1402_v59 }
  0x23   : > { %v6833_v62 = vcombine.low %v1393_v60, %v1403_v61 }
  0x24   : > { %7881 = vmatpush3.bf16.msra.mxu0 %v8298_v34 }
  0x25   : > { %7787 = vmatpush3.bf16.msra.mxu1 %v8269_v7  ;;  %7882 = vmatprep.subr.bf16.mxu0 %v8300_v35 }
  0x26   : > { %7788 = vmatprep.subr.bf16.mxu1 %v8270_v8 }
  0x28   : > { %7883 = vmatpush3.bf16.msra.mxu0 %v8300_v35 }
  0x29   : > { %7789 = vmatpush3.bf16.msra.mxu1 %v8270_v8  ;;  %7884 = vmatprep.subr.bf16.mxu0 %v8301_v38 }
  0x2a   : > { %7822 = vmatprep.subr.bf16.mxu1 %v8287_v9 }
  0x2c   : > { %7791 = vmatmul.mubr.bf16.vlgmr.msra.gmra.mxu1 %v8272_v10  ;;  %7885 = vmatpush3.bf16.msra.mxu0 %v8301_v38 }
  0x2d   : > { %7794 = vmatprep.mubr.bf16.mxu1 %v8273_v11  ;;  %7823 = vmatpush3.bf16.msra.mxu1 %v8287_v9 }
  0x2e   : > { %7824 = vmatprep.subr.bf16.mxu1 %v8288_v12 }
  0x31   : > { %7825 = vmatpush3.bf16.msra.mxu1 %v8288_v12 }
  0x32   : > { %7826 = vmatprep.subr.bf16.mxu1 %v8289_v13 }
  0x34   : > { %7795 = vmatmul.mubr.bf16.gmra.mxu1 %v8274_v14 }
  0x35   : > { %7798 = vmatprep.mubr.bf16.mxu1 %v8275_v15  ;;  %7827 = vmatpush3.bf16.msra.mxu1 %v8289_v13 }
  0x36   : > { %7828 = vmatprep.subr.bf16.mxu1 %v8290_v32 }
  0x39   : > { %7829 = vmatpush3.bf16.msra.mxu1 %v8290_v32 }
  0x3a   : > { %7830 = vmatprep.subr.bf16.mxu1 %v8293_v33 }
  0x3c   : > { %7799 = vmatmul.mubr.bf16.gmra.mxu1 %v8276_v16  ;;  %v8633_v16 = vld [vmem:[%s11300_s2 + $0xf8] sm:$0xff]  }
  0x3d   : > { %7802 = vmatprep.mubr.bf16.mxu1 %v8277_v17  ;;  %7831 = vmatpush3.bf16.msra.mxu1 %v8293_v33 }
  0x3e   : > { %7832 = vmatprep.subr.bf16.mxu1 %v8296_v36  ;;  %7966 = vmatprep.subr.bf16.mxu0 %v8633_v16 }
  0x41   : > { %7833 = vmatpush3.bf16.msra.mxu1 %v8296_v36 }
  0x42   : > { %7834 = vmatprep.subr.bf16.mxu1 %v8299_v39 }
  0x44   : > { %7803 = vmatmul.mubr.bf16.gmra.mxu1 %v8278_v18 }
  0x45   : > { %7806 = vmatprep.mubr.bf16.mxu1 %v8279_v19  ;;  %7835 = vmatpush3.bf16.msra.mxu1 %v8299_v39 }
  0x46   : > { %7836 = vmatprep.subr.bf16.mxu1 %v8303_v43 }
  0x49   : > { %7837 = vmatpush3.bf16.msra.mxu1 %v8303_v43 }
  0x4a   : > { %7918 = vmatprep.subr.bf16.mxu1 %v8618_v63 }
  0x4c   : > { %7807 = vmatmul.mubr.bf16.gmra.mxu1 %v8280_v20 }
  0x4d   : > { %7810 = vmatprep.mubr.bf16.mxu1 %v8281_v21 }
  0x54   : > { %7811 = vmatmul.mubr.bf16.gmra.mxu1 %v8282_v22  ;;  %v1104_v22 = vld [vmem:[#allocation2 + $0x18] sm:$0xf] }
  0x55   : > { %7814 = vmatprep.mubr.bf16.mxu1 %v8283_v23 }
  0x5c   : > { %7815 = vmatmul.mubr.bf16.gmra.mxu1 %v8284_v24 }
  0x5d   : > { %7818 = vmatprep.mubr.bf16.mxu1 %v8285_v25 }
  0x64   : > { %7819 = vmatmul.mubr.bf16.gmra.mxu1 %v8286_v26 }
  0x65   : > { %7838 = vmatprep.mubr.bf16.mxu1 %v6833_v62  ;;  %v1101_v62 = vld [vmem:[#allocation2 + $0x14] sm:$0x1] }
  0xec   : > { %v7792_v1 = vpop.f32.mrf.mxu1 }
  0xed   : > { %v522_v2 = vadd.f32 %v7792_v1, %v8624_v0 }
  0xee   : > { %v513_v3 = vpop.f32.mrf.mxu1 }
  0xef   : > { %v642_v4 = vmax.f32 %v522_v2, 0.0  ;;  %v514_v5 = vadd.f32 %v8624_v0, %v513_v3 }
  0xf0   : > { %v7793_v6 = vpop.f32.mrf.mxu1 }
  0xf1   : > { %v7265_v7 = vpack.c.bf16 %v642_v4, %v642_v4  ;;  %v640_v8 = vmax.f32 %v514_v5, 0.0  ;;  %v525_v9 = vadd.f32 %v7793_v6, %v8624_v0 }
  0xf2   : > { %v516_v10 = vpop.f32.mrf.mxu1 }
  0xf3   : > { %v789_v11 = vshrl.u32 %v7265_v7, 16  ;;  %v7263_v12 = vpack.c.bf16 %v640_v8, %v640_v8  ;;  %v643_v13 = vmax.f32 %v525_v9, 0.0  ;;  %v517_v14 = vadd.f32 %v8624_v0, %v516_v10  ;;  %v1118_v8 = vld [vmem:[#allocation2 + $0x30] sm:$0xf] }
  0xf4   : > { %v7796_v15 = vpop.f32.mrf.mxu1  ;;  %v792_v18 = vshll.u32 %v7265_v7, 16 }
  0xf5   : > { %v791_v17 = vrot.slane %v789_v11, 7  ;;  %v772_v19 = vshrl.u32 %v7263_v12, 16  ;;  %v7266_v20 = vpack.c.bf16 %v643_v13, %v643_v13  ;;  %v775_v23 = vshll.u32 %v7263_v12, 16 }
  0xf6   : > { %v641_v24 = vmax.f32 %v517_v14, 0.0  ;;  %v538_v25 = vadd.f32 %v7796_v15, %v8624_v0  ;;  %v529_v26 = vpop.f32.mrf.mxu1 }
  0xf7   : > { %v794_v27 = vor.u32 %v792_v18, %v791_v17  ;;  %v795_v28 = vrot.slane %v791_v17, 4  ;;  %v774_v29 = vrot.slane %v772_v19, 7  ;;  %v797_v30 = vshrl.u32 %v7266_v20, 16 }
  0xf8   : > { %v800_v32 = vshll.u32 %v7266_v20, 16  ;;  %v7264_v33 = vpack.c.bf16 %v641_v24, %v641_v24  ;;  %v646_v34 = vmax.f32 %v538_v25, 0.0  ;;  %v530_v35 = vadd.f32 %v8624_v0, %v529_v26  ;;  %v7797_v36 = vpop.f32.mrf.mxu1 }
  0xf9   : > { %v1105_v38 = vsel %vm8637_vm7, %v794_v27, %v1104_v22  ;;  %v777_v39 = vor.u32 %v775_v23, %v774_v29  ;;  %v778_v40 = vrot.slane %v774_v29, 4  ;;  %v799_v42 = vrot.slane %v797_v30, 7  ;;  %v1111_v27 = vld [vmem:[#allocation2 + $0x24] sm:$0xf] }
  0xfa   : > { %1106 = vst [vmem:[#allocation2 + $0x18] sm:$0xf] %v1105_v38  ;;  %v780_v45 = vshrl.u32 %v7264_v33, 16  ;;  %v783_v46 = vshll.u32 %v7264_v33, 16  ;;  %v7269_v47 = vpack.c.bf16 %v646_v34, %v646_v34  ;;  %v644_v48 = vmax.f32 %v530_v35, 0.0  ;;  %v532_v49 = vpop.f32.mrf.mxu1 }
  0xfb   : > { %v1096_v50 = vsel %vm8637_vm7, %v777_v39, %v1095_v31  ;;  %v802_v51 = vor.u32 %v800_v32, %v799_v42  ;;  %v804_v52 = vrot.slane %v799_v42, 4  ;;  %v541_v53 = vadd.f32 %v7797_v36, %v8624_v0  ;;  %v1122_v39 = vld [vmem:[#allocation2 + $0x38] sm:$0x1] }
  0xfc   : > { %1097 = vst [vmem:[#allocation2 + $0xc] sm:$0xf] %v1096_v50  ;;  %v782_v54 = vrot.slane %v780_v45, 7  ;;  %v823_v55 = vshrl.u32 %v7269_v47, 16  ;;  %v826_v56 = vshll.u32 %v7269_v47, 16  ;;  %v7267_v58 = vpack.c.bf16 %v644_v48, %v644_v48  ;;  %v7800_v59 = vpop.f32.mrf.mxu1 }
  0xfd   : > { %v803_v60 = vsel %vm8654_vm10, %v795_v28, %v802_v51  ;;  %v1109_v61 = vsel %vm8646_vm9, %v804_v52, %v1108_v44  ;;  %v647_v1 = vmax.f32 %v541_v53, 0.0  ;;  %v533_v2 = vadd.f32 %v8624_v0, %v532_v49  ;;  %v1115_v51 = vld [vmem:[#allocation2 + $0x2c] sm:$0x1] }
  0xfe   : > { %1107 = vst [vmem:[#allocation2 + $0x1c] sm:$0xf] %v803_v60  ;;  %1110 = vst [vmem:[#allocation2 + $0x20] sm:$0x1] %v1109_v61  ;;  %v785_v3 = vor.u32 %v783_v46, %v782_v54  ;;  %v787_v4 = vrot.slane %v782_v54, 4  ;;  %v825_v5 = vrot.slane %v823_v55, 7  ;;  %v545_v7 = vpop.f32.mrf.mxu1  ;;  %v554_v12 = vadd.f32 %v7800_v59, %v8624_v0 }
  0xff   : > { %v806_v6 = vshrl.u32 %v7267_v58, 16  ;;  %v809_v9 = vshll.u32 %v7267_v58, 16  ;;  %v7270_v10 = vpack.c.bf16 %v647_v1, %v647_v1  ;;  %v645_v11 = vmax.f32 %v533_v2, 0.0 }
 0x100   : > { %v786_v13 = vsel %vm8654_vm10, %v778_v40, %v785_v3  ;;  %v1102_v14 = vsel %vm8646_vm9, %v787_v4, %v1101_v62  ;;  %v828_v15 = vor.u32 %v826_v56, %v825_v5  ;;  %v829_v17 = vrot.slane %v825_v5, 4  ;;  %v7801_v18 = vpop.f32.mrf.mxu1 }
 0x101   : > { %v1219_v19 = vld [vmem:[#allocation2 + $0x18] sm:$0x1]  ;;  %1098 = vst [vmem:[#allocation2 + $0x10] sm:$0xf] %v786_v13  ;;  %1103 = vst [vmem:[#allocation2 + $0x14] sm:$0x1] %v1102_v14  ;;  %v7268_v24 = vpack.c.bf16 %v645_v11, %v645_v11  ;;  %v546_v29 = vadd.f32 %v8624_v0, %v545_v7  ;;  %v557_v4 = vadd.f32 %v7801_v18, %v8624_v0 }
 0x102   : > { %v808_v20 = vrot.slane %v806_v6, 7  ;;  %v831_v22 = vshrl.u32 %v7270_v10, 16  ;;  %v834_v23 = vshll.u32 %v7270_v10, 16  ;;  %v1220_v25 = vsel %vm8646_vm9, 0, %v1219_v19  ;;  %v548_v30 = vpop.f32.mrf.mxu1  ;;  %v1125_v18 = vld [vmem:[#allocation2 + $0x3c] sm:$0xf] }
 0x103   : > { %v1119_v26 = vsel %vm8637_vm7, %v828_v15, %v1118_v8  ;;  %v650_v28 = vmax.f32 %v554_v12, 0.0  ;;  %1221 = vst [vmem:[#allocation2 + $0x18] sm:$0x1] %v1220_v25  ;;  %v1216_v32 = vld [vmem:[#allocation2 + $0xc] sm:$0x1]  ;;  %v814_v36 = vshrl.u32 %v7268_v24, 16  ;;  %v549_v10 = vadd.f32 %v8624_v0, %v548_v30 }
 0x104   : > { %1120 = vst [vmem:[#allocation2 + $0x30] sm:$0xf] %v1119_v26  ;;  %v811_v33 = vor.u32 %v809_v9, %v808_v20  ;;  %v812_v34 = vrot.slane %v808_v20, 4  ;;  %v833_v35 = vrot.slane %v831_v22, 7  ;;  %v1217_v38 = vsel %vm8646_vm9, 0, %v1216_v32  ;;  %v7804_v45 = vpop.f32.mrf.mxu1 }
 0x105   : > { %v817_v40 = vshll.u32 %v7268_v24, 16  ;;  %v7273_v42 = vpack.c.bf16 %v650_v28, %v650_v28  ;;  %v648_v44 = vmax.f32 %v546_v29, 0.0  ;;  %1218 = vst [vmem:[#allocation2 + $0xc] sm:$0x1] %v1217_v38  ;;  %v1268_v46 = vld [vmem:[#allocation2 + $0x20] sm:$0x1]  ;;  %v570_v20 = vadd.f32 %v7804_v45, %v8624_v0 }
 0x106   : > { %v1112_v47 = vsel %vm8637_vm7, %v811_v33, %v1111_v27  ;;  %v836_v48 = vor.u32 %v834_v23, %v833_v35  ;;  %v838_v49 = vrot.slane %v833_v35, 4  ;;  %v816_v50 = vrot.slane %v814_v36, 7  ;;  %v561_v56 = vpop.f32.mrf.mxu1  ;;  %v1132_v9 = vld [vmem:[#allocation2 + $0x48] sm:$0xf] }
 0x107   : > { %v1269_v52 = vsel %vm8678_vm11, 0, %v1268_v46  ;;  %1113 = vst [vmem:[#allocation2 + $0x24] sm:$0xf] %v1112_v47  ;;  %v857_v53 = vshrl.u32 %v7273_v42, 16  ;;  %v860_v54 = vshll.u32 %v7273_v42, 16  ;;  %v7271_v55 = vpack.c.bf16 %v648_v44, %v648_v44 }
 0x108   : > { %1270 = vst [vmem:[#allocation2 + $0x20] sm:$0x1] %v1269_v52  ;;  %v837_v58 = vsel %vm8654_vm10, %v829_v17, %v836_v48  ;;  %v1123_v59 = vsel %vm8646_vm9, %v838_v49, %v1122_v39  ;;  %v819_v60 = vor.u32 %v817_v40, %v816_v50  ;;  %v821_v61 = vrot.slane %v816_v50, 4  ;;  %v1265_v62 = vld [vmem:[#allocation2 + $0x14] sm:$0x1]  ;;  %v7805_v5 = vpop.f32.mrf.mxu1 }
 0x109   : > { %1121 = vst [vmem:[#allocation2 + $0x34] sm:$0xf] %v837_v58  ;;  %1124 = vst [vmem:[#allocation2 + $0x38] sm:$0x1] %v1123_v59  ;;  %v8692_v1 = vrot.slane %v857_v53, 7  ;;  %v840_v2 = vshrl.u32 %v7271_v55, 16  ;;  %v562_v22 = vadd.f32 %v8624_v0, %v561_v56  ;;  %v573_v33 = vadd.f32 %v7805_v5, %v8624_v0 }
 0x10a   : > { %v843_v3 = vshll.u32 %v7271_v55, 16  ;;  %v1266_v6 = vsel %vm8678_vm11, 0, %v1265_v62  ;;  %v820_v7 = vsel %vm8654_vm10, %v812_v34, %v819_v60  ;;  %v1116_v8 = vsel %vm8646_vm9, %v821_v61, %v1115_v51  ;;  %v564_v27 = vpop.f32.mrf.mxu1  ;;  %v1136_v40 = vld [vmem:[#allocation2 + $0x50] sm:$0x1]  ;;  %v1129_v61 = vld [vmem:[#allocation2 + $0x44] sm:$0x1] }
 0x10b   : > { %1267 = vst [vmem:[#allocation2 + $0x14] sm:$0x1] %v1266_v6  ;;  %v1225_v11 = vld [vmem:[#allocation2 + $0x30] sm:$0x1]  ;;  %1114 = vst [vmem:[#allocation2 + $0x28] sm:$0xf] %v820_v7  ;;  %v862_v12 = vor.u32 %v860_v54, %v8692_v1  ;;  %v565_v50 = vadd.f32 %v8624_v0, %v564_v27 }
 0x10c   : > { %1117 = vst [vmem:[#allocation2 + $0x2c] sm:$0x1] %v1116_v8  ;;  %v863_v13 = vrot.slane %v8692_v1, 4  ;;  %v8704_v14 = vrot.slane %v840_v2, 7  ;;  %v651_v15 = vmax.f32 %v557_v4, 0.0  ;;  %v1226_v17 = vsel %vm8646_vm9, 0, %v1225_v11  ;;  %v7808_v51 = vpop.f32.mrf.mxu1 }
 0x10d   : > { %v649_v19 = vmax.f32 %v549_v10, 0.0  ;;  %1227 = vst [vmem:[#allocation2 + $0x30] sm:$0x1] %v1226_v17  ;;  %v1133_v23 = vsel %vm8637_vm7, %v862_v12, %v1132_v9  ;;  %v654_v30 = vmax.f32 %v570_v20, 0.0  ;;  %v652_v32 = vmax.f32 %v562_v22, 0.0 }
 0x10e   : > { %v845_v24 = vor.u32 %v843_v3, %v8704_v14  ;;  %v846_v25 = vrot.slane %v8704_v14, 4  ;;  %v7274_v26 = vpack.c.bf16 %v651_v15, %v651_v15  ;;  %v1222_v28 = vld [vmem:[#allocation2 + $0x24] sm:$0x1]  ;;  %1134 = vst [vmem:[#allocation2 + $0x48] sm:$0xf] %v1133_v23  ;;  %v655_v49 = vmax.f32 %v573_v33, 0.0  ;;  %v577_v12 = vpop.f32.mrf.mxu1 }
 0x10f   : > { %v7272_v29 = vpack.c.bf16 %v649_v19, %v649_v19  ;;  %v1223_v34 = vsel %vm8646_vm9, 0, %v1222_v28  ;;  %v7277_v45 = vpack.c.bf16 %v654_v30, %v654_v30  ;;  %v7275_v46 = vpack.c.bf16 %v652_v32, %v652_v32  ;;  %v1146_v4 = vld [vmem:[#allocation2 + $0x60] sm:$0xf]  ;;  %v1139_v9 = vld [vmem:[#allocation2 + $0x54] sm:$0xf] }
 0x110   : > { %v1126_v35 = vsel %vm8637_vm7, %v845_v24, %v1125_v18  ;;  %v865_v36 = vshrl.u32 %v7274_v26, 16  ;;  %v868_v38 = vshll.u32 %v7274_v26, 16  ;;  %1224 = vst [vmem:[#allocation2 + $0x24] sm:$0x1] %v1223_v34  ;;  %v1274_v39 = vld [vmem:[#allocation2 + $0x38] sm:$0x1]  ;;  %v7278_v10 = vpack.c.bf16 %v655_v49, %v655_v49 }
 0x111   : > { %1127 = vst [vmem:[#allocation2 + $0x3c] sm:$0xf] %v1126_v35  ;;  %v848_v42 = vshrl.u32 %v7272_v29, 16  ;;  %v851_v44 = vshll.u32 %v7272_v29, 16  ;;  %v1275_v47 = vsel %vm8678_vm11, 0, %v1274_v39  ;;  %v891_v54 = vshrl.u32 %v7277_v45, 16  ;;  %v8750_v35 = vpop.f32.mrf.mxu1 }
 0x112   : > { %v867_v48 = vrot.slane %v865_v36, 7  ;;  %1276 = vst [vmem:[#allocation2 + $0x38] sm:$0x1] %v1275_v47  ;;  %v894_v55 = vshll.u32 %v7277_v45, 16  ;;  %v874_v56 = vshrl.u32 %v7275_v46, 16  ;;  %v877_v62 = vshll.u32 %v7275_v46, 16 }
 0x113   : > { %v1271_v52 = vld [vmem:[#allocation2 + $0x2c] sm:$0x1]  ;;  %v850_v53 = vrot.slane %v848_v42, 7  ;;  %v893_v3 = vrot.slane %v891_v54, 7  ;;  %v653_v11 = vmax.f32 %v565_v50, 0.0  ;;  %v899_v24 = vshrl.u32 %v7278_v10, 16 }
 0x114   : > { %v1272_v58 = vsel %vm8678_vm11, 0, %v1271_v52  ;;  %v870_v59 = vor.u32 %v868_v38, %v867_v48  ;;  %v872_v60 = vrot.slane %v867_v48, 4  ;;  %v8724_v5 = vrot.slane %v874_v56, 7  ;;  %v8748_v34 = vld [vmem:[#allocation2 + $0x10] sm:$0xf] }
 0x115   : > { %1273 = vst [vmem:[#allocation2 + $0x2c] sm:$0x1] %v1272_v58  ;;  %v853_v1 = vor.u32 %v851_v44, %v850_v53  ;;  %v855_v2 = vrot.slane %v850_v53, 4  ;;  %v1231_v6 = vld [vmem:[#allocation2 + $0x48] sm:$0x1]  ;;  %v896_v18 = vor.u32 %v894_v55, %v893_v3  ;;  %v897_v20 = vrot.slane %v893_v3, 4 }
 0x116   : > { %v871_v7 = vsel %vm8654_vm10, %v863_v13, %v870_v59  ;;  %v1137_v8 = vsel %vm8646_vm9, %v872_v60, %v1136_v40  ;;  %v1232_v14 = vsel %vm8646_vm9, 0, %v1231_v6  ;;  %v8736_v13 = vld [vmem:[#allocation2 + $0xc] sm:$0xf]  ;;  %v879_v22 = vor.u32 %v877_v62, %v8724_v5  ;;  %v1150_v36 = vld [vmem:[#allocation2 + $0x68] sm:$0x1]  ;;  %v8759_v59 = vpop.f32.mrf.mxu1 }
 0x117   : > { %1135 = vst [vmem:[#allocation2 + $0x4c] sm:$0xf] %v871_v7  ;;  %1138 = vst [vmem:[#allocation2 + $0x50] sm:$0x1] %v1137_v8  ;;  %v854_v15 = vsel %vm8654_vm10, %v846_v25, %v853_v1  ;;  %v1130_v17 = vsel %vm8646_vm9, %v855_v2, %v1129_v61  ;;  %v880_v23 = vrot.slane %v8724_v5, 4  ;;  %v1147_v25 = vsel %vm8637_vm7, %v896_v18, %v1146_v4 }
 0x118   : > { %1233 = vst [vmem:[#allocation2 + $0x48] sm:$0x1] %v1232_v14  ;;  %v1228_v19 = vld [vmem:[#allocation2 + $0x3c] sm:$0x1]  ;;  %1128 = vst [vmem:[#allocation2 + $0x40] sm:$0xf] %v854_v15  ;;  %v7276_v28 = vpack.c.bf16 %v653_v11, %v653_v11  ;;  %v1140_v29 = vsel %vm8637_vm7, %v879_v22, %v1139_v9  ;;  %v586_v32 = vadd.f32 %v7808_v51, %v8624_v0 }
 0x119   : > { %1131 = vst [vmem:[#allocation2 + $0x44] sm:$0x1] %v1130_v17  ;;  %v1229_v26 = vsel %vm8646_vm9, 0, %v1228_v19  ;;  %v902_v27 = vshll.u32 %v7278_v10, 16  ;;  %1148 = vst [vmem:[#allocation2 + $0x60] sm:$0xf] %v1147_v25  ;;  %v578_v33 = vadd.f32 %v8624_v0, %v577_v12 }
 0x11a   : > { %1230 = vst [vmem:[#allocation2 + $0x3c] sm:$0x1] %v1229_v26  ;;  %v901_v30 = vrot.slane %v899_v24, 7  ;;  %1141 = vst [vmem:[#allocation2 + $0x54] sm:$0xf] %v1140_v29  ;;  %v882_v38 = vshrl.u32 %v7276_v28, 16  ;;  %v7812_v24 = vpop.f32.mrf.mxu1 }
 0x11b   : > { %v885_v39 = vshll.u32 %v7276_v28, 16  ;;  %v1405_v40 = vshrl.u32 %v8736_v13, 16  ;;  %v1408_v42 = vshll.u32 %v8736_v13, 16  ;;  %v658_v46 = vmax.f32 %v586_v32, 0.0  ;;  %v1143_v55 = vld [vmem:[#allocation2 + $0x5c] sm:$0x1] }
 0x11c   : > { %v904_v44 = vor.u32 %v902_v27, %v901_v30  ;;  %v906_v45 = vrot.slane %v901_v30, 4  ;;  %v656_v47 = vmax.f32 %v578_v33, 0.0  ;;  %v884_v48 = vrot.slane %v882_v38, 7  ;;  %v1160_v11 = vld [vmem:[#allocation2 + $0x78] sm:$0xf]  ;;  %v8319_v29 = vld [vmem:[%s11300_s2 + $0xf0] sm:$0xff]  }
 0x11d   : > { %v1407_v49 = vrot.slane %v1405_v40, 4  ;;  %v1410_v50 = vrot.slane %v1408_v42, 5  ;;  %v1414_v51 = vshll.u32 %v8748_v34, 16  ;;  %v7281_v56 = vpack.c.bf16 %v658_v46, %v658_v46  ;;  %v1153_v14 = vld [vmem:[#allocation2 + $0x6c] sm:$0xf] }
 0x11e   : > { %v1280_v52 = vld [vmem:[#allocation2 + $0x50] sm:$0x1]  ;;  %v905_v53 = vsel %vm8654_vm10, %v897_v20, %v904_v44  ;;  %v1151_v54 = vsel %vm8646_vm9, %v906_v45, %v1150_v36  ;;  %v7279_v58 = vpack.c.bf16 %v656_v47, %v656_v47  ;;  %v887_v62 = vor.u32 %v885_v39, %v884_v48  ;;  %v1317_v15 = vld [vmem:[#allocation2 + $0x18] sm:$0xf]  ;;  %v8770_v17 = vld [vmem:[#allocation2 + $0x1c] sm:$0xf] }
 0x11f   : > { %v1281_v60 = vsel %vm8678_vm11, 0, %v1280_v52  ;;  %1149 = vst [vmem:[#allocation2 + $0x64] sm:$0xf] %v905_v53  ;;  %1152 = vst [vmem:[#allocation2 + $0x68] sm:$0x1] %v1151_v54  ;;  %v889_v1 = vrot.slane %v884_v48, 4  ;;  %v1411_v2 = vor.u32 %v1410_v50, %v1407_v49  ;;  %v6858_v28 = vcombine.low %v8736_v13, %v8748_v34  ;;  %v593_v48 = vpop.f32.mrf.mxu1 }
 0x120   : > { %v1277_v61 = vld [vmem:[#allocation2 + $0x44] sm:$0x1]  ;;  %1282 = vst [vmem:[#allocation2 + $0x50] sm:$0x1] %v1281_v60  ;;  %v925_v4 = vshrl.u32 %v7281_v56, 16  ;;  %v908_v5 = vshrl.u32 %v7279_v58, 16  ;;  %v888_v8 = vsel %vm8654_vm10, %v880_v23, %v887_v62  ;;  %v589_v13 = vadd.f32 %v8750_v35, %v8624_v0 }
 0x121   : > { %v1278_v3 = vsel %vm8678_vm11, 0, %v1277_v61  ;;  %v2412_v6 = vrot.slane %v8599_v41, 5  ;;  %v1237_v7 = vld [vmem:[#allocation2 + $0x60] sm:$0x1]  ;;  %v1144_v9 = vsel %vm8646_vm9, %v889_v1, %v1143_v55  ;;  %v928_v10 = vshll.u32 %v7281_v56, 16  ;;  %7887 = vmatmul.mubr.bf16.vlgmr.msra.gmra.mxu0 %v6858_v28  ;;  %v8322_v53 = vld [vmem:[%s11300_s2 + $0xe8] sm:$0xff]  }
 0x122   : > { %1279 = vst [vmem:[#allocation2 + $0x44] sm:$0x1] %v1278_v3  ;;  %v911_v12 = vshll.u32 %v7279_v58, 16  ;;  %v1238_v18 = vsel %vm8646_vm9, 0, %v1237_v7  ;;  %v1234_v19 = vld [vmem:[#allocation2 + $0x54] sm:$0x1]  ;;  %7967 = vmatpush3.bf16.msra.mxu0 %v8633_v16  ;;  %v6859_v16 = vcombine.low %v1317_v15, %v8770_v17  ;;  %v581_v55 = vadd.f32 %v8624_v0, %v8759_v59 }
 0x123   : > { %1142 = vst [vmem:[#allocation2 + $0x58] sm:$0xf] %v888_v8  ;;  %1145 = vst [vmem:[#allocation2 + $0x5c] sm:$0x1] %v1144_v9  ;;  %v8774_v20 = vrot.slane %v925_v4, 7  ;;  %v8776_v22 = vrot.slane %v908_v5, 7  ;;  %7968 = vmatprep.subr.bf16.mxu0 %v8319_v29  ;;  %v602_v56 = vadd.f32 %v7812_v24, %v8624_v0  ;;  %v594_v62 = vadd.f32 %v8624_v0, %v593_v48  ;;  %v7813_v8 = vpop.f32.mrf.mxu1 }
 0x124   : > { %v8778_v23 = vrot.slane %v1411_v2, 4  ;;  %1239 = vst [vmem:[#allocation2 + $0x60] sm:$0x1] %v1238_v18  ;;  %v1235_v26 = vsel %vm8646_vm9, 0, %v1234_v19  ;;  %v8782_v25 = vrot.slane %v1414_v51, 5  ;;  %v1418_v27 = vshrl.u32 %v8748_v34, 16  ;;  %7890 = vmatprep.mubr.bf16.mxu0 %v6859_v16 }
 0x125   : > { %1236 = vst [vmem:[#allocation2 + $0x54] sm:$0x1] %v1235_v26  ;;  %v930_v30 = vor.u32 %v928_v10, %v8774_v20  ;;  %v931_v32 = vrot.slane %v8774_v20, 4  ;;  %v913_v33 = vor.u32 %v911_v12, %v8776_v22  ;;  %v2419_v36 = vrot.slane %v8748_v34, 5  ;;  %v1319_v49 = vld [vmem:[#allocation2 + $0x24] sm:$0xf] }
 0x126   : > { %v914_v38 = vrot.slane %v8776_v22, 4  ;;  %v1420_v39 = vrot.slane %v1418_v27, 4  ;;  %v1429_v40 = vshrl.u32 %v1317_v15, 16  ;;  %v1286_v42 = vld [vmem:[#allocation2 + $0x68] sm:$0x1]  ;;  %v1432_v46 = vshll.u32 %v1317_v15, 16  ;;  %7969 = vmatpush3.bf16.msra.mxu0 %v8319_v29 }
 0x127   : > { %v1161_v44 = vsel %vm8637_vm7, %v930_v30, %v1160_v11  ;;  %v1154_v45 = vsel %vm8637_vm7, %v913_v33, %v1153_v14  ;;  %v1442_v47 = vshrl.u32 %v8770_v17, 16  ;;  %v1287_v50 = vsel %vm8678_vm11, 0, %v1286_v42  ;;  %v8820_v1 = vld [vmem:[#allocation2 + $0x28] sm:$0xf]  ;;  %v8324_v59 = vld [vmem:[%s11300_s2 + $0xe0] sm:$0xff]   ;;  %7970 = vmatprep.subr.bf16.mxu0 %v8322_v53 }
 0x128   : > { %1162 = vst [vmem:[#allocation2 + $0x78] sm:$0xf] %v1161_v44  ;;  %1155 = vst [vmem:[#allocation2 + $0x6c] sm:$0xf] %v1154_v45  ;;  %v1421_v35 = vor.u32 %v1420_v39, %v8782_v25  ;;  %v659_v51 = vmax.f32 %v589_v13, 0.0  ;;  %v8806_v52 = vrot.slane %v1429_v40, 4  ;;  %v6860_v30 = vcombine.low %v1319_v49, %v8820_v1 }
 0x129   : > { %1288 = vst [vmem:[#allocation2 + $0x68] sm:$0x1] %v1287_v50  ;;  %v8811_v54 = vrot.slane %v1432_v46, 5  ;;  %v1453_v2 = vshrl.u32 %v1319_v49, 16  ;;  %v657_v4 = vmax.f32 %v581_v55, 0.0  ;;  %v662_v5 = vmax.f32 %v602_v56, 0.0 }
 0x12a   : > { %v1283_v58 = vld [vmem:[#allocation2 + $0x5c] sm:$0x1]  ;;  %v8817_v60 = vrot.slane %v1421_v35, 4  ;;  %v7282_v61 = vpack.c.bf16 %v659_v51, %v659_v51  ;;  %v1456_v7 = vshll.u32 %v1319_v49, 16  ;;  %v660_v11 = vmax.f32 %v594_v62, 0.0  ;;  %7971 = vmatpush3.bf16.msra.mxu0 %v8322_v53 }
 0x12b   : > { %v1284_v3 = vsel %vm8678_vm11, 0, %v1283_v58  ;;  %v8827_v12 = vrot.slane %v1453_v2, 4  ;;  %v8829_v14 = vld [vmem:[#allocation2 + $0x30] sm:$0xf]  ;;  %v8831_v15 = vld [vmem:[#allocation2 + $0x34] sm:$0xf]  ;;  %v7280_v19 = vpack.c.bf16 %v657_v4, %v657_v4  ;;  %v7285_v24 = vpack.c.bf16 %v662_v5, %v662_v5  ;;  %7891 = vmatmul.mubr.bf16.gmra.mxu0 %v6860_v30  ;;  %7972 = vmatprep.subr.bf16.mxu0 %v8324_v59  ;;  %v596_v58 = vpop.f32.mrf.mxu1 }
 0x12c   : > { %1285 = vst [vmem:[#allocation2 + $0x5c] sm:$0x1] %v1284_v3  ;;  %v933_v9 = vshrl.u32 %v7282_v61, 16  ;;  %v936_v10 = vshll.u32 %v7282_v61, 16  ;;  %v1164_v18 = vld [vmem:[#allocation2 + $0x80] sm:$0x1]  ;;  %v7283_v29 = vpack.c.bf16 %v660_v11, %v660_v11  ;;  %v605_v33 = vadd.f32 %v7813_v8, %v8624_v0 }
 0x12d   : > { %v8833_v26 = vrot.slane %v1456_v7, 5  ;;  %v1466_v27 = vshrl.u32 %v8820_v1, 16  ;;  %v916_v40 = vshrl.u32 %v7280_v19, 16  ;;  %v919_v42 = vshll.u32 %v7280_v19, 16  ;;  %v8327_v35 = vld [vmem:[%s11300_s2 + $0xd8] sm:$0xff]  }
 0x12e   : > { %v935_v28 = vrot.slane %v933_v9, 7  ;;  %v1417_v44 = vsel %vm8607_vm2, %v8778_v23, %v8782_v25  ;;  %v6861_v45 = vcombine.low %v8829_v14, %v8831_v15  ;;  %v959_v16 = vshrl.u32 %v7285_v24, 16  ;;  %v1362_v56 = vld [vmem:[#allocation2 + $0x14] sm:$0x1]  ;;  %7973 = vmatpush3.bf16.msra.mxu0 %v8324_v59  ;;  %v1167_v30 = vld [vmem:[#allocation2 + $0x84] sm:$0xf] }
 0x12f   : > { %v1243_v39 = vld [vmem:[#allocation2 + $0x78] sm:$0x1]  ;;  %v1240_v13 = vld [vmem:[#allocation2 + $0x6c] sm:$0x1]  ;;  %v918_v51 = vrot.slane %v916_v40, 7  ;;  %v962_v55 = vshll.u32 %v7285_v24, 16  ;;  %7974 = vmatprep.subr.bf16.mxu0 %v8327_v35 }
 0x130   : > { %v1244_v46 = vsel %vm8646_vm9, 0, %v1243_v39  ;;  %v1241_v48 = vsel %vm8646_vm9, 0, %v1240_v13  ;;  %v938_v49 = vor.u32 %v936_v10, %v935_v28  ;;  %v940_v50 = vrot.slane %v935_v28, 4  ;;  %7894 = vmatprep.mubr.bf16.mxu0 %v6861_v45  ;;  %v1157_v2 = vld [vmem:[#allocation2 + $0x74] sm:$0x1] }
 0x131   : > { %1245 = vst [vmem:[#allocation2 + $0x78] sm:$0x1] %v1244_v46  ;;  %1242 = vst [vmem:[#allocation2 + $0x6c] sm:$0x1] %v1241_v48  ;;  %v942_v53 = vshrl.u32 %v7283_v29, 16  ;;  %v945_v3 = vshll.u32 %v7283_v29, 16  ;;  %v921_v5 = vor.u32 %v919_v42, %v918_v51 }
 0x132   : > { %v939_v61 = vsel %vm8654_vm10, %v931_v32, %v938_v49  ;;  %v1165_v62 = vsel %vm8646_vm9, %v940_v50, %v1164_v18  ;;  %v663_v4 = vmax.f32 %v605_v33, 0.0  ;;  %v923_v7 = vrot.slane %v918_v51, 4  ;;  %v1174_v10 = vld [vmem:[#allocation2 + $0x90] sm:$0xf]  ;;  %v7816_v33 = vpop.f32.mrf.mxu1  ;;  %v1363_v42 = vld [vmem:[#allocation2 + $0x20] sm:$0x1]  ;;  %7975 = vmatpush3.bf16.msra.mxu0 %v8327_v35 }
 0x133   : > { %1163 = vst [vmem:[#allocation2 + $0x7c] sm:$0xf] %v939_v61  ;;  %1166 = vst [vmem:[#allocation2 + $0x80] sm:$0x1] %v1165_v62  ;;  %v961_v8 = vrot.slane %v959_v16, 7  ;;  %v8857_v9 = vrot.slane %v942_v53, 7  ;;  %v922_v24 = vsel %vm8654_vm10, %v914_v38, %v921_v5  ;;  %v1435_v16 = vor.u32 %v8811_v54, %v8806_v52 }
 0x134   : > { %v7286_v11 = vpack.c.bf16 %v663_v4, %v663_v4  ;;  %v1424_v20 = vshll.u32 %v1362_v56, 16  ;;  %v1477_v19 = vshrl.u32 %v8829_v14, 16  ;;  %v1480_v32 = vshll.u32 %v8829_v14, 16  ;;  %v8329_v18 = vld [vmem:[%s11300_s2 + $0xd0] sm:$0xff]   ;;  %1156 = vst [vmem:[#allocation2 + $0x70] sm:$0xf] %v922_v24  ;;  %v609_v62 = vpop.f32.mrf.mxu1 }
 0x135   : > { %v1158_v59 = vsel %vm8646_vm9, %v923_v7, %v1157_v2  ;;  %v964_v28 = vor.u32 %v962_v55, %v961_v8  ;;  %v965_v29 = vrot.slane %v961_v8, 4  ;;  %v947_v14 = vor.u32 %v945_v3, %v8857_v9  ;;  %v1178_v50 = vld [vmem:[#allocation2 + $0x98] sm:$0x1]  ;;  %v8310_v55 = vld [vmem:[%s11300_s2 + $0xb0] sm:$0xff]   ;;  %7976 = vmatprep.subr.bf16.mxu0 %v8329_v18  ;;  %v8332_v52 = vld [vmem:[%s11300_s2 + $0xc8] sm:$0xff]  }
 0x136   : > { %1159 = vst [vmem:[#allocation2 + $0x74] sm:$0x1] %v1158_v59  ;;  %v948_v39 = vrot.slane %v8857_v9, 4  ;;  %v967_v13 = vshrl.u32 %v7286_v11, 16  ;;  %v970_v40 = vshll.u32 %v7286_v11, 16  ;;  %v1426_v38 = vrot.slane %v1424_v20, 5  ;;  %7977 = vmatpush3.bf16.msra.mxu0 %v8329_v18 }
 0x137   : > { %v1175_v22 = vsel %vm8637_vm7, %v964_v28, %v1174_v10  ;;  %v8874_v45 = vrot.slane %v1477_v19, 4  ;;  %v8876_v46 = vrot.slane %v1480_v32, 5  ;;  %v1168_v48 = vsel %vm8637_vm7, %v947_v14, %v1167_v30  ;;  %v8900_v5 = vld [vmem:[#allocation2 + $0x3c] sm:$0xf]  ;;  %v8334_v20 = vld [vmem:[%s11300_s2 + $0xc0] sm:$0xff]   ;;  %7978 = vmatprep.subr.bf16.mxu0 %v8332_v52 }
 0x138   : > { %1176 = vst [vmem:[#allocation2 + $0x90] sm:$0xf] %v1175_v22  ;;  %v969_v49 = vrot.slane %v967_v13, 7  ;;  %v1490_v51 = vshrl.u32 %v8831_v15, 16  ;;  %1169 = vst [vmem:[#allocation2 + $0x84] sm:$0xf] %v1168_v48  ;;  %v1427_v35 = vsel %vm8607_vm2, %v8817_v60, %v1426_v38  ;;  %v597_v8 = vadd.f32 %v8624_v0, %v596_v58 }
 0x139   : > { %v1438_v53 = vshll.u32 %v8770_v17, 16  ;;  %v1444_v56 = vrot.slane %v1442_v47, 4  ;;  %v1448_v61 = vshll.u32 %v1363_v42, 16  ;;  %v6834_v60 = vcombine.low %v1417_v44, %v1427_v35  ;;  %v8911_v44 = vld [vmem:[#allocation2 + $0x40] sm:$0xf] }
 0x13a   : > { %v1292_v54 = vld [vmem:[#allocation2 + $0x80] sm:$0x1]  ;;  %v972_v2 = vor.u32 %v970_v40, %v969_v49  ;;  %v974_v3 = vrot.slane %v969_v49, 4  ;;  %v1436_v4 = vrot.slane %v1435_v16, 4  ;;  %v618_v23 = vadd.f32 %v7816_v33, %v8624_v0  ;;  %7979 = vmatpush3.bf16.msra.mxu0 %v8332_v52  ;;  %v8936_v16 = vld [vmem:[%s11300_s2 + $0x178] sm:$0xff]  }
 0x13b   : > { %v1293_v17 = vsel %vm8678_vm11, 0, %v1292_v54  ;;  %v1440_v47 = vrot.slane %v1438_v53, 5  ;;  %v1450_v7 = vrot.slane %v1448_v61, 5  ;;  %7839 = vmatmul.mubr.bf16.vlgmr.msra.gmra.mxu1 %v6834_v60  ;;  %v610_v25 = vadd.f32 %v8624_v0, %v609_v62  ;;  %v8313_v0 = vld [vmem:[%s11300_s2 + $0xa8] sm:$0xff]   ;;  %7980 = vmatprep.subr.bf16.mxu0 %v8334_v20  ;;  %v8316_v60 = vld [vmem:[%s11300_s2 + $0xa0] sm:$0xff]  }
 0x13c   : > { %1294 = vst [vmem:[#allocation2 + $0x80] sm:$0x1] %v1293_v17  ;;  %v973_v10 = vsel %vm8654_vm10, %v965_v29, %v972_v2  ;;  %v1179_v11 = vsel %vm8646_vm9, %v974_v3, %v1178_v50  ;;  %7919 = vmatpush3.bf16.msra.mxu1 %v8618_v63  ;;  %v661_v18 = vmax.f32 %v597_v8, 0.0  ;;  %v1501_v24 = vshrl.u32 %v8900_v5, 16  ;;  %v7817_v50 = vpop.f32.mrf.mxu1  ;;  %v1171_v52 = vld [vmem:[#allocation2 + $0x8c] sm:$0x1] }
 0x13d   : > { %v1289_v58 = vld [vmem:[#allocation2 + $0x74] sm:$0x1]  ;;  %1177 = vst [vmem:[#allocation2 + $0x94] sm:$0xf] %v973_v10  ;;  %1180 = vst [vmem:[#allocation2 + $0x98] sm:$0x1] %v1179_v11  ;;  %v1441_v19 = vsel %vm8607_vm2, %v1436_v4, %v1440_v47  ;;  %v1445_v32 = vor.u32 %v1444_v56, %v1440_v47  ;;  %7920 = vmatprep.subr.bf16.mxu1 %v8310_v55 }
 0x13e   : > { %v1290_v59 = vsel %vm8678_vm11, 0, %v1289_v58  ;;  %v666_v28 = vmax.f32 %v618_v23, 0.0  ;;  %v664_v29 = vmax.f32 %v610_v25, 0.0  ;;  %v1504_v30 = vshll.u32 %v8900_v5, 16  ;;  %v1188_v17 = vld [vmem:[#allocation2 + $0xa8] sm:$0xf]  ;;  %7981 = vmatpush3.bf16.msra.mxu0 %v8334_v20 }
 0x13f   : > { %1291 = vst [vmem:[#allocation2 + $0x74] sm:$0x1] %v1290_v59  ;;  %v1249_v63 = vld [vmem:[#allocation2 + $0x90] sm:$0x1]  ;;  %v1446_v33 = vrot.slane %v1445_v32, 4  ;;  %v7284_v14 = vpack.c.bf16 %v661_v18, %v661_v18  ;;  %v8926_v13 = vrot.slane %v1501_v24, 4  ;;  %v1459_v58 = vor.u32 %v8833_v26, %v8827_v12  ;;  %8062 = vmatprep.subr.bf16.mxu0 %v8936_v16 }
 0x140   : > { %v1514_v40 = vshrl.u32 %v8911_v44, 16  ;;  %v1250_v42 = vsel %vm8646_vm9, 0, %v1249_v63  ;;  %v1246_v22 = vld [vmem:[#allocation2 + $0x84] sm:$0x1]  ;;  %v7289_v38 = vpack.c.bf16 %v666_v28, %v666_v28  ;;  %v7287_v48 = vpack.c.bf16 %v664_v29, %v664_v29  ;;  %7921 = vmatpush3.bf16.msra.mxu1 %v8310_v55  ;;  %v1181_v8 = vld [vmem:[#allocation2 + $0x9c] sm:$0xf]  ;;  %v612_v63 = vpop.f32.mrf.mxu1 }
 0x141   : > { %v8931_v49 = vrot.slane %v1504_v30, 5  ;;  %1251 = vst [vmem:[#allocation2 + $0x90] sm:$0x1] %v1250_v42  ;;  %v1247_v35 = vsel %vm8646_vm9, 0, %v1246_v22  ;;  %v1451_v53 = vsel %vm8607_vm2, %v1446_v33, %v1450_v7  ;;  %v950_v56 = vshrl.u32 %v7284_v14, 16  ;;  %7922 = vmatprep.subr.bf16.mxu1 %v8313_v0  ;;  %v8321_v59 = vld [vmem:[%s11300_s2 + $0x98] sm:$0xff]  }
 0x142   : > { %v953_v61 = vshll.u32 %v7284_v14, 16  ;;  %1248 = vst [vmem:[#allocation2 + $0x84] sm:$0x1] %v1247_v35  ;;  %v6835_v62 = vcombine.low %v1441_v19, %v1451_v53  ;;  %v993_v54 = vshrl.u32 %v7289_v38, 16  ;;  %v996_v2 = vshll.u32 %v7289_v38, 16 }
 0x143   : > { %v976_v3 = vshrl.u32 %v7287_v48, 16  ;;  %v952_v4 = vrot.slane %v950_v56, 7  ;;  %v979_v47 = vshll.u32 %v7287_v48, 16  ;;  %v6862_v7 = vcombine.low %v8900_v5, %v8911_v44  ;;  %v8950_v55 = vld [vmem:[%s11302_s4] ss:$0 sm:$0xff] }
 0x144   : > { %v621_v10 = vadd.f32 %v8950_v55, %v7817_v50  ;;  %v1298_v11 = vld [vmem:[#allocation2 + $0x98] sm:$0x1]  ;;  %7842 = vmatprep.mubr.bf16.mxu1 %v6835_v62  ;;  %v8953_v23 = vrot.slane %v993_v54, 7  ;;  %v1462_v19 = vshll.u32 %v8820_v1, 16  ;;  %v8963_v24 = vld [vmem:[#allocation2 + $0x2c] sm:$0x1]  ;;  %7923 = vmatpush3.bf16.msra.mxu1 %v8313_v0 }
 0x145   : > { %v8955_v25 = vrot.slane %v976_v3, 7  ;;  %v1299_v5 = vsel %vm8678_vm11, 0, %v1298_v11  ;;  %v955_v32 = vor.u32 %v953_v61, %v952_v4  ;;  %v957_v18 = vrot.slane %v952_v4, 4  ;;  %7895 = vmatmul.mubr.bf16.gmra.mxu0 %v6862_v7  ;;  %v1325_v30 = vld [vmem:[#allocation2 + $0x48] sm:$0xf]  ;;  %7924 = vmatprep.subr.bf16.mxu1 %v8316_v60  ;;  %v8326_v61 = vld [vmem:[%s11300_s2 + $0x90] sm:$0xff]  }
 0x146   : > { %v667_v20 = vmax.f32 %v621_v10, 0.0  ;;  %1300 = vst [vmem:[#allocation2 + $0x98] sm:$0x1] %v1299_v5  ;;  %v998_v12 = vor.u32 %v996_v2, %v8953_v23  ;;  %v999_v26 = vrot.slane %v8953_v23, 4  ;;  %v1460_v42 = vrot.slane %v1459_v58, 4  ;;  %v7820_v2 = vpop.f32.mrf.mxu1 }
 0x147   : > { %v981_v28 = vor.u32 %v979_v47, %v8955_v25  ;;  %v982_v29 = vrot.slane %v8955_v25, 4  ;;  %v956_v0 = vsel %vm8654_vm10, %v948_v39, %v955_v32  ;;  %v1172_v33 = vsel %vm8646_vm9, %v957_v18, %v1171_v52  ;;  %v8978_v22 = vld [vmem:[#allocation2 + $0x4c] sm:$0xf]  ;;  %v1192_v47 = vld [vmem:[#allocation2 + $0xb0] sm:$0x1] }
 0x148   : > { %v7290_v14 = vpack.c.bf16 %v667_v20, %v667_v20  ;;  %1170 = vst [vmem:[#allocation2 + $0x88] sm:$0xf] %v956_v0  ;;  %1173 = vst [vmem:[#allocation2 + $0x8c] sm:$0x1] %v1172_v33  ;;  %v1189_v38 = vsel %vm8637_vm7, %v998_v12, %v1188_v17  ;;  %v1464_v50 = vrot.slane %v1462_v19, 5  ;;  %v1468_v9 = vrot.slane %v1466_v27, 4  ;;  %7925 = vmatpush3.bf16.msra.mxu1 %v8316_v60 }
 0x149   : > { %v1182_v48 = vsel %vm8637_vm7, %v981_v28, %v1181_v8  ;;  %1190 = vst [vmem:[#allocation2 + $0xa8] sm:$0xf] %v1189_v38  ;;  %v1472_v53 = vshll.u32 %v8963_v24, 16  ;;  %v1525_v56 = vshrl.u32 %v1325_v30, 16  ;;  %v1528_v54 = vshll.u32 %v1325_v30, 16  ;;  %7926 = vmatprep.subr.bf16.mxu1 %v8321_v59  ;;  %v625_v28 = vpop.f32.mrf.mxu1  ;;  %v8331_v33 = vld [vmem:[%s11300_s2 + $0x88] sm:$0xff]  }
 0x14a   : > { %1183 = vst [vmem:[#allocation2 + $0x9c] sm:$0xf] %v1182_v48  ;;  %v1001_v39 = vshrl.u32 %v7290_v14, 16  ;;  %v1004_v35 = vshll.u32 %v7290_v14, 16  ;;  %v1465_v62 = vsel %vm8607_vm2, %v1460_v42, %v1464_v50  ;;  %v1469_v52 = vor.u32 %v1468_v9, %v1464_v50  ;;  %v8993_v27 = vld [vmem:[#allocation2 + $0x38] sm:$0x1] }
 0x14b   : > { %v1538_v1 = vshrl.u32 %v8978_v22, 16  ;;  %v1474_v4 = vrot.slane %v1472_v53, 5  ;;  %v8995_v17 = vrot.slane %v1525_v56, 4  ;;  %v6863_v60 = vcombine.low %v1325_v30, %v8978_v22  ;;  %v1327_v0 = vld [vmem:[#allocation2 + $0x54] sm:$0xf] }
 0x14c   : > { %v1003_v3 = vrot.slane %v1001_v39, 7  ;;  %v1470_v8 = vrot.slane %v1469_v52, 4  ;;  %v8998_v7 = vrot.slane %v1528_v54, 5  ;;  %v1483_v10 = vor.u32 %v8876_v46, %v8874_v45  ;;  %7927 = vmatpush3.bf16.msra.mxu1 %v8321_v59  ;;  %v9009_v45 = vld [vmem:[#allocation2 + $0x58] sm:$0xf] }
 0x14d   : > { %v1486_v11 = vshll.u32 %v8831_v15, 16  ;;  %7898 = vmatprep.mubr.bf16.mxu0 %v6863_v60  ;;  %v1492_v19 = vrot.slane %v1490_v51, 4  ;;  %v1496_v5 = vshll.u32 %v8993_v27, 16  ;;  %v613_v12 = vadd.f32 %v8950_v55, %v612_v63  ;;  %7928 = vmatprep.subr.bf16.mxu1 %v8326_v61 }
 0x14e   : > { %v1006_v23 = vor.u32 %v1004_v35, %v1003_v3  ;;  %v1008_v58 = vrot.slane %v1003_v3, 4  ;;  %v1475_v32 = vsel %vm8607_vm2, %v1470_v8, %v1474_v4  ;;  %v1484_v18 = vrot.slane %v1483_v10, 4 }
 0x14f   : > { %v1488_v20 = vrot.slane %v1486_v11, 5  ;;  %v1295_v46 = vld [vmem:[#allocation2 + $0x8c] sm:$0x1]  ;;  %v6836_v51 = vcombine.low %v1465_v62, %v1475_v32  ;;  %v1498_v59 = vrot.slane %v1496_v5, 5  ;;  %v665_v48 = vmax.f32 %v613_v12, 0.0 }
 0x150   : > { %v1007_v30 = vsel %vm8654_vm10, %v999_v26, %v1006_v23  ;;  %v1193_v15 = vsel %vm8646_vm9, %v1008_v58, %v1192_v47  ;;  %v1296_v63 = vsel %vm8678_vm11, 0, %v1295_v46  ;;  %v1255_v14 = vld [vmem:[#allocation2 + $0xa8] sm:$0x1]  ;;  %v634_v39 = vadd.f32 %v8950_v55, %v7820_v2  ;;  %7929 = vmatpush3.bf16.msra.mxu1 %v8326_v61  ;;  %v7821_v47 = vpop.f32.mrf.mxu1  ;;  %v8335_v2 = vld [vmem:[%s11300_s2 + $0x80] sm:$0xff]   ;;  %v9046_v46 = vld [vmem:[%s11300_s2 + $0x138] sm:$0xff]  }
 0x151   : > { %v1252_v42 = vld [vmem:[#allocation2 + $0x9c] sm:$0x1]  ;;  %1191 = vst [vmem:[#allocation2 + $0xac] sm:$0xf] %v1007_v30  ;;  %1194 = vst [vmem:[#allocation2 + $0xb0] sm:$0x1] %v1193_v15  ;;  %v1489_v26 = vsel %vm8607_vm2, %v1484_v18, %v1488_v20  ;;  %v1493_v38 = vor.u32 %v1492_v19, %v1488_v20  ;;  %7843 = vmatmul.mubr.bf16.gmra.mxu1 %v6836_v51  ;;  %v626_v35 = vadd.f32 %v8950_v55, %v625_v28 }
 0x152   : > { %1297 = vst [vmem:[#allocation2 + $0x8c] sm:$0x1] %v1296_v63  ;;  %v1256_v50 = vsel %vm8646_vm9, 0, %v1255_v14  ;;  %v1253_v9 = vsel %vm8646_vm9, 0, %v1252_v42  ;;  %v7288_v56 = vpack.c.bf16 %v665_v48, %v665_v48  ;;  %v1549_v62 = vshrl.u32 %v1327_v0, 16  ;;  %7930 = vmatprep.subr.bf16.mxu1 %v8331_v33 }
 0x153   : > { %1257 = vst [vmem:[#allocation2 + $0xa8] sm:$0x1] %v1256_v50  ;;  %1254 = vst [vmem:[#allocation2 + $0x9c] sm:$0x1] %v1253_v9  ;;  %v1494_v53 = vrot.slane %v1493_v38, 4  ;;  %v1552_v52 = vshll.u32 %v1327_v0, 16  ;;  %v6864_v60 = vcombine.low %v1327_v0, %v9009_v45  ;;  %v637_v20 = vadd.f32 %v8950_v55, %v7821_v47 }
 0x154   : > { %v670_v54 = vmax.f32 %v634_v39, 0.0  ;;  %v668_v3 = vmax.f32 %v626_v35, 0.0  ;;  %v1562_v4 = vshrl.u32 %v9009_v45, 16  ;;  %v984_v10 = vshrl.u32 %v7288_v56, 16  ;;  %v1185_v18 = vld [vmem:[#allocation2 + $0xa4] sm:$0x1]  ;;  %7931 = vmatpush3.bf16.msra.mxu1 %v8331_v33 }
 0x155   : > { %v1499_v8 = vsel %vm8607_vm2, %v1494_v53, %v1498_v59  ;;  %v987_v11 = vshll.u32 %v7288_v56, 16  ;;  %v9035_v23 = vrot.slane %v1549_v62, 4  ;;  %v9037_v5 = vrot.slane %v1552_v52, 5  ;;  %7899 = vmatmul.mubr.bf16.gmra.mxu0 %v6864_v60  ;;  %7932 = vmatprep.subr.bf16.mxu1 %v8335_v2  ;;  %v1195_v42 = vld [vmem:[#allocation2 + $0xb4] sm:$0xf] }
 0x156   : > { %v6837_v61 = vcombine.low %v1489_v26, %v1499_v8  ;;  %v7293_v58 = vpack.c.bf16 %v670_v54, %v670_v54  ;;  %v7291_v19 = vpack.c.bf16 %v668_v3, %v668_v3  ;;  %v986_v32 = vrot.slane %v984_v10, 7  ;;  %v9052_v9 = vld [vmem:[#allocation2 + $0x64] sm:$0xf]  ;;  %v1329_v52 = vld [vmem:[#allocation2 + $0x60] sm:$0xf] }
 0x157   : > { %v1507_v12 = vor.u32 %v8931_v49, %v8926_v13  ;;  %v1510_v28 = vshll.u32 %v8911_v44, 16  ;;  %v1202_v49 = vld [vmem:[#allocation2 + $0xc0] sm:$0xf]  ;;  %v671_v33 = vmax.f32 %v637_v20, 0.0  ;;  %v9060_v56 = vld [vmem:[#allocation2 + $0x44] sm:$0x1]  ;;  %v1531_v21 = vor.u32 %v8998_v7, %v8995_v17 }
 0x158   : > { %v1304_v30 = vld [vmem:[#allocation2 + $0xb0] sm:$0x1]  ;;  %7846 = vmatprep.mubr.bf16.mxu1 %v6837_v61  ;;  %v1027_v15 = vshrl.u32 %v7293_v58, 16  ;;  %v1030_v51 = vshll.u32 %v7293_v58, 16  ;;  %v1010_v59 = vshrl.u32 %v7291_v19, 16  ;;  %v1013_v0 = vshll.u32 %v7291_v19, 16  ;;  %7933 = vmatpush3.bf16.msra.mxu1 %v8335_v2 }
 0x159   : > { %v1305_v63 = vsel %vm8678_vm11, 0, %v1304_v30  ;;  %v989_v14 = vor.u32 %v987_v11, %v986_v32  ;;  %v991_v13 = vrot.slane %v986_v32, 4  ;;  %v1508_v48 = vrot.slane %v1507_v12, 4  ;;  %8014 = vmatprep.subr.bf16.mxu1 %v9046_v46  ;;  %v1206_v20 = vld [vmem:[#allocation2 + $0xc8] sm:$0x1] }
 0x15a   : > { %1306 = vst [vmem:[#allocation2 + $0xb0] sm:$0x1] %v1305_v63  ;;  %v1029_v26 = vrot.slane %v1027_v15, 7  ;;  %v9050_v38 = vrot.slane %v1010_v59, 7  ;;  %v1512_v50 = vrot.slane %v1510_v28, 5  ;;  %v7294_v53 = vpack.c.bf16 %v671_v33, %v671_v33  ;;  %v628_v63 = vpop.f32.mrf.mxu1 }
 0x15b   : > { %v990_v39 = vsel %vm8654_vm10, %v982_v29, %v989_v14  ;;  %v1186_v35 = vsel %vm8646_vm9, %v991_v13, %v1185_v18  ;;  %v1516_v62 = vrot.slane %v1514_v40, 4  ;;  %v1520_v2 = vshll.u32 %v9060_v56, 16  ;;  %v9075_v18 = vld [vmem:[#allocation2 + $0x50] sm:$0x1]  ;;  %v1331_v14 = vld [vmem:[#allocation2 + $0x6c] sm:$0xf] }
 0x15c   : > { %1184 = vst [vmem:[#allocation2 + $0xa0] sm:$0xf] %v990_v39  ;;  %1187 = vst [vmem:[#allocation2 + $0xa4] sm:$0x1] %v1186_v35  ;;  %v1032_v54 = vor.u32 %v1030_v51, %v1029_v26  ;;  %v1033_v3 = vrot.slane %v1029_v26, 4  ;;  %v1015_v25 = vor.u32 %v1013_v0, %v9050_v38  ;;  %v1016_v60 = vrot.slane %v9050_v38, 4 }
 0x15d   : > { %v1035_v29 = vshrl.u32 %v7294_v53, 16  ;;  %v1038_v47 = vshll.u32 %v7294_v53, 16  ;;  %v1513_v8 = vsel %vm8607_vm2, %v1508_v48, %v1512_v50  ;;  %v1517_v10 = vor.u32 %v1516_v62, %v1512_v50  ;;  %v9090_v26 = vld [vmem:[#allocation2 + $0x70] sm:$0xf]  ;;  %v9155_v38 = vld [vmem:[#allocation2 + $0x94] sm:$0xf] }
 0x15e   : > { %v1203_v44 = vsel %vm8637_vm7, %v1032_v54, %v1202_v49  ;;  %v1196_v40 = vsel %vm8637_vm7, %v1015_v25, %v1195_v42  ;;  %v1573_v11 = vshrl.u32 %v1329_v52, 16  ;;  %v1576_v19 = vshll.u32 %v1329_v52, 16 }
 0x15f   : > { %1204 = vst [vmem:[#allocation2 + $0xc0] sm:$0xf] %v1203_v44  ;;  %1197 = vst [vmem:[#allocation2 + $0xb4] sm:$0xf] %v1196_v40  ;;  %v1037_v61 = vrot.slane %v1035_v29, 7  ;;  %v1518_v58 = vrot.slane %v1517_v10, 4  ;;  %v6865_v30 = vcombine.low %v1329_v52, %v9052_v9 }
 0x160   : > { %v1586_v32 = vshrl.u32 %v9052_v9, 16  ;;  %v1522_v12 = vrot.slane %v1520_v2, 5  ;;  %v9077_v28 = vrot.slane %v1573_v11, 4  ;;  %v9082_v59 = vrot.slane %v1576_v19, 5  ;;  %v9102_v29 = vld [vmem:[#allocation2 + $0x5c] sm:$0x1] }
 0x161   : > { %v1040_v15 = vor.u32 %v1038_v47, %v1037_v61  ;;  %v1042_v51 = vrot.slane %v1037_v61, 4  ;;  %v1534_v0 = vshll.u32 %v8978_v22, 16  ;;  %7902 = vmatprep.mubr.bf16.mxu0 %v6865_v30  ;;  %v1532_v49 = vrot.slane %v1531_v21, 4  ;;  %v1333_v47 = vld [vmem:[#allocation2 + $0x78] sm:$0xf] }
 0x162   : > { %v1523_v13 = vsel %vm8607_vm2, %v1518_v58, %v1522_v12  ;;  %v1540_v42 = vrot.slane %v1538_v1, 4  ;;  %v1544_v33 = vshll.u32 %v9075_v18, 16  ;;  %v629_v1 = vadd.f32 %v8950_v55, %v628_v63 }
 0x163   : > { %v1301_v17 = vld [vmem:[#allocation2 + $0xa4] sm:$0x1]  ;;  %v1041_v7 = vsel %vm8654_vm10, %v1033_v3, %v1040_v15  ;;  %v1207_v48 = vsel %vm8646_vm9, %v1042_v51, %v1206_v20  ;;  %v6838_v50 = vcombine.low %v1513_v8, %v1523_v13  ;;  %v1536_v39 = vrot.slane %v1534_v0, 5 }
 0x164   : > { %v1302_v35 = vsel %vm8678_vm11, 0, %v1301_v17  ;;  %1205 = vst [vmem:[#allocation2 + $0xc4] sm:$0xf] %v1041_v7  ;;  %1208 = vst [vmem:[#allocation2 + $0xc8] sm:$0x1] %v1207_v48  ;;  %v1546_v53 = vrot.slane %v1544_v33, 5  ;;  %v6866_v55 = vcombine.low %v1331_v14, %v9090_v26  ;;  %v1555_v2 = vor.u32 %v9037_v5, %v9035_v23 }
 0x165   : > { %v1597_v62 = vshrl.u32 %v1331_v14, 16  ;;  %1303 = vst [vmem:[#allocation2 + $0xa4] sm:$0x1] %v1302_v35  ;;  %7847 = vmatmul.mubr.bf16.gmra.mxu1 %v6838_v50  ;;  %v1537_v52 = vsel %vm8607_vm2, %v1532_v49, %v1536_v39  ;;  %v1541_v54 = vor.u32 %v1540_v42, %v1536_v39  ;;  %v1600_v3 = vshll.u32 %v1331_v14, 16  ;;  %v9118_v23 = vld [vmem:[#allocation2 + $0x7c] sm:$0xf] }
 0x166   : > { %v1610_v25 = vshrl.u32 %v9090_v26, 16  ;;  %v1261_v8 = vld [vmem:[#allocation2 + $0xc0] sm:$0x1]  ;;  %v1258_v10 = vld [vmem:[#allocation2 + $0xb4] sm:$0x1]  ;;  %v669_v44 = vmax.f32 %v629_v1, 0.0  ;;  %7903 = vmatmul.mubr.bf16.gmra.mxu0 %v6866_v55 }
 0x167   : > { %v9104_v40 = vrot.slane %v1597_v62, 4  ;;  %v1262_v11 = vsel %vm8646_vm9, 0, %v1261_v8  ;;  %v1259_v61 = vsel %vm8646_vm9, 0, %v1258_v10  ;;  %v1542_v58 = vrot.slane %v1541_v54, 4  ;;  %v9123_v42 = vld [vmem:[#allocation2 + $0x68] sm:$0x1] }
 0x168   : > { %v9113_v19 = vrot.slane %v1600_v3, 5  ;;  %1263 = vst [vmem:[#allocation2 + $0xc0] sm:$0x1] %v1262_v11  ;;  %1260 = vst [vmem:[#allocation2 + $0xb4] sm:$0x1] %v1259_v61  ;;  %v7292_v20 = vpack.c.bf16 %v669_v44, %v669_v44  ;;  %v1556_v12 = vrot.slane %v1555_v2, 4  ;;  %v1579_v54 = vor.u32 %v9082_v59, %v9077_v28 }
 0x169   : > { %v1558_v30 = vshll.u32 %v9009_v45, 16  ;;  %v1564_v21 = vrot.slane %v1562_v4, 4  ;;  %v1547_v5 = vsel %vm8607_vm2, %v1542_v58, %v1546_v53  ;;  %v1568_v15 = vshll.u32 %v9102_v29, 16  ;;  %v1335_v1 = vld [vmem:[#allocation2 + $0x84] sm:$0xf] }
 0x16a   : > { %v1621_v51 = vshrl.u32 %v1333_v47, 16  ;;  %v1624_v0 = vshll.u32 %v1333_v47, 16  ;;  %v6839_v63 = vcombine.low %v1537_v52, %v1547_v5  ;;  %v1018_v14 = vshrl.u32 %v7292_v20, 16  ;;  %v1199_v62 = vld [vmem:[#allocation2 + $0xbc] sm:$0x1] }
 0x16b   : > { %v1021_v13 = vshll.u32 %v7292_v20, 16  ;;  %v1560_v49 = vrot.slane %v1558_v30, 5  ;;  %v1310_v33 = vld [vmem:[#allocation2 + $0xc8] sm:$0x1]  ;;  %v1570_v17 = vrot.slane %v1568_v15, 5  ;;  %v1634_v48 = vshrl.u32 %v9118_v23, 16 }
 0x16c   : > { %v9125_v7 = vrot.slane %v1621_v51, 4  ;;  %v9127_v4 = vrot.slane %v1624_v0, 5  ;;  %v1311_v50 = vsel %vm8678_vm11, 0, %v1310_v33  ;;  %7850 = vmatprep.mubr.bf16.mxu1 %v6839_v63  ;;  %v1020_v39 = vrot.slane %v1018_v14, 7  ;;  %v9141_v11 = vld [vmem:[#allocation2 + $0x74] sm:$0x1] }
 0x16d   : > { %v1561_v35 = vsel %vm8607_vm2, %v1556_v12, %v1560_v49  ;;  %v1565_v53 = vor.u32 %v1564_v21, %v1560_v49  ;;  %1312 = vst [vmem:[#allocation2 + $0xc8] sm:$0x1] %v1311_v50  ;;  %v6867_v52 = vcombine.low %v1333_v47, %v9118_v23  ;;  %v1582_v3 = vshll.u32 %v9052_v9, 16  ;;  %v9143_v20 = vld [vmem:[#allocation2 + $0x88] sm:$0xf] }
 0x16e   : > { %v1588_v8 = vrot.slane %v1586_v32, 4  ;;  %v1023_v10 = vor.u32 %v1021_v13, %v1020_v39  ;;  %v1025_v44 = vrot.slane %v1020_v39, 4  ;;  %v1592_v2 = vshll.u32 %v9123_v42, 16  ;;  %v1337_v0 = vld [vmem:[#allocation2 + $0x90] sm:$0xf] }
 0x16f   : > { %v1566_v55 = vrot.slane %v1565_v53, 4  ;;  %7906 = vmatprep.mubr.bf16.mxu0 %v6867_v52  ;;  %v1580_v61 = vrot.slane %v1579_v54, 4  ;;  %v1584_v58 = vrot.slane %v1582_v3, 5  ;;  %v1645_v47 = vshrl.u32 %v1335_v1, 16  ;;  %v1339_v52 = vld [vmem:[#allocation2 + $0x9c] sm:$0xf] }
 0x170   : > { %v1648_v12 = vshll.u32 %v1335_v1, 16  ;;  %v1024_v28 = vsel %vm8654_vm10, %v1016_v60, %v1023_v10  ;;  %v1200_v32 = vsel %vm8646_vm9, %v1025_v44, %v1199_v62  ;;  %v1594_v30 = vrot.slane %v1592_v2, 5  ;;  %v9169_v62 = vld [vmem:[#allocation2 + $0x80] sm:$0x1] }
 0x171   : > { %v1571_v59 = vsel %vm8607_vm2, %v1566_v55, %v1570_v17  ;;  %1198 = vst [vmem:[#allocation2 + $0xb8] sm:$0xf] %v1024_v28  ;;  %1201 = vst [vmem:[#allocation2 + $0xbc] sm:$0x1] %v1200_v32  ;;  %v1585_v5 = vsel %vm8607_vm2, %v1580_v61, %v1584_v58  ;;  %v1589_v15 = vor.u32 %v1588_v8, %v1584_v58  ;;  %v1647_v51 = vrot.slane %v1645_v47, 4 }
 0x172   : > { %v6840_v21 = vcombine.low %v1561_v35, %v1571_v59  ;;  %v1650_v43 = vrot.slane %v1648_v12, 5  ;;  %v1658_v60 = vshrl.u32 %v9143_v20, 16  ;;  %v6868_v37 = vcombine.low %v1335_v1, %v9143_v20  ;;  %v9173_v10 = vld [vmem:[#allocation2 + $0xa0] sm:$0xf]  ;;  %v9180_v58 = vld [vmem:[#allocation2 + $0x8c] sm:$0x1] }
 0x173   : > { %v1603_v63 = vor.u32 %v9113_v19, %v9104_v40  ;;  %v1590_v14 = vrot.slane %v1589_v15, 4  ;;  %v1606_v13 = vshll.u32 %v9090_v26, 16  ;;  %v1612_v49 = vrot.slane %v1610_v25, 4 }
 0x174   : > { %7851 = vmatmul.mubr.bf16.gmra.mxu1 %v6840_v21  ;;  %v1616_v33 = vshll.u32 %v9141_v11, 16  ;;  %7907 = vmatmul.mubr.bf16.gmra.mxu0 %v6868_v37  ;;  %v1669_v50 = vshrl.u32 %v1337_v0, 16  ;;  %v1672_v39 = vshll.u32 %v1337_v0, 16  ;;  %v1682_v35 = vshrl.u32 %v9155_v38, 16 }
 0x175   : > { %v1604_v17 = vrot.slane %v1603_v63, 4  ;;  %v1595_v53 = vsel %vm8607_vm2, %v1590_v14, %v1594_v30  ;;  %v1608_v1 = vrot.slane %v1606_v13, 5  ;;  %v6869_v19 = vcombine.low %v1337_v0, %v9155_v38 }
 0x176   : > { %v1618_v40 = vrot.slane %v1616_v33, 5  ;;  %v6841_v54 = vcombine.low %v1585_v5, %v1595_v53  ;;  %v1671_v25 = vrot.slane %v1669_v50, 4  ;;  %v1674_v3 = vrot.slane %v1672_v39, 5  ;;  %v1341_v5 = vld [vmem:[#allocation2 + $0xa8] sm:$0xf] }
 0x177   : > { %v1627_v8 = vor.u32 %v9127_v4, %v9125_v7  ;;  %v1609_v44 = vsel %vm8607_vm2, %v1604_v17, %v1608_v1  ;;  %v1613_v55 = vor.u32 %v1612_v49, %v1608_v1  ;;  %7910 = vmatprep.mubr.bf16.mxu0 %v6869_v19  ;;  %v1630_v2 = vshll.u32 %v9118_v23, 16  ;;  %v9191_v49 = vld [vmem:[#allocation2 + $0xac] sm:$0xf] }
 0x178   : > { %v1636_v61 = vrot.slane %v1634_v48, 4  ;;  %v1307_v47 = vld [vmem:[#allocation2 + $0xbc] sm:$0x1]  ;;  %7854 = vmatprep.mubr.bf16.mxu1 %v6841_v54  ;;  %v1640_v28 = vshll.u32 %v9169_v62, 16  ;;  %v1693_v7 = vshrl.u32 %v1339_v52, 16  ;;  %v1696_v4 = vshll.u32 %v1339_v52, 16 }
 0x179   : > { %v1628_v12 = vrot.slane %v1627_v8, 4  ;;  %v1308_v32 = vsel %vm8678_vm11, 0, %v1307_v47  ;;  %v1614_v59 = vrot.slane %v1613_v55, 4  ;;  %v1632_v30 = vrot.slane %v1630_v2, 5  ;;  %v9195_v54 = vld [vmem:[#allocation2 + $0x98] sm:$0x1] }
 0x17a   : > { %v1706_v21 = vshrl.u32 %v9173_v10, 16  ;;  %1309 = vst [vmem:[#allocation2 + $0xbc] sm:$0x1] %v1308_v32  ;;  %v1642_v15 = vrot.slane %v1640_v28, 5  ;;  %v1695_v48 = vrot.slane %v1693_v7, 4  ;;  %v1698_v0 = vrot.slane %v1696_v4, 5 }
 0x17b   : > { %v6870_v37 = vcombine.low %v1339_v52, %v9173_v10  ;;  %v1619_v63 = vsel %vm8607_vm2, %v1614_v59, %v1618_v40  ;;  %v1633_v14 = vsel %vm8607_vm2, %v1628_v12, %v1632_v30  ;;  %v1637_v13 = vor.u32 %v1636_v61, %v1632_v30  ;;  %v9201_v47 = vld [vmem:[#allocation2 + $0xb8] sm:$0xf] }
 0x17c   : > { %v1651_v31 = vor.u32 %v1650_v43, %v1647_v51  ;;  %v6842_v33 = vcombine.low %v1609_v44, %v1619_v63  ;;  %v1654_v17 = vshll.u32 %v9143_v20, 16  ;;  %v1660_v50 = vrot.slane %v1658_v60, 4  ;;  %v1343_v44 = vld [vmem:[#allocation2 + $0xb4] sm:$0xf] }
 0x17d   : > { %7911 = vmatmul.mubr.bf16.gmra.mxu0 %v6870_v37  ;;  %v1664_v39 = vshll.u32 %v9180_v58, 16  ;;  %v1638_v53 = vrot.slane %v1637_v13, 4  ;;  %v1717_v19 = vshrl.u32 %v1341_v5, 16  ;;  %v1720_v52 = vshll.u32 %v1341_v5, 16 }
 0x17e   : > { %v1652_v1 = vrot.slane %v1651_v31, 4  ;;  %7855 = vmatmul.mubr.bf16.gmra.mxu1 %v6842_v33  ;;  %v1656_v40 = vrot.slane %v1654_v17, 5  ;;  %v1730_v51 = vshrl.u32 %v9191_v49, 16  ;;  %v6871_v43 = vcombine.low %v1341_v5, %v9191_v49  ;;  %v9211_v31 = vld [vmem:[#allocation2 + $0xa4] sm:$0x1] }
 0x17f   : > { %v1666_v8 = vrot.slane %v1664_v39, 5  ;;  %v1643_v55 = vsel %vm8607_vm2, %v1638_v53, %v1642_v15  ;;  %v1719_v60 = vrot.slane %v1717_v19, 4  ;;  %v1722_v2 = vrot.slane %v1720_v52, 5  ;;  %v8333_v53 = vld [vmem:[#allocation2 + $0xc] sm:$0xff]  }
 0x180   : > { %v1675_v61 = vor.u32 %v1674_v3, %v1671_v25  ;;  %v6843_v12 = vcombine.low %v1633_v14, %v1643_v55  ;;  %v1657_v28 = vsel %vm8607_vm2, %v1652_v1, %v1656_v40  ;;  %v1661_v7 = vor.u32 %v1660_v50, %v1656_v40  ;;  %7914 = vmatprep.mubr.bf16.mxu0 %v6871_v43  ;;  %v9217_v1 = vld [vmem:[#allocation2 + $0xb0] sm:$0x1] }
 0x181   : > { %v1678_v4 = vshll.u32 %v9155_v38, 16  ;;  %v1684_v59 = vrot.slane %v1682_v35, 4  ;;  %v1688_v30 = vshll.u32 %v9195_v54, 16  ;;  %v1741_v5 = vshrl.u32 %v1343_v44, 16 }
 0x182   : > { %v1676_v32 = vrot.slane %v1675_v61, 4  ;;  %7858 = vmatprep.mubr.bf16.mxu1 %v6843_v12  ;;  %v1662_v15 = vrot.slane %v1661_v7, 4  ;;  %v1744_v3 = vshll.u32 %v1343_v44, 16  ;;  %v1754_v37 = vshrl.u32 %v9201_v47, 16  ;;  %v2359_v7 = vld [vmem:[#allocation2] sm:$0xe] }
 0x183   : > { %v1680_v25 = vrot.slane %v1678_v4, 5  ;;  %v1690_v63 = vrot.slane %v1688_v30, 5  ;;  %v1743_v14 = vrot.slane %v1741_v5, 4  ;;  %v6872_v13 = vcombine.low %v1343_v44, %v9201_v47  ;;  %v9227_v30 = vld [vmem:[#allocation2 + $0xbc] sm:$0x1] }
 0x184   : > { %v1699_v33 = vor.u32 %v1698_v0, %v1695_v48  ;;  %v1667_v35 = vsel %vm8607_vm2, %v1662_v15, %v1666_v8  ;;  %v1746_v39 = vrot.slane %v1744_v3, 5  ;;  %v1702_v40 = vshll.u32 %v9173_v10, 16 }
 0x185   : > { %v1681_v17 = vsel %vm8607_vm2, %v1676_v32, %v1680_v25  ;;  %v1685_v50 = vor.u32 %v1684_v59, %v1680_v25  ;;  %v6844_v19 = vcombine.low %v1657_v28, %v1667_v35  ;;  %7915 = vmatmul.mubr.bf16.gmra.mxu0 %v6872_v13  ;;  %v1708_v48 = vrot.slane %v1706_v21, 4 }
 0x186   : > { %v1700_v52 = vrot.slane %v1699_v33, 4  ;;  %v1712_v43 = vshll.u32 %v9211_v31, 16  ;;  %7982 = vmatprep.mubr.bf16.mxu0 %v8333_v53  ;;  %v1723_v8 = vor.u32 %v1722_v2, %v1719_v60  ;;  %v1726_v44 = vshll.u32 %v9191_v49, 16  ;;  %v8336_v33 = vld [vmem:[#allocation2 + $0x18] sm:$0xff]  }
 0x187   : > { %v1686_v0 = vrot.slane %v1685_v50, 4  ;;  %7859 = vmatmul.mubr.bf16.gmra.mxu1 %v6844_v19  ;;  %v1704_v55 = vrot.slane %v1702_v40, 5  ;;  %v1732_v61 = vrot.slane %v1730_v51, 4  ;;  %v1736_v12 = vshll.u32 %v9217_v1, 16  ;;  %v8337_v19 = vld [vmem:[#allocation2 + $0x24] sm:$0xff]  }
 0x188   : > { %v1747_v28 = vor.u32 %v1746_v39, %v1743_v14  ;;  %v1714_v32 = vrot.slane %v1712_v43, 5  ;;  %v1724_v59 = vrot.slane %v1723_v8, 4  ;;  %v1728_v21 = vrot.slane %v1726_v44, 5  ;;  %v8424_v40 = vld [vmem:[#allocation2 + $0x8] sm:$0x1] }
 0x189   : > { %v1691_v4 = vsel %vm8607_vm2, %v1686_v0, %v1690_v63  ;;  %v1705_v60 = vsel %vm8607_vm2, %v1700_v52, %v1704_v55  ;;  %v1709_v2 = vor.u32 %v1708_v48, %v1704_v55  ;;  %v1738_v15 = vrot.slane %v1736_v12, 5  ;;  %v2360_v63 = vld [vmem:[#allocation2 + $0xc] sm:$0xe]  ;;  %v8351_v0 = vld [vmem:[%s11300_s2 + $0x170] sm:$0xff]  }
 0x18a   : > { %v6845_v5 = vcombine.low %v1681_v17, %v1691_v4  ;;  %v1729_v51 = vsel %vm8607_vm2, %v1724_v59, %v1728_v21  ;;  %v1733_v25 = vor.u32 %v1732_v61, %v1728_v21  ;;  %v9233_v3 = vrot.slane %v1747_v28, 4  ;;  %v8425_v21 = vld [vmem:[#allocation2 + $0x14] sm:$0x1] }
 0x18b   : > { %v1750_v14 = vshll.u32 %v9201_v47, 16  ;;  %v1710_v13 = vrot.slane %v1709_v2, 4  ;;  %v1756_v35 = vrot.slane %v1754_v37, 4  ;;  %v1760_v17 = vshll.u32 %v9227_v30, 16 }
 0x18c   : > { %7862 = vmatprep.mubr.bf16.mxu1 %v6845_v5  ;;  %v6881_v50 = vrot.slane %v2359_v7, 9  ;;  %v1734_v39 = vrot.slane %v1733_v25, 4  ;;  %v2414_v52 = vrot.slane %v2412_v6, 4  ;;  %v2415_v48 = vrot.slane %v8424_v40, 5  ;;  %v2361_v7 = vld [vmem:[#allocation2 + $0x18] sm:$0xe] }
 0x18d   : > { %v1752_v53 = vrot.slane %v1750_v14, 5  ;;  %v2421_v43 = vrot.slane %v2419_v36, 4  ;;  %v1715_v37 = vsel %vm8607_vm2, %v1710_v13, %v1714_v32  ;;  %7983 = vmatmul.mubr.bf16.vlgmr.msra.gmra.mxu0 %v8336_v33  ;;  %v1762_v8 = vrot.slane %v1760_v17, 5  ;;  %v8354_v25 = vld [vmem:[%s11300_s2 + $0x168] sm:$0xff]  }
 0x18e   : > { %v6846_v44 = vcombine.low %v1705_v60, %v1715_v37  ;;  %v1739_v55 = vsel %vm8607_vm2, %v1734_v39, %v1738_v15  ;;  %7986 = vmatprep.mubr.bf16.mxu0 %v8337_v19  ;;  %v6882_v28 = vrot.slane %v2360_v63, 9  ;;  %v9258_v32 = vsel %vm9250_vm14, %v6881_v50, %v2412_v6  ;;  %v2362_v60 = vld [vmem:[#allocation2 + $0x24] sm:$0xe]  ;;  %8063 = vmatpush3.bf16.msra.mxu0 %v8936_v16  ;;  %v8426_v6 = vld [vmem:[#allocation2 + $0x1c] sm:$0xf]  ;;  %v8338_v16 = vld [vmem:[#allocation2 + $0x30] sm:$0xff]  }
 0x18f   : > { %v1757_v61 = vor.u32 %v1756_v35, %v1752_v53  ;;  %v6847_v4 = vcombine.low %v1729_v51, %v1739_v55  ;;  %v9262_v59 = vsel %vm9250_vm14, %v2414_v52, %v2415_v48  ;;  %v2422_v5 = vrot.slane %v8425_v21, 5  ;;  %8064 = vmatprep.subr.bf16.mxu0 %v8351_v0  ;;  %v8427_v63 = vld [vmem:[#allocation2 + $0x20] sm:$0x1]  ;;  %v8428_v13 = vld [vmem:[#allocation2 + $0x28] sm:$0xf] }
 0x190   : > { %7863 = vmatmul.mubr.bf16.gmra.mxu1 %v6846_v44  ;;  %v1753_v2 = vsel %vm8607_vm2, %v9233_v3, %v1752_v53  ;;  %v9272_v41 = vsel %vm9250_vm14, %v6882_v28, %v2419_v36  ;;  %v2426_v51 = vrot.slane %v8426_v6, 5  ;;  %v6883_v3 = vrot.slane %v2361_v7, 9  ;;  %v2363_v36 = vld [vmem:[#allocation2 + $0x30] sm:$0xe]  ;;  %v2364_v53 = vld [vmem:[#allocation2 + $0x3c] sm:$0xe] }
 0x191   : > { %v1758_v15 = vrot.slane %v1757_v61, 4  ;;  %7866 = vmatprep.mubr.bf16.mxu1 %v6847_v4  ;;  %v9279_v14 = vsel %vm9250_vm14, %v2421_v43, %v2422_v5  ;;  %v2429_v34 = vrot.slane %v8427_v63, 5  ;;  %v2433_v33 = vrot.slane %v8428_v13, 5  ;;  %v2365_v19 = vld [vmem:[#allocation2 + $0x48] sm:$0xe]  ;;  %v8340_v44 = vld [vmem:[#allocation2 + $0x3c] sm:$0xff]  }
 0x192   : > { %v6913_v17 = vcombine.low %v9258_v32, %v9262_v59  ;;  %v2428_v50 = vrot.slane %v2426_v51, 4  ;;  %v6884_v39 = vrot.slane %v2362_v60, 9  ;;  %v6914_v52 = vcombine.low %v9272_v41, %v9279_v14  ;;  %v2366_v37 = vld [vmem:[#allocation2 + $0x54] sm:$0xe]  ;;  %8065 = vmatpush3.bf16.msra.mxu0 %v8351_v0  ;;  %v8356_v4 = vld [vmem:[%s11300_s2 + $0x160] sm:$0xff]   ;;  %v8364_v41 = vld [vmem:[%s11300_s2 + $0x148] sm:$0xff]  }
 0x193   : > { %v1763_v35 = vsel %vm8607_vm2, %v1758_v15, %v1762_v8  ;;  %v9289_v40 = vsel %vm9250_vm14, %v6883_v3, %v2426_v51  ;;  %v2435_v48 = vrot.slane %v2433_v33, 4  ;;  %v2436_v43 = vrot.slane %v8963_v24, 5  ;;  %v8429_v61 = vld [vmem:[#allocation2 + $0x34] sm:$0xf]  ;;  %8066 = vmatprep.subr.bf16.mxu0 %v8354_v25  ;;  %v8430_v59 = vld [vmem:[#allocation2 + $0x40] sm:$0xf] }
 0x194   : > { %v6848_v8 = vcombine.low %v1753_v2, %v1763_v35  ;;  %v9294_v55 = vsel %vm9250_vm14, %v2428_v50, %v2429_v34  ;;  %v2440_v28 = vrot.slane %v8429_v61, 5  ;;  %v2443_v7 = vrot.slane %v8993_v27, 5  ;;  %v2367_v15 = vld [vmem:[#allocation2 + $0x60] sm:$0xe]  ;;  %v8343_v61 = vld [vmem:[#allocation2 + $0x54] sm:$0xff]  }
 0x195   : > { %7987 = vmatmul.mubr.bf16.gmra.mxu0 %v8338_v16  ;;  %v9302_v24 = vsel %vm9250_vm14, %v2435_v48, %v2436_v43  ;;  %v6885_v0 = vrot.slane %v2363_v36, 9  ;;  %v6886_v32 = vrot.slane %v2364_v53, 9  ;;  %v2447_v21 = vrot.slane %v8430_v59, 5  ;;  %v8359_v36 = vld [vmem:[%s11300_s2 + $0x158] sm:$0xff]   ;;  %v8341_v48 = vld [vmem:[#allocation2 + $0x48] sm:$0xff]   ;;  %v8361_v59 = vld [vmem:[%s11300_s2 + $0x150] sm:$0xff]  }
 0x196   : > { %7990 = vmatprep.mubr.bf16.mxu0 %v8340_v44  ;;  %v6915_v5 = vcombine.low %v9289_v40, %v9294_v55  ;;  %v9308_v27 = vsel %vm9250_vm14, %v6884_v39, %v2433_v33  ;;  %v2442_v60 = vrot.slane %v2440_v28, 4  ;;  %v2450_v2 = vrot.slane %v9060_v56, 5  ;;  %8067 = vmatpush3.bf16.msra.mxu0 %v8354_v25  ;;  %v2368_v56 = vld [vmem:[#allocation2 + $0x6c] sm:$0xe]  ;;  %v2369_v53 = vld [vmem:[#allocation2 + $0x78] sm:$0xe] }
 0x197   : > { %v6916_v6 = vcombine.low %v9308_v27, %v9302_v24  ;;  %v2449_v51 = vrot.slane %v2447_v21, 4  ;;  %v6887_v16 = vrot.slane %v2365_v19, 9  ;;  %v2454_v3 = vrot.slane %v8978_v22, 5  ;;  %8068 = vmatprep.subr.bf16.mxu0 %v8356_v4  ;;  %v2370_v19 = vld [vmem:[#allocation2 + $0x84] sm:$0xe] }
 0x198   : > { %7867 = vmatmul.mubr.bf16.gmra.mxu1 %v6848_v8  ;;  %v9316_v63 = vsel %vm9250_vm14, %v2442_v60, %v2443_v7  ;;  %v2457_v34 = vrot.slane %v9075_v18, 5  ;;  %v6888_v13 = vrot.slane %v2366_v37, 9  ;;  %v2461_v33 = vrot.slane %v9009_v45, 5 }
 0x199   : > { %7934 = vmatprep.mubr.bf16.mxu1 %v6913_v17  ;;  %v9325_v22 = vsel %vm9250_vm14, %v6885_v0, %v2440_v28  ;;  %v9329_v25 = vsel %vm9250_vm14, %v6886_v32, %v2447_v21  ;;  %v9333_v18 = vsel %vm9250_vm14, %v2449_v51, %v2450_v2  ;;  %v2456_v45 = vrot.slane %v2454_v3, 4 }
 0x19a   : > { %v6917_v35 = vcombine.low %v9325_v22, %v9316_v63  ;;  %v6918_v50 = vcombine.low %v9329_v25, %v9333_v18  ;;  %v9341_v17 = vsel %vm9250_vm14, %v6887_v16, %v2454_v3  ;;  %v9345_v39 = vsel %vm9250_vm14, %v6888_v13, %v2461_v33  ;;  %8069 = vmatpush3.bf16.msra.mxu0 %v8356_v4  ;;  %v2372_v16 = vld [vmem:[#allocation2 + $0x9c] sm:$0xe]  ;;  %v8363_v25 = vld [vmem:[%s11300_s2 + $0x108] sm:$0xff]  }
 0x19b   : > { %v9349_v43 = vsel %vm9250_vm14, %v2456_v45, %v2457_v34  ;;  %v6889_v37 = vrot.slane %v2367_v15, 9  ;;  %v2468_v8 = vrot.slane %v9052_v9, 5  ;;  %v2471_v44 = vrot.slane %v9123_v42, 5  ;;  %8070 = vmatprep.subr.bf16.mxu0 %v8359_v36 }
 0x19c   : > { %v2463_v28 = vrot.slane %v2461_v33, 4  ;;  %v2464_v7 = vrot.slane %v9102_v29, 5  ;;  %v6890_v0 = vrot.slane %v2368_v56, 9  ;;  %v2475_v32 = vrot.slane %v9090_v26, 5  ;;  %v2371_v29 = vld [vmem:[#allocation2 + $0x90] sm:$0xe] }
 0x19d   : > { %7991 = vmatmul.mubr.bf16.gmra.mxu0 %v8341_v48  ;;  %v6919_v21 = vcombine.low %v9341_v17, %v9349_v43  ;;  %v9362_v9 = vsel %vm9250_vm14, %v6889_v37, %v2468_v8  ;;  %v2470_v42 = vrot.slane %v2468_v8, 4  ;;  %v2478_v4 = vrot.slane %v9141_v11, 5  ;;  %v8342_v26 = vld [vmem:[%s11300_s2 + $0x130] sm:$0xff]   ;;  %v9385_v33 = vld [vmem:[%s11300_s2 + $0x128] sm:$0xff]   ;;  %v9569_v17 = vld [vmem:[#allocation2 + $0x40] sm:$0xf] }
 0x19e   : > { %7994 = vmatprep.mubr.bf16.mxu0 %v8343_v61  ;;  %v9370_v60 = vsel %vm9250_vm14, %v6890_v0, %v2475_v32  ;;  %v2477_v2 = vrot.slane %v2475_v32, 4  ;;  %v6891_v15 = vrot.slane %v2369_v53, 9  ;;  %v2482_v51 = vrot.slane %v9118_v23, 5  ;;  %8071 = vmatpush3.bf16.msra.mxu0 %v8359_v36  ;;  %v9411_v53 = vld [vmem:[#allocation2 + $0x10] sm:$0xf] }
 0x19f   : > { %v9375_v3 = vsel %vm9250_vm14, %v2470_v42, %v2471_v44  ;;  %v2485_v11 = vrot.slane %v9169_v62, 5  ;;  %v6892_v34 = vrot.slane %v2370_v19, 9  ;;  %v2489_v13 = vrot.slane %v9143_v20, 5  ;;  %8072 = vmatprep.subr.bf16.mxu0 %v8361_v59  ;;  %v9413_v19 = vld [vmem:[#allocation2 + $0x14] sm:$0x1]  ;;  %v8346_v32 = vld [vmem:[#allocation2 + $0x6c] sm:$0xff]  }
 0x1a0   : > { %7935 = vmatmul.mubr.bf16.vlgmr.msra.gmra.mxu1 %v6914_v52  ;;  %v6921_v23 = vcombine.low %v9362_v9, %v9375_v3  ;;  %v9391_v56 = vsel %vm9250_vm14, %v2477_v2, %v2478_v4  ;;  %v9395_v20 = vsel %vm9250_vm14, %v6891_v15, %v2482_v51  ;;  %v2484_v62 = vrot.slane %v2482_v51, 4  ;;  %v3984_v37 = vld [vmem:[#allocation2 + $0xc] sm:$0xe]  ;;  %v2373_v0 = vld [vmem:[#allocation2 + $0xa8] sm:$0xe]  ;;  %v8352_v43 = vld [vmem:[#allocation2 + $0x90] sm:$0xff]  }
 0x1a1   : > { %8015 = vmatpush3.bf16.msra.mxu1 %v9046_v46  ;;  %7938 = vmatprep.mubr.bf16.mxu1 %v6915_v5  ;;  %v6922_v14 = vcombine.low %v9370_v60, %v9391_v56  ;;  %v9408_v52 = vsel %vm9250_vm14, %v6892_v34, %v2489_v13  ;;  %v2491_v36 = vrot.slane %v2489_v13, 4  ;;  %v2492_v45 = vrot.slane %v9180_v58, 5  ;;  %v8344_v46 = vld [vmem:[#allocation2 + $0x60] sm:$0xff]   ;;  %v3985_v34 = vld [vmem:[#allocation2 + $0x18] sm:$0xe]  ;;  %v8357_v3 = vld [vmem:[#allocation2 + $0xa8] sm:$0xff]  }
 0x1a2   : > { %8016 = vmatprep.subr.bf16.mxu1 %v8342_v26  ;;  %v9417_v40 = vsel %vm9250_vm14, %v2484_v62, %v2485_v11  ;;  %v6893_v55 = vrot.slane %v2371_v29, 9  ;;  %v2496_v5 = vrot.slane %v9155_v38, 5  ;;  %v2499_v48 = vrot.slane %v9195_v54, 5  ;;  %8073 = vmatpush3.bf16.msra.mxu0 %v8361_v59  ;;  %v8365_v59 = vld [vmem:[%s11300_s2 + $0x140] sm:$0xff]   ;;  %v9438_v29 = vld [vmem:[#allocation2 + $0x1c] sm:$0xf] }
 0x1a3   : > { %v6923_v8 = vcombine.low %v9395_v20, %v9417_v40  ;;  %v9425_v58 = vsel %vm9250_vm14, %v2491_v36, %v2492_v45  ;;  %v6894_v44 = vrot.slane %v2372_v16, 9  ;;  %v2503_v61 = vrot.slane %v9173_v10, 5  ;;  %8074 = vmatprep.subr.bf16.mxu0 %v8364_v41  ;;  %v9611_v9 = vld [vmem:[#allocation2 + $0x4c] sm:$0xf]  ;;  %v8362_v20 = vld [vmem:[#allocation2 + $0xc0] sm:$0xff]  }
 0x1a4   : > { %v9430_v42 = vsel %vm9250_vm14, %v2463_v28, %v2464_v7  ;;  %v2498_v54 = vrot.slane %v2496_v5, 4  ;;  %v2506_v4 = vrot.slane %v9211_v31, 5  ;;  %v9442_v10 = vsel %vm9250_vm14, %v6893_v55, %v2496_v5  ;;  %v9449_v31 = vld [vmem:[#allocation2 + $0x20] sm:$0x1]  ;;  %v9472_v55 = vld [vmem:[%s11300_s2 + $0x1f8] sm:$0xff]  }
 0x1a5   : > { %8017 = vmatpush3.bf16.msra.mxu1 %v8342_v26  ;;  %7995 = vmatmul.mubr.bf16.gmra.mxu0 %v8344_v46  ;;  %v9446_v28 = vsel %vm9250_vm14, %v6894_v44, %v2503_v61  ;;  %v2505_v7 = vrot.slane %v2503_v61, 4  ;;  %v4050_v2 = vrot.slane %v9411_v53, 5  ;;  %v8348_v26 = vld [vmem:[%s11300_s2 + $0x120] sm:$0xff]   ;;  %v7017_v51 = vrot.slane %v3984_v37, 9  ;;  %v9467_v46 = vld [vmem:[#allocation2 + $0x28] sm:$0xf] }
 0x1a6   : > { %8018 = vmatprep.subr.bf16.mxu1 %v9385_v33  ;;  %7998 = vmatprep.mubr.bf16.mxu0 %v8346_v32  ;;  %v9457_v15 = vsel %vm9250_vm14, %v2498_v54, %v2499_v48  ;;  %v4053_v16 = vrot.slane %v9413_v19, 5  ;;  %v2510_v11 = vrot.slane %v9191_v49, 5  ;;  %v6895_v45 = vrot.slane %v2373_v0, 9  ;;  %v9485_v44 = vld [vmem:[#allocation2 + $0x2c] sm:$0x1]  ;;  %v8347_v32 = vld [vmem:[#allocation2 + $0x78] sm:$0xff]  }
 0x1a7   : > { %v9465_v62 = vsel %vm9250_vm14, %v2505_v7, %v2506_v4  ;;  %8075 = vmatpush3.bf16.msra.mxu0 %v8364_v41  ;;  %v4052_v36 = vrot.slane %v4050_v2, 4  ;;  %v6920_v49 = vcombine.low %v9345_v39, %v9430_v42  ;;  %v8353_v41 = vld [vmem:[%s11300_s2 + $0x118] sm:$0xff]   ;;  %v2513_v37 = vrot.slane %v9217_v1, 5  ;;  %v3230_v61 = vld [vmem:[#allocation2 + $0xc] sm:$0xf] }
 0x1a8   : > { %7939 = vmatmul.mubr.bf16.gmra.mxu1 %v6916_v6  ;;  %v2512_v48 = vrot.slane %v2510_v11, 4  ;;  %8076 = vmatprep.subr.bf16.mxu0 %v8365_v59  ;;  %v9493_v24 = vsel %vm9250_vm14, %v7017_v51, %v4050_v2  ;;  %v4057_v1 = vrot.slane %v9438_v29, 5  ;;  %v4060_v6 = vrot.slane %v9449_v31, 5  ;;  %v2374_v0 = vld [vmem:[#allocation2 + $0xb4] sm:$0xe] }
 0x1a9   : > { %7942 = vmatprep.mubr.bf16.mxu1 %v6917_v35  ;;  %8019 = vmatpush3.bf16.msra.mxu1 %v9385_v33  ;;  %v9497_v27 = vsel %vm9250_vm14, %v4052_v36, %v4053_v16  ;;  %v9503_v63 = vsel %vm9250_vm14, %v6895_v45, %v2510_v11  ;;  %v7018_v35 = vrot.slane %v3985_v34, 9  ;;  %v2517_v33 = vrot.slane %v9201_v47, 5  ;;  %v3986_v51 = vld [vmem:[#allocation2 + $0x24] sm:$0xe]  ;;  %v9520_v45 = vld [vmem:[#allocation2 + $0x34] sm:$0xf] }
 0x1aa   : > { %8020 = vmatprep.subr.bf16.mxu1 %v8348_v26  ;;  %v9507_v22 = vsel %vm9250_vm14, %v2512_v48, %v2513_v37  ;;  %v7049_v54 = vcombine.low %v9493_v24, %v9497_v27  ;;  %v4059_v7 = vrot.slane %v4057_v1, 4  ;;  %v2520_v2 = vrot.slane %v9227_v30, 5  ;;  %v8350_v16 = vld [vmem:[#allocation2 + $0x84] sm:$0xff]   ;;  %v8358_v30 = vld [vmem:[%s11300_s2 + $0x110] sm:$0xff]  }
 0x1ab   : > { %8077 = vmatpush3.bf16.msra.mxu0 %v8365_v59  ;;  %v9517_v11 = vsel %vm9250_vm14, %v7018_v35, %v4057_v1  ;;  %v6896_v34 = vrot.slane %v2374_v0, 9  ;;  %v2519_v36 = vrot.slane %v2517_v33, 4  ;;  %v4064_v47 = vrot.slane %v9467_v46, 5  ;;  %v9531_v0 = vld [vmem:[#allocation2 + $0x38] sm:$0x1] }
 0x1ac   : > { %8158 = vmatprep.subr.bf16.mxu0 %v9472_v55  ;;  %v9528_v59 = vsel %vm9250_vm14, %v4059_v7, %v4060_v6  ;;  %v4067_v48 = vrot.slane %v9485_v44, 5  ;;  %v3279_v37 = vshrl.u32 %v3230_v61, 16  ;;  %v3282_v1 = vshll.u32 %v3230_v61, 16  ;;  %v3987_v35 = vld [vmem:[#allocation2 + $0x30] sm:$0xe] }
 0x1ad   : > { %7999 = vmatmul.mubr.bf16.gmra.mxu0 %v8347_v32  ;;  %8021 = vmatpush3.bf16.msra.mxu1 %v8348_v26  ;;  %v9535_v26 = vsel %vm9250_vm14, %v6896_v34, %v2517_v33  ;;  %v9539_v32 = vsel %vm9250_vm14, %v2519_v36, %v2520_v2  ;;  %v7019_v4 = vrot.slane %v3986_v51, 9  ;;  %v4066_v6 = vrot.slane %v4064_v47, 4  ;;  %v3233_v7 = vld [vmem:[#allocation2 + $0x18] sm:$0xf]  ;;  %v9682_v24 = vld [vmem:[#allocation2 + $0x68] sm:$0x1] }
 0x1ae   : > { %8002 = vmatprep.mubr.bf16.mxu0 %v8350_v16  ;;  %8022 = vmatprep.subr.bf16.mxu1 %v8353_v41  ;;  %v3281_v61 = vrot.slane %v3279_v37, 4  ;;  %v3284_v13 = vrot.slane %v3282_v1, 5  ;;  %v3288_v38 = vshll.u32 %v9411_v53, 16  ;;  %v7050_v33 = vcombine.low %v9517_v11, %v9528_v59  ;;  %v9573_v37 = vld [vmem:[#allocation2 + $0x44] sm:$0x1] }
 0x1af   : > { %v9551_v2 = vsel %vm9250_vm14, %v7019_v4, %v4064_v47  ;;  %v9555_v51 = vsel %vm9250_vm14, %v4066_v6, %v4067_v48  ;;  %v3292_v16 = vshrl.u32 %v9411_v53, 16  ;;  %v3298_v4 = vshll.u32 %v9413_v19, 16  ;;  %v8355_v19 = vld [vmem:[#allocation2 + $0x9c] sm:$0xff]   ;;  %v3245_v27 = vld [vmem:[#allocation2 + $0x48] sm:$0xf] }
 0x1b0   : > { %7943 = vmatmul.mubr.bf16.gmra.mxu1 %v6918_v50  ;;  %v3285_v18 = vor.u32 %v3284_v13, %v3281_v61  ;;  %v9564_v50 = vrot.slane %v3288_v38, 5  ;;  %v4071_v34 = vrot.slane %v9520_v45, 5  ;;  %v7020_v47 = vrot.slane %v3987_v35, 9 }
 0x1b1   : > { %7946 = vmatprep.mubr.bf16.mxu1 %v6919_v21  ;;  %8023 = vmatpush3.bf16.msra.mxu1 %v8353_v41  ;;  %v3294_v36 = vrot.slane %v3292_v16, 4  ;;  %v4074_v53 = vrot.slane %v9531_v0, 5  ;;  %v3303_v48 = vshrl.u32 %v3233_v7, 16  ;;  %v3306_v38 = vshll.u32 %v3233_v7, 16  ;;  %v3236_v21 = vld [vmem:[#allocation2 + $0x24] sm:$0xf] }
 0x1b2   : > { %8024 = vmatprep.subr.bf16.mxu1 %v8358_v30  ;;  %v3286_v41 = vrot.slane %v3285_v18, 4  ;;  %v4073_v13 = vrot.slane %v4071_v34, 4  ;;  %v3312_v35 = vshll.u32 %v9438_v29, 16  ;;  %v3316_v61 = vshrl.u32 %v9438_v29, 16 }
 0x1b3   : > { %v3295_v1 = vor.u32 %v3294_v36, %v9564_v50  ;;  %v3305_v6 = vrot.slane %v3303_v48, 4  ;;  %v3300_v16 = vrot.slane %v3298_v4, 5  ;;  %v3308_v18 = vrot.slane %v3306_v38, 5  ;;  %v8366_v36 = vld [vmem:[%s11300_s2 + $0x100] sm:$0xff]   ;;  %v3988_v48 = vld [vmem:[#allocation2 + $0x3c] sm:$0xe] }
 0x1b4   : > { %v9580_v5 = vsel %vm9250_vm14, %v4073_v13, %v4074_v53  ;;  %v3322_v7 = vshll.u32 %v9449_v31, 16  ;;  %v3291_v29 = vsel %vm8607_vm2, %v3286_v41, %v9564_v50  ;;  %v3314_v4 = vrot.slane %v3312_v35, 5 }
 0x1b5   : > { %8003 = vmatmul.mubr.bf16.gmra.mxu0 %v8352_v43  ;;  %8025 = vmatpush3.bf16.msra.mxu1 %v8358_v30  ;;  %v9591_v30 = vsel %vm9250_vm14, %v7020_v47, %v4071_v34  ;;  %v3318_v53 = vrot.slane %v3316_v61, 4  ;;  %v3296_v43 = vrot.slane %v3295_v1, 4  ;;  %v3309_v13 = vor.u32 %v3308_v18, %v3305_v6  ;;  %v9608_v1 = vld [vmem:[%s11300_s2 + $0x1b8] sm:$0xff]  }
 0x1b6   : > { %8006 = vmatprep.mubr.bf16.mxu0 %v8355_v19  ;;  %8026 = vmatprep.subr.bf16.mxu1 %v8363_v25  ;;  %v7052_v31 = vcombine.low %v9591_v30, %v9580_v5  ;;  %v4078_v38 = vrot.slane %v9569_v17, 5  ;;  %v3324_v50 = vrot.slane %v3322_v7, 5  ;;  %v4081_v41 = vrot.slane %v9573_v37, 5 }
 0x1b7   : > { %v3319_v19 = vor.u32 %v3318_v53, %v3314_v4  ;;  %v3327_v34 = vshrl.u32 %v3236_v21, 16  ;;  %v3301_v47 = vsel %vm8607_vm2, %v3296_v43, %v3300_v16  ;;  %v3310_v39 = vrot.slane %v3309_v13, 4  ;;  %v9624_v53 = vld [vmem:[#allocation2 + $0x50] sm:$0x1] }
 0x1b8   : > { %7947 = vmatmul.mubr.bf16.gmra.mxu1 %v6920_v49  ;;  %v7021_v42 = vrot.slane %v3988_v48, 9  ;;  %v4080_v49 = vrot.slane %v4078_v38, 4  ;;  %v3330_v61 = vshll.u32 %v3236_v21, 16  ;;  %v3336_v18 = vshll.u32 %v9467_v46, 16  ;;  %v3239_v21 = vld [vmem:[#allocation2 + $0x30] sm:$0xf] }
 0x1b9   : > { %7950 = vmatprep.mubr.bf16.mxu1 %v6921_v23  ;;  %8027 = vmatpush3.bf16.msra.mxu1 %v8363_v25  ;;  %v3320_v6 = vrot.slane %v3319_v19, 4  ;;  %v3329_v35 = vrot.slane %v3327_v34, 4  ;;  %v3315_v23 = vsel %vm8607_vm2, %v3310_v39, %v3314_v4  ;;  %v3340_v7 = vshrl.u32 %v9467_v46, 16  ;;  %v8360_v48 = vld [vmem:[#allocation2 + $0xb4] sm:$0xff]   ;;  %v3989_v39 = vld [vmem:[#allocation2 + $0x48] sm:$0xe] }
 0x1ba   : > { %8028 = vmatprep.subr.bf16.mxu1 %v8366_v36  ;;  %v9617_v25 = vsel %vm9250_vm14, %v7021_v42, %v4078_v38  ;;  %v9621_v16 = vsel %vm9250_vm14, %v4080_v49, %v4081_v41  ;;  %v3332_v13 = vrot.slane %v3330_v61, 5  ;;  %v9628_v19 = vrot.slane %v3336_v18, 5  ;;  %v9643_v61 = vld [vmem:[#allocation2 + $0x58] sm:$0xf] }
 0x1bb   : > { %v3325_v43 = vsel %vm8607_vm2, %v3320_v6, %v3324_v50  ;;  %v3346_v4 = vshll.u32 %v9485_v44, 16  ;;  %v9631_v38 = vcombine.low %v3291_v29, %v3301_v47  ;;  %v7053_v46 = vcombine.low %v9617_v25, %v9621_v16  ;;  %v8377_v25 = vld [vmem:[%s11300_s2 + $0x1d8] sm:$0xff]  }
 0x1bc   : > { %v9633_v41 = vcombine.low %v3315_v23, %v3325_v43  ;;  %v3342_v34 = vrot.slane %v3340_v7, 4  ;;  %v3333_v50 = vor.u32 %v3332_v13, %v3329_v35  ;;  %v4085_v42 = vrot.slane %v9611_v9, 5  ;;  %v3990_v7 = vld [vmem:[#allocation2 + $0x54] sm:$0xe] }
 0x1bd   : > { %8007 = vmatmul.mubr.bf16.gmra.mxu0 %v8357_v3  ;;  %8029 = vmatpush3.bf16.msra.mxu1 %v8366_v36  ;;  %v4088_v49 = vrot.slane %v9624_v53, 5  ;;  %v3351_v44 = vshrl.u32 %v3239_v21, 16  ;;  %v3354_v29 = vshll.u32 %v3239_v21, 16  ;;  %v3360_v47 = vshll.u32 %v9520_v45, 16 }
 0x1be   : > { %8010 = vmatprep.mubr.bf16.mxu0 %v8360_v48  ;;  %8110 = vmatprep.subr.bf16.mxu1 %v9608_v1  ;;  %v3343_v36 = vor.u32 %v3342_v34, %v9628_v19  ;;  %v3364_v6 = vshrl.u32 %v9520_v45, 16  ;;  %v3334_v18 = vrot.slane %v3333_v50, 4  ;;  %v3348_v35 = vrot.slane %v3346_v4, 5  ;;  %v9651_v45 = vld [vmem:[#allocation2 + $0x5c] sm:$0x1] }
 0x1bf   : > { %v7022_v3 = vrot.slane %v3989_v39, 9  ;;  %v3353_v23 = vrot.slane %v3351_v44, 4  ;;  %v4087_v21 = vrot.slane %v4085_v42, 4  ;;  %v3356_v48 = vrot.slane %v3354_v29, 5  ;;  %v3242_v34 = vld [vmem:[#allocation2 + $0x3c] sm:$0xf] }
 0x1c0   : > { %7951 = vmatmul.mubr.bf16.gmra.mxu1 %v6922_v14  ;;  %v3362_v43 = vrot.slane %v3360_v47, 5  ;;  %v3366_v13 = vrot.slane %v3364_v6, 4  ;;  %v3339_v60 = vsel %vm8607_vm2, %v3334_v18, %v9628_v19  ;;  %v3344_v56 = vrot.slane %v3343_v36, 4 }
 0x1c1   : > { %7954 = vmatprep.mubr.bf16.mxu1 %v6923_v8  ;;  %v9658_v14 = vsel %vm9250_vm14, %v7022_v3, %v4085_v42  ;;  %v3370_v4 = vshll.u32 %v9531_v0, 16  ;;  %v9663_v40 = vsel %vm9250_vm14, %v4087_v21, %v4088_v49  ;;  %v3357_v8 = vor.u32 %v3356_v48, %v3353_v23  ;;  %v9676_v23 = vld [vmem:[#allocation2 + $0x64] sm:$0xf] }
 0x1c2   : > { %v3367_v39 = vor.u32 %v3366_v13, %v3362_v43  ;;  %v7023_v50 = vrot.slane %v3990_v7, 9  ;;  %v3349_v44 = vsel %vm8607_vm2, %v3344_v56, %v3348_v35  ;;  %v4092_v36 = vrot.slane %v9643_v61, 5 }
 0x1c3   : > { %v3372_v19 = vrot.slane %v3370_v4, 5  ;;  %v4095_v42 = vrot.slane %v9651_v45, 5  ;;  %v3358_v29 = vrot.slane %v3357_v8, 4  ;;  %v3375_v47 = vshrl.u32 %v3242_v34, 16 }
 0x1c4   : > { %v3368_v0 = vrot.slane %v3367_v39, 4  ;;  %v3378_v6 = vshll.u32 %v3242_v34, 16  ;;  %v7054_v49 = vcombine.low %v9658_v14, %v9663_v40  ;;  %v4094_v18 = vrot.slane %v4092_v36, 4 }
 0x1c5   : > { %8011 = vmatmul.mubr.bf16.gmra.mxu0 %v8362_v20  ;;  %v3384_v35 = vshll.u32 %v9569_v17, 16  ;;  %v3388_v3 = vshrl.u32 %v9569_v17, 16  ;;  %v3363_v7 = vsel %vm8607_vm2, %v3358_v29, %v3362_v43  ;;  %v3377_v48 = vrot.slane %v3375_v47, 4  ;;  %v9708_v47 = vld [vmem:[#allocation2 + $0x74] sm:$0x1] }
 0x1c6   : > { %8078 = vmatprep.mubr.bf16.mxu0 %v7049_v54  ;;  %v3373_v21 = vsel %vm8607_vm2, %v3368_v0, %v3372_v19  ;;  %v3380_v13 = vrot.slane %v3378_v6, 5  ;;  %v11325_v54 = vcombine.low %v9408_v52, %v9425_v58  ;;  %v9687_v56 = vcombine.low %v3339_v60, %v3349_v44  ;;  %v3991_v60 = vld [vmem:[#allocation2 + $0x60] sm:$0xe]  ;;  %v9706_v0 = vld [vmem:[#allocation2 + $0x70] sm:$0xf] }
 0x1c7   : > { %v9691_v17 = vsel %vm9250_vm14, %v7023_v50, %v4092_v36  ;;  %v3386_v4 = vrot.slane %v3384_v35, 5  ;;  %v3390_v43 = vrot.slane %v3388_v3, 4  ;;  %v11326_v34 = vcombine.low %v9442_v10, %v9457_v15  ;;  %v3992_v3 = vld [vmem:[#allocation2 + $0x6c] sm:$0xe] }
 0x1c8   : > { %7955 = vmatmul.mubr.bf16.gmra.mxu1 %v11325_v54  ;;  %v9696_v20 = vcombine.low %v3363_v7, %v3373_v21  ;;  %v9700_v8 = vsel %vm9250_vm14, %v4094_v18, %v4095_v42  ;;  %v3381_v52 = vor.u32 %v3380_v13, %v3377_v48  ;;  %v3394_v58 = vshll.u32 %v9573_v37, 16  ;;  %v8372_v37 = vld [vmem:[%s11300_s2 + $0x1f0] sm:$0xff]  }
 0x1c9   : > { %7958 = vmatprep.mubr.bf16.mxu1 %v11326_v34  ;;  %v3391_v39 = vor.u32 %v3390_v43, %v3386_v4  ;;  %v4099_v50 = vrot.slane %v9676_v23, 5  ;;  %v4102_v44 = vrot.slane %v9682_v24, 5  ;;  %v3399_v19 = vshrl.u32 %v3245_v27, 16 }
 0x1ca   : > { %v3382_v36 = vrot.slane %v3381_v52, 4  ;;  %v3396_v29 = vrot.slane %v3394_v58, 5  ;;  %v3402_v10 = vshll.u32 %v3245_v27, 16  ;;  %v3408_v15 = vshll.u32 %v9611_v9, 16  ;;  %v3248_v27 = vld [vmem:[#allocation2 + $0x54] sm:$0xf] }
 0x1cb   : > { %v7055_v42 = vcombine.low %v9691_v17, %v9700_v8  ;;  %v3392_v6 = vrot.slane %v3391_v39, 4  ;;  %v7024_v18 = vrot.slane %v3991_v60, 9  ;;  %v3401_v35 = vrot.slane %v3399_v19, 4 }
 0x1cc   : > { %v4101_v7 = vrot.slane %v4099_v50, 4  ;;  %v3404_v21 = vrot.slane %v3402_v10, 5  ;;  %v3410_v48 = vrot.slane %v3408_v15, 5  ;;  %v3412_v13 = vshrl.u32 %v9611_v9, 16 }
 0x1cd   : > { %8079 = vmatmul.mubr.bf16.vlgmr.msra.gmra.mxu0 %v7050_v33  ;;  %v11327_v54 = vcombine.low %v9551_v2, %v9555_v51  ;;  %v3387_v43 = vsel %vm8607_vm2, %v3382_v36, %v3386_v4  ;;  %v3397_v34 = vsel %vm8607_vm2, %v3392_v6, %v3396_v29  ;;  %v9728_v11 = vsel %vm9250_vm14, %v7024_v18, %v4099_v50  ;;  %v8374_v4 = vld [vmem:[%s11300_s2 + $0x1e8] sm:$0xff]   ;;  %v9748_v29 = vld [vmem:[#allocation2 + $0x7c] sm:$0xf] }
 0x1ce   : > { %v3418_v59 = vshll.u32 %v9624_v53, 16  ;;  %8159 = vmatpush3.bf16.msra.mxu0 %v9472_v55  ;;  %v9734_v33 = vsel %vm9250_vm14, %v4101_v7, %v4102_v44  ;;  %v3405_v2 = vor.u32 %v3404_v21, %v3401_v35  ;;  %v3414_v51 = vrot.slane %v3412_v13, 4  ;;  %v3259_v35 = vld [vmem:[#allocation2 + $0x80] sm:$0x1] }
 0x1cf   : > { %8082 = vmatprep.mubr.bf16.mxu0 %v11327_v54  ;;  %v7025_v9 = vrot.slane %v3992_v3, 9  ;;  %8160 = vmatprep.subr.bf16.mxu0 %v8372_v37  ;;  %v11328_v52 = vcombine.low %v9446_v28, %v9465_v62  ;;  %v4106_v53 = vrot.slane %v9706_v0, 5  ;;  %v4109_v55 = vrot.slane %v9708_v47, 5  ;;  %v8375_v3 = vld [vmem:[%s11300_s2 + $0x1e0] sm:$0xff]  }
 0x1d0   : > { %v3420_v58 = vrot.slane %v3418_v59, 5  ;;  %v3423_v60 = vshrl.u32 %v3248_v27, 16  ;;  %v11329_v39 = vcombine.low %v9503_v63, %v9507_v22  ;;  %v3406_v50 = vrot.slane %v3405_v2, 4 }
 0x1d1   : > { %7959 = vmatmul.mubr.bf16.gmra.mxu1 %v11328_v52  ;;  %v3415_v44 = vor.u32 %v3414_v51, %v3410_v48  ;;  %v3426_v19 = vshll.u32 %v3248_v27, 16  ;;  %v3432_v36 = vshll.u32 %v9643_v61, 16  ;;  %v9750_v10 = vcombine.low %v3387_v43, %v3397_v34  ;;  %v3251_v43 = vld [vmem:[#allocation2 + $0x60] sm:$0xf]  ;;  %v3993_v34 = vld [vmem:[#allocation2 + $0x78] sm:$0xe] }
 0x1d2   : > { %7962 = vmatprep.mubr.bf16.mxu1 %v11329_v39  ;;  %v4108_v28 = vrot.slane %v4106_v53, 4  ;;  %v3425_v62 = vrot.slane %v3423_v60, 4  ;;  %v3436_v15 = vshrl.u32 %v9643_v61, 16  ;;  %8161 = vmatpush3.bf16.msra.mxu0 %v8372_v37  ;;  %v3411_v6 = vsel %vm8607_vm2, %v3406_v50, %v3410_v48 }
 0x1d3   : > { %v3416_v18 = vrot.slane %v3415_v44, 4  ;;  %v3428_v63 = vrot.slane %v3426_v19, 5  ;;  %v3434_v22 = vrot.slane %v3432_v36, 5  ;;  %8162 = vmatprep.subr.bf16.mxu0 %v8374_v4  ;;  %v3442_v61 = vshll.u32 %v9651_v45, 16  ;;  %v9797_v44 = vld [vmem:[#allocation2 + $0x8c] sm:$0x1] }
 0x1d4   : > { %v9760_v7 = vsel %vm9250_vm14, %v4108_v28, %v4109_v55  ;;  %v3438_v21 = vrot.slane %v3436_v15, 4  ;;  %v3508_v37 = vshrl.u32 %v9748_v29, 16  ;;  %v7056_v48 = vcombine.low %v9728_v11, %v9734_v33  ;;  %v3254_v28 = vld [vmem:[#allocation2 + $0x6c] sm:$0xf] }
 0x1d5   : > { %8083 = vmatmul.mubr.bf16.gmra.mxu0 %v7052_v31  ;;  %v3421_v13 = vsel %vm8607_vm2, %v3416_v18, %v3420_v58  ;;  %v9773_v27 = vsel %vm9250_vm14, %v7025_v9, %v4106_v53  ;;  %v3429_v54 = vor.u32 %v3428_v63, %v3425_v62  ;;  %v3444_v31 = vrot.slane %v3442_v61, 5  ;;  %v9791_v53 = vld [vmem:[#allocation2 + $0x88] sm:$0xf]  ;;  %v8378_v18 = vld [vmem:[%s11300_s2 + $0x1d0] sm:$0xff]  }
 0x1d6   : > { %8086 = vmatprep.mubr.bf16.mxu0 %v7053_v46  ;;  %v7057_v5 = vcombine.low %v9773_v27, %v9760_v7  ;;  %v3439_v30 = vor.u32 %v3438_v21, %v3434_v22  ;;  %v3514_v45 = vshll.u32 %v3259_v35, 16  ;;  %8163 = vmatpush3.bf16.msra.mxu0 %v8374_v4  ;;  %v9780_v59 = vcombine.low %v3411_v6, %v3421_v13  ;;  %v9823_v13 = vld [vmem:[#allocation2 + $0x94] sm:$0xf] }
 0x1d7   : > { %v3430_v2 = vrot.slane %v3429_v54, 4  ;;  %v9782_v51 = vrot.slane %v3508_v37, 4  ;;  %v4113_v9 = vrot.slane %v9748_v29, 5  ;;  %8164 = vmatprep.subr.bf16.mxu0 %v8375_v3  ;;  %v11330_v16 = vcombine.low %v9535_v26, %v9539_v32  ;;  %v8368_v54 = vld [vmem:[%s11300_s2 + $0x1b0] sm:$0xff]  }
 0x1d8   : > { %v3440_v46 = vrot.slane %v3439_v30, 4  ;;  %v4116_v52 = vrot.slane %v3259_v35, 5  ;;  %v3447_v58 = vshrl.u32 %v3251_v43, 16  ;;  %v3450_v4 = vshll.u32 %v3251_v43, 16 }
 0x1d9   : > { %7963 = vmatmul.mubr.bf16.gmra.mxu1 %v11330_v16  ;;  %v3435_v55 = vsel %vm8607_vm2, %v3430_v2, %v3434_v22  ;;  %v7026_v60 = vrot.slane %v3993_v34, 9  ;;  %v4115_v39 = vrot.slane %v4113_v9, 4  ;;  %v3456_v50 = vshll.u32 %v9676_v23, 16 }
 0x1da   : > { %8030 = vmatprep.mubr.bf16.mxu1 %v9631_v38  ;;  %v3445_v26 = vsel %vm8607_vm2, %v3440_v46, %v3444_v31  ;;  %v3449_v32 = vrot.slane %v3447_v58, 4  ;;  %v3452_v19 = vrot.slane %v3450_v4, 5  ;;  %v3460_v36 = vshrl.u32 %v9676_v23, 16  ;;  %8165 = vmatpush3.bf16.msra.mxu0 %v8375_v3  ;;  %v3994_v3 = vld [vmem:[#allocation2 + $0x84] sm:$0xe] }
 0x1db   : > { %v9802_v62 = vrot.slane %v3514_v45, 5  ;;  %v9806_v38 = vsel %vm9250_vm14, %v7026_v60, %v4113_v9  ;;  %v3458_v15 = vrot.slane %v3456_v50, 5  ;;  %v3466_v6 = vshll.u32 %v9682_v24, 16  ;;  %8166 = vmatprep.subr.bf16.mxu0 %v8377_v25  ;;  %v8380_v9 = vld [vmem:[%s11300_s2 + $0x1c8] sm:$0xff]   ;;  %v3257_v60 = vld [vmem:[#allocation2 + $0x78] sm:$0xf] }
 0x1dc   : > { %v9812_v63 = vcombine.low %v3435_v55, %v3445_v26  ;;  %v9816_v23 = vsel %vm9250_vm14, %v4115_v39, %v4116_v52  ;;  %v3453_v22 = vor.u32 %v3452_v19, %v3449_v32  ;;  %v3462_v35 = vrot.slane %v3460_v36, 4  ;;  %v3995_v55 = vld [vmem:[#allocation2 + $0x90] sm:$0xe]  ;;  %v9863_v32 = vld [vmem:[#allocation2 + $0xa0] sm:$0xf] }
 0x1dd   : > { %8087 = vmatmul.mubr.bf16.gmra.mxu0 %v7054_v49  ;;  %v3468_v21 = vrot.slane %v3466_v6, 5  ;;  %v4120_v24 = vrot.slane %v9791_v53, 5  ;;  %v4123_v61 = vrot.slane %v9797_v44, 5  ;;  %v3471_v37 = vshrl.u32 %v3254_v28, 16  ;;  %v9832_v49 = vld [vmem:[#allocation2 + $0x98] sm:$0x1] }
 0x1de   : > { %8090 = vmatprep.mubr.bf16.mxu0 %v7055_v42  ;;  %v3454_v43 = vrot.slane %v3453_v22, 4  ;;  %v3463_v30 = vor.u32 %v3462_v35, %v3458_v15  ;;  %v3474_v14 = vshll.u32 %v3254_v28, 16  ;;  %v3480_v40 = vshll.u32 %v9706_v0, 16  ;;  %8167 = vmatpush3.bf16.msra.mxu0 %v8377_v25  ;;  %v9870_v6 = vld [vmem:[#allocation2 + $0xa4] sm:$0x1] }
 0x1df   : > { %v7027_v31 = vrot.slane %v3994_v3, 9  ;;  %v4122_v45 = vrot.slane %v4120_v24, 4  ;;  %v3473_v34 = vrot.slane %v3471_v37, 4  ;;  %v3484_v2 = vshrl.u32 %v9706_v0, 16  ;;  %8168 = vmatprep.subr.bf16.mxu0 %v8378_v18  ;;  %v3996_v3 = vld [vmem:[#allocation2 + $0x9c] sm:$0xe] }
 0x1e0   : > { %v3459_v17 = vsel %vm8607_vm2, %v3454_v43, %v3458_v15  ;;  %v3464_v8 = vrot.slane %v3463_v30, 4  ;;  %v3476_v42 = vrot.slane %v3474_v14, 5  ;;  %v3482_v16 = vrot.slane %v3480_v40, 5 }
 0x1e1   : > { %8031 = vmatmul.mubr.bf16.vlgmr.msra.gmra.mxu1 %v9633_v41  ;;  %v9845_v0 = vsel %vm9250_vm14, %v4122_v45, %v4123_v61  ;;  %v3486_v25 = vrot.slane %v3484_v2, 4  ;;  %v3490_v46 = vshll.u32 %v9708_v47, 16  ;;  %v3556_v52 = vshrl.u32 %v9823_v13, 16  ;;  %v8369_v41 = vld [vmem:[%s11300_s2 + $0x1a8] sm:$0xff]  }
 0x1e2   : > { %8111 = vmatpush3.bf16.msra.mxu1 %v9608_v1  ;;  %8034 = vmatprep.mubr.bf16.mxu1 %v9687_v56  ;;  %v3469_v58 = vsel %vm8607_vm2, %v3464_v8, %v3468_v21  ;;  %v9856_v1 = vsel %vm9250_vm14, %v7027_v31, %v4120_v24  ;;  %v3477_v56 = vor.u32 %v3476_v42, %v3473_v34  ;;  %v3562_v4 = vshll.u32 %v9832_v49, 16  ;;  %v8370_v21 = vld [vmem:[%s11300_s2 + $0x1a0] sm:$0xff]   ;;  %v8373_v34 = vld [vmem:[%s11300_s2 + $0x198] sm:$0xff]  }
 0x1e3   : > { %8112 = vmatprep.subr.bf16.mxu1 %v8368_v54  ;;  %8169 = vmatpush3.bf16.msra.mxu0 %v8378_v18  ;;  %v7058_v47 = vcombine.low %v9806_v38, %v9816_v23  ;;  %v7059_v39 = vcombine.low %v9856_v1, %v9845_v0  ;;  %v3487_v50 = vor.u32 %v3486_v25, %v3482_v16  ;;  %v3492_v26 = vrot.slane %v3490_v46, 5  ;;  %v8381_v38 = vld [vmem:[%s11300_s2 + $0x1c0] sm:$0xff]   ;;  %v9914_v25 = vld [vmem:[#allocation2 + $0xac] sm:$0xf] }
 0x1e4   : > { %8170 = vmatprep.subr.bf16.mxu0 %v8380_v9  ;;  %v9865_v19 = vcombine.low %v3459_v17, %v3469_v58  ;;  %v3478_v36 = vrot.slane %v3477_v56, 4  ;;  %v9867_v28 = vrot.slane %v3556_v52, 4  ;;  %v4127_v15 = vrot.slane %v9823_v13, 5  ;;  %v3271_v56 = vld [vmem:[#allocation2 + $0xb0] sm:$0x1] }
 0x1e5   : > { %8091 = vmatmul.mubr.bf16.gmra.mxu0 %v7056_v48  ;;  %v3488_v18 = vrot.slane %v3487_v50, 4  ;;  %v7028_v23 = vrot.slane %v3995_v55, 9  ;;  %v3495_v22 = vshrl.u32 %v3257_v60, 16  ;;  %v3498_v35 = vshll.u32 %v3257_v60, 16  ;;  %v3260_v48 = vld [vmem:[#allocation2 + $0x84] sm:$0xf] }
 0x1e6   : > { %8113 = vmatpush3.bf16.msra.mxu1 %v8368_v54  ;;  %8094 = vmatprep.mubr.bf16.mxu0 %v7057_v5  ;;  %v3483_v24 = vsel %vm8607_vm2, %v3478_v36, %v3482_v16  ;;  %v9886_v61 = vrot.slane %v3562_v4, 5  ;;  %v4130_v11 = vrot.slane %v9832_v49, 5  ;;  %v3504_v33 = vshll.u32 %v9748_v29, 16  ;;  %v9898_v29 = vpop.f32.mrf.mxu0  ;;  %v3997_v50 = vld [vmem:[#allocation2 + $0xa8] sm:$0xe] }
 0x1e7   : > { %8114 = vmatprep.subr.bf16.mxu1 %v8369_v41  ;;  %v3493_v37 = vsel %vm8607_vm2, %v3488_v18, %v3492_v26  ;;  %v9894_v7 = vsel %vm9250_vm14, %v7028_v23, %v4127_v15  ;;  %v3497_v27 = vrot.slane %v3495_v22, 4  ;;  %v3500_v5 = vrot.slane %v3498_v35, 5  ;;  %8171 = vmatpush3.bf16.msra.mxu0 %v8380_v9 }
 0x1e8   : > { %v4129_v54 = vrot.slane %v4127_v15, 4  ;;  %v3506_v43 = vrot.slane %v3504_v33, 5  ;;  %v7029_v30 = vrot.slane %v3996_v3, 9  ;;  %v4134_v14 = vrot.slane %v9863_v32, 5  ;;  %8172 = vmatprep.subr.bf16.mxu0 %v8381_v38  ;;  %v8376_v15 = vld [vmem:[%s11300_s2 + $0x190] sm:$0xff]  }
 0x1e9   : > { %8035 = vmatmul.mubr.bf16.gmra.mxu1 %v9696_v20  ;;  %v9901_v40 = vcombine.low %v3483_v24, %v3493_v37  ;;  %v3501_v49 = vor.u32 %v3500_v5, %v3497_v27  ;;  %v4137_v31 = vrot.slane %v9870_v6, 5  ;;  %v3519_v45 = vshrl.u32 %v3260_v48, 16 }
 0x1ea   : > { %8038 = vmatprep.mubr.bf16.mxu1 %v9750_v10  ;;  %8115 = vmatpush3.bf16.msra.mxu1 %v8369_v41  ;;  %v9906_v20 = vsel %vm9250_vm14, %v4129_v54, %v4130_v11  ;;  %v3511_v2 = vor.u32 %v9782_v51, %v3506_v43  ;;  %v4136_v9 = vrot.slane %v4134_v14, 4  ;;  %v3522_v10 = vshll.u32 %v3260_v48, 16  ;;  %v9919_v51 = vpop.f32.mrf.mxu0 }
 0x1eb   : > { %8116 = vmatprep.subr.bf16.mxu1 %v8370_v21  ;;  %v3502_v17 = vrot.slane %v3501_v49, 4  ;;  %v3521_v8 = vrot.slane %v3519_v45, 4  ;;  %v3528_v42 = vshll.u32 %v9791_v53, 16  ;;  %v3532_v16 = vshrl.u32 %v9791_v53, 16  ;;  %8173 = vmatpush3.bf16.msra.mxu0 %v8381_v38  ;;  %v3263_v38 = vld [vmem:[#allocation2 + $0x90] sm:$0xf] }
 0x1ec   : > { %v3512_v46 = vrot.slane %v3511_v2, 4  ;;  %v4138_v52 = vsel %vm9250_vm14, %v4136_v9, %v4137_v31  ;;  %v3524_v41 = vrot.slane %v3522_v10, 5  ;;  %v3538_v58 = vshll.u32 %v9797_v44, 16  ;;  %v9945_v24 = vpop.f32.mrf.mxu0 }
 0x1ed   : > { %8095 = vmatmul.mubr.bf16.gmra.mxu0 %v7058_v47  ;;  %v7060_v4 = vcombine.low %v9894_v7, %v9906_v20  ;;  %v3507_v53 = vsel %vm8607_vm2, %v3502_v17, %v3506_v43  ;;  %v3530_v55 = vrot.slane %v3528_v42, 5  ;;  %v3534_v60 = vrot.slane %v3532_v16, 4  ;;  %v3998_v7 = vld [vmem:[#allocation2 + $0xb4] sm:$0xe]  ;;  %v3266_v43 = vld [vmem:[#allocation2 + $0x9c] sm:$0xf] }
 0x1ee   : > { %8117 = vmatpush3.bf16.msra.mxu1 %v8370_v21  ;;  %8098 = vmatprep.mubr.bf16.mxu0 %v7059_v39  ;;  %v3517_v44 = vsel %vm8607_vm2, %v3512_v46, %v9802_v62  ;;  %v4135_v47 = vsel %vm9250_vm14, %v7029_v30, %v4134_v14  ;;  %v3525_v26 = vor.u32 %v3524_v41, %v3521_v8  ;;  %v3604_v36 = vshrl.u32 %v9914_v25, 16  ;;  %v9937_v39 = vld [vmem:[#allocation2 + $0xb8] sm:$0xf]  ;;  %v9943_v21 = vld [vmem:[#allocation2 + $0xbc] sm:$0x1]  ;;  %v9963_v9 = vpop.f32.mrf.mxu0  ;;  %v8382_v41 = vld [vmem:[%s11300_s2 + $0x180] sm:$0xff]  }
 0x1ef   : > { %8118 = vmatprep.subr.bf16.mxu1 %v8373_v34  ;;  %v7061_v18 = vcombine.low %v4135_v47, %v4138_v52  ;;  %v3535_v23 = vor.u32 %v3534_v60, %v3530_v55  ;;  %v3540_v0 = vrot.slane %v3538_v58, 5  ;;  %v3610_v1 = vshll.u32 %v3271_v56, 16 }
 0x1f0   : > { %v9940_v62 = vcombine.low %v3507_v53, %v3517_v44  ;;  %v3526_v22 = vrot.slane %v3525_v26, 4  ;;  %v7030_v35 = vrot.slane %v3997_v50, 9  ;;  %v4141_v3 = vrot.slane %v9914_v25, 5  ;;  %v9982_v47 = vpop.f32.mrf.mxu0 }
 0x1f1   : > { %8039 = vmatmul.mubr.bf16.gmra.mxu1 %v9780_v59  ;;  %v3536_v11 = vrot.slane %v3535_v23, 4  ;;  %v9948_v33 = vrot.slane %v3604_v36, 4  ;;  %v3543_v48 = vshrl.u32 %v3263_v38, 16  ;;  %v3546_v37 = vshll.u32 %v3263_v38, 16  ;;  %v9987_v38 = vld [vmem:[#allocation2 + $0xc8] sm:$0x1] }
 0x1f2   : > { %8042 = vmatprep.mubr.bf16.mxu1 %v9812_v63  ;;  %8119 = vmatpush3.bf16.msra.mxu1 %v8373_v34  ;;  %v3531_v59 = vsel %vm8607_vm2, %v3526_v22, %v3530_v55  ;;  %v9952_v27 = vrot.slane %v3610_v1, 5  ;;  %v4144_v5 = vrot.slane %v3271_v56, 5  ;;  %v3552_v54 = vshll.u32 %v9823_v13, 16  ;;  %v8379_v63 = vld [vmem:[%s11300_s2 + $0x188] sm:$0xff]   ;;  %v9976_v55 = vld [vmem:[#allocation2 + $0xc4] sm:$0xf] }
 0x1f3   : > { %8120 = vmatprep.subr.bf16.mxu1 %v8376_v15  ;;  %v3541_v30 = vsel %vm8607_vm2, %v3536_v11, %v3540_v0  ;;  %v4142_v14 = vsel %vm9250_vm14, %v7030_v35, %v4141_v3  ;;  %v3545_v49 = vrot.slane %v3543_v48, 4  ;;  %v3548_v31 = vrot.slane %v3546_v37, 5  ;;  %v3269_v0 = vld [vmem:[#allocation2 + $0xa8] sm:$0xf]  ;;  %v9998_v1 = vld [vmem:[%s11300_s2 + $0x238] sm:$0xff]  }
 0x1f4   : > { %v4143_v45 = vrot.slane %v4141_v3, 4  ;;  %v3554_v20 = vrot.slane %v3552_v54, 5  ;;  %v7031_v34 = vrot.slane %v3998_v7, 9  ;;  %v4148_v2 = vrot.slane %v9937_v39, 5 }
 0x1f5   : > { %8099 = vmatmul.mubr.bf16.gmra.mxu0 %v7060_v4  ;;  %v9965_v13 = vcombine.low %v3531_v59, %v3541_v30  ;;  %v3549_v10 = vor.u32 %v3548_v31, %v3545_v49  ;;  %v4151_v17 = vrot.slane %v9943_v21, 5  ;;  %v3567_v8 = vshrl.u32 %v3266_v43, 16  ;;  %v4869_v59 = vld [vmem:[#allocation2 + $0x18] sm:$0xf] }
 0x1f6   : > { %8121 = vmatpush3.bf16.msra.mxu1 %v8376_v15  ;;  %8102 = vmatprep.mubr.bf16.mxu0 %v7061_v18  ;;  %v4145_v42 = vsel %vm9250_vm14, %v4143_v45, %v4144_v5  ;;  %v3559_v16 = vor.u32 %v9867_v28, %v3554_v20  ;;  %v4150_v46 = vrot.slane %v4148_v2, 4  ;;  %v3570_v52 = vshll.u32 %v3266_v43, 16  ;;  %v10005_v5 = vpop.f32.mrf.mxu0 }
 0x1f7   : > { %8122 = vmatprep.subr.bf16.mxu1 %v8379_v63  ;;  %v3550_v58 = vrot.slane %v3549_v10, 4  ;;  %v3569_v56 = vrot.slane %v3567_v8, 4  ;;  %v3576_v4 = vshll.u32 %v9863_v32, 16  ;;  %v3580_v53 = vshrl.u32 %v9863_v32, 16 }
 0x1f8   : > { %v3560_v60 = vrot.slane %v3559_v16, 4  ;;  %v4152_v28 = vsel %vm9250_vm14, %v4150_v46, %v4151_v17  ;;  %v3572_v50 = vrot.slane %v3570_v52, 5  ;;  %v3586_v44 = vshll.u32 %v9870_v6, 16  ;;  %v10017_v17 = vld [vmem:[#allocation2 + $0x20] sm:$0x1] }
 0x1f9   : > { %8043 = vmatmul.mubr.bf16.gmra.mxu1 %v9865_v19  ;;  %v7062_v26 = vcombine.low %v4142_v14, %v4145_v42  ;;  %v3555_v36 = vsel %vm8607_vm2, %v3550_v58, %v3554_v20  ;;  %v3578_v32 = vrot.slane %v3576_v4, 5  ;;  %v3582_v15 = vrot.slane %v3580_v53, 4  ;;  %v10012_v20 = vld [vmem:[#allocation2 + $0x1c] sm:$0xf]  ;;  %v3272_v52 = vld [vmem:[#allocation2 + $0xb4] sm:$0xf] }
 0x1fa   : > { %8046 = vmatprep.mubr.bf16.mxu1 %v9901_v40  ;;  %8123 = vmatpush3.bf16.msra.mxu1 %v8379_v63  ;;  %v3565_v19 = vsel %vm8607_vm2, %v3560_v60, %v9886_v61  ;;  %v4149_v6 = vsel %vm9250_vm14, %v7031_v34, %v4148_v2  ;;  %v3573_v18 = vor.u32 %v3572_v50, %v3569_v56  ;;  %v3652_v23 = vshrl.u32 %v9976_v55, 16  ;;  %v3999_v40 = vld [vmem:[#allocation2 + $0xc0] sm:$0xe] }
 0x1fb   : > { %8124 = vmatprep.subr.bf16.mxu1 %v8382_v41  ;;  %v10000_v22 = vcombine.low %v3555_v36, %v3565_v19  ;;  %v7063_v35 = vcombine.low %v4149_v6, %v4152_v28  ;;  %v3583_v3 = vor.u32 %v3582_v15, %v3578_v32  ;;  %v3588_v11 = vrot.slane %v3586_v44, 5 }
 0x1fc   : > { %v3574_v61 = vrot.slane %v3573_v18, 4  ;;  %v3658_v48 = vshll.u32 %v9987_v38, 16  ;;  %v4155_v37 = vrot.slane %v9976_v55, 5  ;;  %v4158_v7 = vrot.slane %v9987_v38, 5  ;;  %v4875_v38 = vld [vmem:[#allocation2 + $0x30] sm:$0xf] }
 0x1fd   : > { %8103 = vmatmul.mubr.bf16.gmra.mxu0 %v7062_v26  ;;  %v10007_v54 = vrot.slane %v3652_v23, 4  ;;  %v7032_v43 = vrot.slane %v3999_v40, 9  ;;  %v3591_v63 = vshrl.u32 %v3269_v0, 16  ;;  %v3594_v30 = vshll.u32 %v3269_v0, 16 }
 0x1fe   : > { %8125 = vmatpush3.bf16.msra.mxu1 %v8382_v41  ;;  %8106 = vmatprep.mubr.bf16.mxu0 %v7063_v35  ;;  %v3579_v14 = vsel %vm8607_vm2, %v3574_v61, %v3578_v32  ;;  %v3584_v49 = vrot.slane %v3583_v3, 4  ;;  %v4157_v31 = vrot.slane %v4155_v37, 4  ;;  %v3600_v45 = vshll.u32 %v9914_v25, 16  ;;  %v10026_v41 = vpop.f32.mrf.mxu0  ;;  %v4872_v35 = vld [vmem:[#allocation2 + $0x24] sm:$0xf]  ;;  %v10037_v3 = vpop.f32.mrf.mxu1 }
 0x1ff   : > { %8206 = vmatprep.subr.bf16.mxu1 %v9998_v1  ;;  %v4156_v34 = vsel %vm9250_vm14, %v7032_v43, %v4155_v37  ;;  %v3593_v2 = vrot.slane %v3591_v63, 4  ;;  %v3596_v10 = vrot.slane %v3594_v30, 5  ;;  %v4918_v8 = vshrl.u32 %v4869_v59, 16 }
 0x200   : > { %v3589_v42 = vsel %vm8607_vm2, %v3584_v49, %v3588_v11  ;;  %v4159_v25 = vsel %vm9250_vm14, %v4157_v31, %v4158_v7  ;;  %v10024_v16 = vrot.slane %v3600_v45, 5  ;;  %v4921_v46 = vshll.u32 %v4869_v59, 16  ;;  %v10034_v18 = vpop.f32.mrf.mxu0  ;;  %v10043_v59 = vld [vmem:[#allocation2 + $0x28] sm:$0xf] }
 0x201   : > { %8047 = vmatmul.mubr.bf16.gmra.mxu1 %v9940_v62  ;;  %v7064_v58 = vcombine.low %v4156_v34, %v4159_v25  ;;  %v3597_v56 = vor.u32 %v3596_v10, %v3593_v2  ;;  %v4920_v4 = vrot.slane %v4918_v8, 4  ;;  %v4927_v53 = vshll.u32 %v10012_v20, 16  ;;  %11331 = vst [vmem:[#allocation3_spill] sm:$0xff] %v10034_v18  ;;  %v10054_v8 = vld [vmem:[#allocation2 + $0x2c] sm:$0x1]  ;;  %v10057_v25 = vpop.f32.mrf.mxu1 }
 0x202   : > { %8050 = vmatprep.mubr.bf16.mxu1 %v9965_v13  ;;  %v3607_v62 = vor.u32 %v9948_v33, %v10024_v16  ;;  %v4923_v60 = vrot.slane %v4921_v46, 5  ;;  %v4931_v28 = vshrl.u32 %v10012_v20, 16  ;;  %v4937_v50 = vshll.u32 %v10017_v17, 16 }
 0x203   : > { %v3598_v44 = vrot.slane %v3597_v56, 4  ;;  %v4929_v26 = vrot.slane %v4927_v53, 5  ;;  %v3615_v36 = vshrl.u32 %v3272_v52, 16  ;;  %v3618_v32 = vshll.u32 %v3272_v52, 16  ;;  %v3275_v52 = vld [vmem:[#allocation2 + $0xc0] sm:$0xf] }
 0x204   : > { %v7005_v15 = vcombine.low %v3579_v14, %v3589_v42  ;;  %v3608_v19 = vrot.slane %v3607_v62, 4  ;;  %v4924_v13 = vor.u32 %v4923_v60, %v4920_v4  ;;  %v4933_v6 = vrot.slane %v4931_v28, 4 }
 0x205   : > { %8107 = vmatmul.mubr.bf16.gmra.mxu0 %v7064_v58  ;;  %v4939_v23 = vrot.slane %v4937_v50, 5  ;;  %v3617_v40 = vrot.slane %v3615_v36, 4  ;;  %v3620_v0 = vrot.slane %v3618_v32, 5  ;;  %v3624_v33 = vshll.u32 %v9937_v39, 16  ;;  %v10052_v2 = vpop.f32.mrf.mxu0 }
 0x206   : > { %v3603_v11 = vsel %vm8607_vm2, %v3598_v44, %v10024_v16  ;;  %v4925_v61 = vrot.slane %v4924_v13, 4  ;;  %v4934_v37 = vor.u32 %v4933_v6, %v4929_v26  ;;  %v3628_v7 = vshrl.u32 %v9937_v39, 16 }
 0x207   : > { %v3613_v43 = vsel %vm8607_vm2, %v3608_v19, %v9952_v27  ;;  %v3621_v63 = vor.u32 %v3620_v0, %v3617_v40  ;;  %v3626_v30 = vrot.slane %v3624_v33, 5  ;;  %v3634_v14 = vshll.u32 %v9943_v21, 16  ;;  %v10069_v44 = vpop.f32.mrf.mxu0  ;;  %v10076_v40 = vld [vmem:[#allocation2 + $0x34] sm:$0xf] }
 0x208   : > { %v4930_v49 = vsel %vm8607_vm2, %v4925_v61, %v4929_v26  ;;  %v4935_v31 = vrot.slane %v4934_v37, 4  ;;  %v3630_v45 = vrot.slane %v3628_v7, 4  ;;  %v4942_v34 = vshrl.u32 %v4872_v35, 16 }
 0x209   : > { %8051 = vmatmul.mubr.bf16.gmra.mxu1 %v10000_v22  ;;  %v3622_v39 = vrot.slane %v3621_v63, 4  ;;  %v3636_v10 = vrot.slane %v3634_v14, 5  ;;  %v4945_v27 = vshll.u32 %v4872_v35, 16  ;;  %v4951_v42 = vshll.u32 %v10043_v59, 16  ;;  %v10078_v63 = vpop.f32.mrf.mxu0 }
 0x20a   : > { %8054 = vmatprep.mubr.bf16.mxu1 %v7005_v15  ;;  %v4940_v21 = vsel %vm8607_vm2, %v4935_v31, %v4939_v23  ;;  %v3631_v22 = vor.u32 %v3630_v45, %v3626_v30  ;;  %v4944_v16 = vrot.slane %v4942_v34, 4  ;;  %v4955_v46 = vshrl.u32 %v10043_v59, 16  ;;  %v4878_v45 = vld [vmem:[#allocation2 + $0x3c] sm:$0xf] }
 0x20b   : > { %v10064_v58 = vrot.slane %v3658_v48, 5  ;;  %v7129_v56 = vcombine.low %v4930_v49, %v4940_v21  ;;  %v4947_v4 = vrot.slane %v4945_v27, 5  ;;  %v4953_v53 = vrot.slane %v4951_v42, 5  ;;  %v10071_v48 = vpop.f32.mrf.mxu1  ;;  %v10082_v49 = vld [vmem:[#allocation2 + $0x38] sm:$0x1] }
 0x20c   : > { %v3627_v62 = vsel %vm8607_vm2, %v3622_v39, %v3626_v30  ;;  %v3632_v60 = vrot.slane %v3631_v22, 4  ;;  %v4957_v28 = vrot.slane %v4955_v46, 4  ;;  %v4961_v50 = vshll.u32 %v10054_v8, 16  ;;  %v10091_v21 = vld [vmem:[#allocation2 + $0x40] sm:$0xf] }
 0x20d   : > { %v7006_v26 = vcombine.low %v3603_v11, %v3613_v43  ;;  %8174 = vmatprep.mubr.bf16.mxu0 %v7129_v56  ;;  %v4948_v36 = vor.u32 %v4947_v4, %v4944_v16  ;;  %v3639_v32 = vshrl.u32 %v3275_v52, 16  ;;  %v3642_v15 = vshll.u32 %v3275_v52, 16  ;;  %v10086_v34 = vpop.f32.mrf.mxu1 }
 0x20e   : > { %v3637_v19 = vsel %vm8607_vm2, %v3632_v60, %v3636_v10  ;;  %v4958_v13 = vor.u32 %v4957_v28, %v4953_v53  ;;  %v4963_v6 = vrot.slane %v4961_v50, 5  ;;  %v3648_v23 = vshll.u32 %v9976_v55, 16  ;;  %v10094_v60 = vpop.f32.mrf.mxu0  ;;  %v10098_v50 = vld [vmem:[#allocation2 + $0x44] sm:$0x1] }
 0x20f   : > { %v7007_v0 = vcombine.low %v3627_v62, %v3637_v19  ;;  %v4949_v33 = vrot.slane %v4948_v36, 4  ;;  %v3641_v35 = vrot.slane %v3639_v32, 4  ;;  %v3644_v11 = vrot.slane %v3642_v15, 5 }
 0x210   : > { %v4959_v61 = vrot.slane %v4958_v13, 4  ;;  %v3650_v37 = vrot.slane %v3648_v23, 5  ;;  %v4966_v7 = vshrl.u32 %v4875_v38, 16  ;;  %v4969_v43 = vshll.u32 %v4875_v38, 16 }
 0x211   : > { %8055 = vmatmul.mubr.bf16.gmra.mxu1 %v7006_v26  ;;  %v4954_v30 = vsel %vm8607_vm2, %v4949_v33, %v4953_v53  ;;  %v3645_v14 = vor.u32 %v3644_v11, %v3641_v35  ;;  %v4975_v55 = vshll.u32 %v10076_v40, 16  ;;  %v4979_v31 = vshrl.u32 %v10076_v40, 16  ;;  %v10101_v32 = vpop.f32.mrf.mxu1  ;;  %v8383_v11 = vld [vmem:[#allocation2 + $0x18] sm:$0xff]  }
 0x212   : > { %8058 = vmatprep.mubr.bf16.mxu1 %v7007_v0  ;;  %v4964_v39 = vsel %vm8607_vm2, %v4959_v61, %v4963_v6  ;;  %v3655_v10 = vor.u32 %v10007_v54, %v3650_v37  ;;  %v4968_v27 = vrot.slane %v4966_v7, 4  ;;  %v4971_v42 = vrot.slane %v4969_v43, 5  ;;  %v4881_v6 = vld [vmem:[#allocation2 + $0x48] sm:$0xf]  ;;  %v10110_v43 = vld [vmem:[#allocation2 + $0x4c] sm:$0xf] }
 0x213   : > { %v7130_v22 = vcombine.low %v4954_v30, %v4964_v39  ;;  %v3646_v16 = vrot.slane %v3645_v14, 4  ;;  %v4977_v46 = vrot.slane %v4975_v55, 5  ;;  %v4981_v52 = vrot.slane %v4979_v31, 4  ;;  %v10120_v31 = vld [vmem:[#allocation2 + $0x50] sm:$0x1]  ;;  %v10122_v39 = vpop.f32.mrf.mxu1 }
 0x214   : > { %v3656_v56 = vrot.slane %v3655_v10, 4  ;;  %v4972_v4 = vor.u32 %v4971_v42, %v4968_v27  ;;  %v4985_v53 = vshll.u32 %v10082_v49, 16  ;;  %v4990_v62 = vshrl.u32 %v4878_v45, 16 }
 0x215   : > { %8175 = vmatmul.mubr.bf16.vlgmr.msra.gmra.mxu0 %v7130_v22  ;;  %v3651_v28 = vsel %vm8607_vm2, %v3646_v16, %v3650_v37  ;;  %v4982_v54 = vor.u32 %v4981_v52, %v4977_v46  ;;  %v4993_v26 = vshll.u32 %v4878_v45, 16  ;;  %v4999_v36 = vshll.u32 %v10091_v21, 16  ;;  %v10112_v30 = vpop.f32.mrf.mxu0 }
 0x216   : > { %v3661_v15 = vsel %vm8607_vm2, %v3656_v56, %v10064_v58  ;;  %v4973_v38 = vrot.slane %v4972_v4, 4  ;;  %v4987_v19 = vrot.slane %v4985_v53, 5  ;;  %v4992_v13 = vrot.slane %v4990_v62, 4  ;;  %v4884_v62 = vld [vmem:[#allocation2 + $0x54] sm:$0xf] }
 0x217   : > { %v7008_v23 = vcombine.low %v3651_v28, %v3661_v15  ;;  %v4983_v0 = vrot.slane %v4982_v54, 4  ;;  %v4995_v33 = vrot.slane %v4993_v26, 5  ;;  %v5001_v61 = vrot.slane %v4999_v36, 5  ;;  %v10131_v28 = vld [vmem:[#allocation2 + $0x58] sm:$0xf]  ;;  %v10133_v54 = vpop.f32.mrf.mxu0 }
 0x218   : > { %v4978_v35 = vsel %vm8607_vm2, %v4973_v38, %v4977_v46  ;;  %v5003_v37 = vshrl.u32 %v10091_v21, 16  ;;  %v5009_v7 = vshll.u32 %v10098_v50, 16  ;;  %v10118_v55 = vadd.f32 %v9898_v29, %v10037_v3  ;;  %v10139_v38 = vld [vmem:[#allocation2 + $0x5c] sm:$0x1] }
 0x219   : > { %8059 = vmatmul.mubr.bf16.gmra.mxu1 %v7008_v23  ;;  %v4988_v58 = vsel %vm8607_vm2, %v4983_v0, %v4987_v19  ;;  %v4996_v14 = vor.u32 %v4995_v33, %v4992_v13  ;;  %v5014_v45 = vshrl.u32 %v4881_v6, 16  ;;  %v5017_v22 = vshll.u32 %v4881_v6, 16  ;;  %v10141_v19 = vpop.f32.mrf.mxu1  ;;  %v8385_v23 = vld [vmem:[#allocation2 + $0x24] sm:$0xff]  }
 0x21a   : > { %v7131_v10 = vcombine.low %v4978_v35, %v4988_v58  ;;  %8126 = vmatprep.mubr.bf16.mxu1 %v8383_v11  ;;  %v5005_v27 = vrot.slane %v5003_v37, 4  ;;  %v5011_v42 = vrot.slane %v5009_v7, 5  ;;  %v5023_v52 = vshll.u32 %v10110_v43, 16  ;;  %v8386_v7 = vld [vmem:[#allocation2 + $0x30] sm:$0xff]  }
 0x21b   : > { %v4997_v16 = vrot.slane %v4996_v14, 4  ;;  %v5016_v46 = vrot.slane %v5014_v45, 4  ;;  %v5027_v56 = vshrl.u32 %v10110_v43, 16  ;;  %v5019_v29 = vrot.slane %v5017_v22, 5  ;;  %v10153_v14 = vpop.f32.mrf.mxu0 }
 0x21c   : > { %8178 = vmatprep.mubr.bf16.mxu0 %v7131_v10  ;;  %v5006_v4 = vor.u32 %v5005_v27, %v5001_v61  ;;  %v5033_v3 = vshll.u32 %v10120_v31, 16  ;;  %v10129_v53 = vadd.f32 %v9919_v51, %v10057_v25  ;;  %v5025_v26 = vrot.slane %v5023_v52, 5 }
 0x21d   : > { %v5029_v36 = vrot.slane %v5027_v56, 4  ;;  %v10137_v15 = vadd.f32 %v9945_v24, %v10071_v48  ;;  %v5002_v13 = vsel %vm8607_vm2, %v4997_v16, %v5001_v61  ;;  %v5020_v25 = vor.u32 %v5019_v29, %v5016_v46  ;;  %v8387_v24 = vld [vmem:[%s11300_s2 + $0x230] sm:$0xff]   ;;  %v4887_v16 = vld [vmem:[#allocation2 + $0x60] sm:$0xf]  ;;  %v10155_v46 = vpop.f32.mrf.mxu1  ;;  %v10162_v29 = vld [vmem:[#allocation2 + $0x68] sm:$0x1] }
 0x21e   : > { %v5007_v51 = vrot.slane %v5006_v4, 4  ;;  %v5035_v6 = vrot.slane %v5033_v3, 5  ;;  %v5038_v33 = vshrl.u32 %v4884_v62, 16  ;;  %v5041_v35 = vshll.u32 %v4884_v62, 16  ;;  %11332 = vst [vmem:[#allocation4_spill] sm:$0xff] %v10155_v46 }
 0x21f   : > { %v5030_v0 = vor.u32 %v5029_v36, %v5025_v26  ;;  %v5047_v11 = vshll.u32 %v10131_v28, 16  ;;  %v5021_v37 = vrot.slane %v5020_v25, 4  ;;  %v5051_v61 = vshrl.u32 %v10131_v28, 16  ;;  %v10160_v4 = vld [vmem:[#allocation2 + $0x64] sm:$0xf] }
 0x220   : > { %v5012_v48 = vsel %vm8607_vm2, %v5007_v51, %v5011_v42  ;;  %v5057_v58 = vshll.u32 %v10139_v38, 16  ;;  %v5040_v27 = vrot.slane %v5038_v33, 4  ;;  %v5043_v22 = vrot.slane %v5041_v35, 5 }
 0x221   : > { %v7132_v45 = vcombine.low %v5002_v13, %v5012_v48  ;;  %8127 = vmatmul.mubr.bf16.vlgmr.msra.gmra.mxu1 %v8385_v23  ;;  %v5031_v10 = vrot.slane %v5030_v0, 4  ;;  %v5026_v52 = vsel %vm8607_vm2, %v5021_v37, %v5025_v26  ;;  %v5049_v42 = vrot.slane %v5047_v11, 5  ;;  %v10173_v0 = vpop.f32.mrf.mxu0  ;;  %v10178_v48 = vld [vmem:[#allocation2 + $0x70] sm:$0xf] }
 0x222   : > { %8207 = vmatpush3.bf16.msra.mxu1 %v9998_v1  ;;  %8130 = vmatprep.mubr.bf16.mxu1 %v8386_v7  ;;  %v5053_v56 = vrot.slane %v5051_v61, 4  ;;  %v5044_v62 = vor.u32 %v5043_v22, %v5040_v27  ;;  %v5059_v36 = vrot.slane %v5057_v58, 5  ;;  %v10168_v13 = vadd.f32 %v9982_v47, %v10101_v32  ;;  %v8390_v1 = vld [vmem:[%s11300_s2 + $0x228] sm:$0xff]  }
 0x223   : > { %8179 = vmatmul.mubr.bf16.gmra.mxu0 %v7132_v45  ;;  %v5036_v3 = vsel %vm8607_vm2, %v5031_v10, %v5035_v6  ;;  %8208 = vmatprep.subr.bf16.mxu1 %v8387_v24  ;;  %v5062_v25 = vshrl.u32 %v4887_v16, 16  ;;  %v5065_v23 = vshll.u32 %v4887_v16, 16  ;;  %v5071_v6 = vshll.u32 %v10160_v4, 16  ;;  %v4890_v58 = vld [vmem:[#allocation2 + $0x6c] sm:$0xf]  ;;  %v8388_v10 = vld [vmem:[#allocation2 + $0x3c] sm:$0xff]  }
 0x224   : > { %11333 = vst [vmem:[#allocation5_spill] sm:$0xff] %v10168_v13  ;;  %v7133_v26 = vcombine.low %v5026_v52, %v5036_v3  ;;  %v5054_v51 = vor.u32 %v5053_v56, %v5049_v42  ;;  %v5045_v33 = vrot.slane %v5044_v62, 4  ;;  %v5075_v35 = vshrl.u32 %v10160_v4, 16  ;;  %v10186_v16 = vld [vmem:[#allocation2 + $0x74] sm:$0x1]  ;;  %v8393_v56 = vld [vmem:[%s11300_s2 + $0x220] sm:$0xff]  }
 0x225   : > { %v5081_v11 = vshll.u32 %v10162_v29, 16  ;;  %v7848_v47 = vpop.f32.mrf.mxu1  ;;  %v5064_v37 = vrot.slane %v5062_v25, 4  ;;  %v5067_v7 = vrot.slane %v5065_v23, 5  ;;  %v10182_v61 = vadd.f32 %v10005_v5, %v10122_v39  ;;  %v8389_v3 = vld [vmem:[#allocation2 + $0x48] sm:$0xff]  }
 0x226   : > { %8182 = vmatprep.mubr.bf16.mxu0 %v7133_v26  ;;  %v5055_v32 = vrot.slane %v5054_v51, 4  ;;  %8209 = vmatpush3.bf16.msra.mxu1 %v8387_v24  ;;  %v5050_v45 = vsel %vm8607_vm2, %v5045_v33, %v5049_v42  ;;  %v5073_v27 = vrot.slane %v5071_v6, 5  ;;  %v5077_v22 = vrot.slane %v5075_v35, 4  ;;  %v10197_v62 = vpop.f32.mrf.mxu0 }
 0x227   : > { %11334 = vst [vmem:[#allocation6_spill] sm:$0xff] %v10182_v61  ;;  %8210 = vmatprep.subr.bf16.mxu1 %v8390_v1  ;;  %v1959_v52 = vpop.f32.mrf.mxu1  ;;  %v5068_v5 = vor.u32 %v5067_v7, %v5064_v37  ;;  %v5083_v39 = vrot.slane %v5081_v11, 5  ;;  %v10195_v42 = vadd.f32 %v10026_v41, %v10141_v19  ;;  %v5086_v25 = vshrl.u32 %v4890_v58, 16  ;;  %v4893_v11 = vld [vmem:[#allocation2 + $0x78] sm:$0xf] }
 0x228   : > { %v5060_v24 = vsel %vm8607_vm2, %v5055_v32, %v5059_v36  ;;  %v5078_v51 = vor.u32 %v5077_v22, %v5073_v27  ;;  %v5089_v23 = vshll.u32 %v4890_v58, 16  ;;  %v5095_v6 = vshll.u32 %v10178_v48, 16  ;;  %v10202_v32 = vpop.f32.mrf.mxu0  ;;  %v10204_v7 = vld [vmem:[#allocation2 + $0x7c] sm:$0xf] }
 0x229   : > { %11335 = vst [vmem:[#allocation7_spill] sm:$0xff] %v10195_v42  ;;  %v7134_v26 = vcombine.low %v5050_v45, %v5060_v24  ;;  %8131 = vmatmul.mubr.bf16.gmra.mxu1 %v8388_v10  ;;  %v5069_v33 = vrot.slane %v5068_v5, 4  ;;  %v5099_v36 = vshrl.u32 %v10178_v48, 16  ;;  %v5105_v35 = vshll.u32 %v10186_v16, 16  ;;  %v7849_v45 = vpop.f32.mrf.mxu1  ;;  %v8396_v58 = vld [vmem:[%s11300_s2 + $0x218] sm:$0xff]  }
 0x22a   : > { %8134 = vmatprep.mubr.bf16.mxu1 %v8389_v3  ;;  %8211 = vmatpush3.bf16.msra.mxu1 %v8390_v1  ;;  %v5079_v41 = vrot.slane %v5078_v51, 4  ;;  %v5088_v19 = vrot.slane %v5086_v25, 4  ;;  %v5091_v37 = vrot.slane %v5089_v23, 5  ;;  %v5097_v22 = vrot.slane %v5095_v6, 5  ;;  %v10211_v5 = vld [vmem:[#allocation2 + $0x80] sm:$0x1]  ;;  %v10213_v3 = vpop.f32.mrf.mxu0 }
 0x22b   : > { %8183 = vmatmul.mubr.bf16.gmra.mxu0 %v7134_v26  ;;  %8212 = vmatprep.subr.bf16.mxu1 %v8393_v56  ;;  %v5074_v10 = vsel %vm8607_vm2, %v5069_v33, %v5073_v27  ;;  %v5101_v24 = vrot.slane %v5099_v36, 4  ;;  %v5107_v1 = vrot.slane %v5105_v35, 5  ;;  %v10218_v25 = vadd.f32 %v10052_v2, %v7848_v47  ;;  %v4896_v33 = vld [vmem:[#allocation2 + $0x84] sm:$0xf]  ;;  %v8391_v36 = vld [vmem:[#allocation2 + $0x54] sm:$0xff]  }
 0x22c   : > { %v5084_v26 = vsel %vm8607_vm2, %v5079_v41, %v5083_v39  ;;  %v5092_v51 = vor.u32 %v5091_v37, %v5088_v19  ;;  %v5110_v23 = vshrl.u32 %v4893_v11, 16  ;;  %v5113_v46 = vshll.u32 %v4893_v11, 16  ;;  %v1962_v39 = vpop.f32.mrf.mxu1  ;;  %v8399_v2 = vld [vmem:[%s11300_s2 + $0x210] sm:$0xff]   ;;  %v8392_v19 = vld [vmem:[#allocation2 + $0x60] sm:$0xff]   ;;  %v10229_v37 = vld [vmem:[#allocation2 + $0x88] sm:$0xf] }
 0x22d   : > { %11336 = vst [vmem:[#allocation8_spill] sm:$0xff] %v10218_v25  ;;  %v7135_v42 = vcombine.low %v5074_v10, %v5084_v26  ;;  %v5102_v18 = vor.u32 %v5101_v24, %v5097_v22  ;;  %v5119_v27 = vshll.u32 %v10204_v7, 16  ;;  %v5123_v61 = vshrl.u32 %v10204_v7, 16  ;;  %v10231_v10 = vpop.f32.mrf.mxu0  ;;  %v10280_v25 = vld [vmem:[#allocation2 + $0xa0] sm:$0xf] }
 0x22e   : > { %8213 = vmatpush3.bf16.msra.mxu1 %v8393_v56  ;;  %v5093_v6 = vrot.slane %v5092_v51, 4  ;;  %v5112_v35 = vrot.slane %v5110_v23, 4  ;;  %v5129_v13 = vshll.u32 %v10211_v5, 16  ;;  %v5115_v11 = vrot.slane %v5113_v46, 5  ;;  %11338 = vst [vmem:[#allocation10_spill] sm:$0xff] %v10231_v10  ;;  %11345 = vst [vmem:[#allocation17_spill] sm:$0xff] %v10280_v25 }
 0x22f   : > { %8214 = vmatprep.subr.bf16.mxu1 %v8396_v58  ;;  %8186 = vmatprep.mubr.bf16.mxu0 %v7135_v42  ;;  %v5103_v47 = vrot.slane %v5102_v18, 4  ;;  %v5121_v41 = vrot.slane %v5119_v27, 5  ;;  %v10227_v56 = vadd.f32 %v10069_v44, %v1959_v52  ;;  %v5125_v26 = vrot.slane %v5123_v61, 4  ;;  %v10238_v18 = vld [vmem:[#allocation2 + $0x8c] sm:$0x1] }
 0x230   : > { %v5098_v24 = vsel %vm8607_vm2, %v5093_v6, %v5097_v22  ;;  %v5131_v51 = vrot.slane %v5129_v13, 5  ;;  %v10236_v23 = vadd.f32 %v10078_v63, %v7849_v45  ;;  %v5116_v44 = vor.u32 %v5115_v11, %v5112_v35  ;;  %v4899_v63 = vld [vmem:[#allocation2 + $0x90] sm:$0xf]  ;;  %v8402_v45 = vld [vmem:[%s11300_s2 + $0x208] sm:$0xff]  }
 0x231   : > { %11337 = vst [vmem:[#allocation9_spill] sm:$0xff] %v10227_v56  ;;  %8135 = vmatmul.mubr.bf16.gmra.mxu1 %v8391_v36  ;;  %v5108_v46 = vsel %vm8607_vm2, %v5103_v47, %v5107_v1  ;;  %v10243_v52 = vadd.f32 %v10094_v60, %v1962_v39  ;;  %v5134_v42 = vshrl.u32 %v4896_v33, 16  ;;  %v5126_v22 = vor.u32 %v5125_v26, %v5121_v41  ;;  %v10251_v39 = vld [vmem:[#allocation2 + $0x94] sm:$0xf]  ;;  %v4902_v56 = vld [vmem:[#allocation2 + $0x9c] sm:$0xf] }
 0x232   : > { %11339 = vst [vmem:[#allocation11_spill] sm:$0xff] %v10236_v23  ;;  %8138 = vmatprep.mubr.bf16.mxu1 %v8392_v19  ;;  %8215 = vmatpush3.bf16.msra.mxu1 %v8396_v58  ;;  %v7136_v27 = vcombine.low %v5098_v24, %v5108_v46  ;;  %v5137_v6 = vshll.u32 %v4896_v33, 16  ;;  %v5143_v13 = vshll.u32 %v10229_v37, 16  ;;  %v5117_v1 = vrot.slane %v5116_v44, 4 }
 0x233   : > { %11340 = vst [vmem:[#allocation12_spill] sm:$0xff] %v10243_v52  ;;  %8216 = vmatprep.subr.bf16.mxu1 %v8399_v2  ;;  %v5136_v36 = vrot.slane %v5134_v42, 4  ;;  %v5147_v35 = vshrl.u32 %v10229_v37, 16  ;;  %v5153_v60 = vshll.u32 %v10238_v18, 16  ;;  %v5127_v33 = vrot.slane %v5126_v22, 4 }
 0x234   : > { %v7852_v61 = vpop.f32.mrf.mxu1  ;;  %v10253_v58 = vpop.f32.mrf.mxu0  ;;  %8187 = vmatmul.mubr.bf16.gmra.mxu0 %v7136_v27  ;;  %v5139_v47 = vrot.slane %v5137_v6, 5  ;;  %v5145_v11 = vrot.slane %v5143_v13, 5  ;;  %v5122_v26 = vsel %vm8607_vm2, %v5117_v1, %v5121_v41  ;;  %v10260_v42 = vld [vmem:[#allocation2 + $0x98] sm:$0x1]  ;;  %v5158_v10 = vshrl.u32 %v4899_v63, 16  ;;  %v8394_v6 = vld [vmem:[#allocation2 + $0x6c] sm:$0xff]  }
 0x235   : > { %v10256_v19 = vadd.f32 %v10112_v30, %v7852_v61  ;;  %v5149_v46 = vrot.slane %v5147_v35, 4  ;;  %v5155_v44 = vrot.slane %v5153_v60, 5  ;;  %11342 = vst [vmem:[#allocation14_spill] sm:$0xff] %v10260_v42  ;;  %v5132_v27 = vsel %vm8607_vm2, %v5127_v33, %v5131_v51  ;;  %v8395_v60 = vld [vmem:[#allocation2 + $0x78] sm:$0xff]  }
 0x236   : > { %v1975_v24 = vpop.f32.mrf.mxu1  ;;  %v10262_v52 = vpop.f32.mrf.mxu0  ;;  %8217 = vmatpush3.bf16.msra.mxu1 %v8399_v2  ;;  %v5140_v22 = vor.u32 %v5139_v47, %v5136_v36  ;;  %v5161_v13 = vshll.u32 %v4899_v63, 16  ;;  %v5167_v30 = vshll.u32 %v10251_v39, 16  ;;  %v5160_v1 = vrot.slane %v5158_v10, 4  ;;  %v8405_v2 = vld [vmem:[%s11300_s2 + $0x200] sm:$0xff]  }
 0x237   : > { %11341 = vst [vmem:[#allocation13_spill] sm:$0xff] %v10256_v19  ;;  %8218 = vmatprep.subr.bf16.mxu1 %v8402_v45  ;;  %v7137_v19 = vcombine.low %v5122_v26, %v5132_v27  ;;  %v5150_v41 = vor.u32 %v5149_v46, %v5145_v11  ;;  %v5171_v35 = vshrl.u32 %v10251_v39, 16  ;;  %v5177_v33 = vshll.u32 %v10260_v42, 16 }
 0x238   : > { %v7853_v61 = vpop.f32.mrf.mxu1  ;;  %v10268_v23 = vpop.f32.mrf.mxu0  ;;  %v5141_v51 = vrot.slane %v5140_v22, 4  ;;  %v5163_v36 = vrot.slane %v5161_v13, 5  ;;  %v5169_v63 = vrot.slane %v5167_v30, 5  ;;  %v10275_v46 = vadd.f32 %v10133_v54, %v1975_v24 }
 0x239   : > { %8139 = vmatmul.mubr.bf16.gmra.mxu1 %v8394_v6  ;;  %8190 = vmatprep.mubr.bf16.mxu0 %v7137_v19  ;;  %v5151_v26 = vrot.slane %v5150_v41, 4  ;;  %v5173_v10 = vrot.slane %v5171_v35, 4  ;;  %v10278_v27 = vadd.f32 %v10153_v14, %v7853_v61  ;;  %v5179_v30 = vrot.slane %v5177_v33, 5  ;;  %v10289_v41 = vld [vmem:[#allocation2 + $0xa4] sm:$0x1] }
 0x23a   : > { %v1978_v47 = vpop.f32.mrf.mxu1  ;;  %8142 = vmatprep.mubr.bf16.mxu1 %v8395_v60  ;;  %11343 = vst [vmem:[#allocation15_spill] sm:$0xff] %v10275_v46  ;;  %v10282_v22 = vpop.f32.mrf.mxu0  ;;  %v5146_v6 = vsel %vm8607_vm2, %v5141_v51, %v5145_v11  ;;  %v5164_v13 = vor.u32 %v5163_v36, %v5160_v1  ;;  %11348 = vst [vmem:[#allocation20_spill] sm:$0xff] %v10289_v41  ;;  %8219 = vmatpush3.bf16.msra.mxu1 %v8402_v45  ;;  %v5182_v24 = vshrl.u32 %v4902_v56, 16  ;;  %v8398_v46 = vld [vmem:[#allocation2 + $0x90] sm:$0xff]  }
 0x23b   : > { %11344 = vst [vmem:[#allocation16_spill] sm:$0xff] %v10278_v27  ;;  %11346 = vst [vmem:[#allocation18_spill] sm:$0xff] %v10282_v22  ;;  %v10287_v19 = vadd.f32 %v10173_v0, %v1978_v47  ;;  %v5156_v54 = vsel %vm8607_vm2, %v5151_v26, %v5155_v44  ;;  %v5174_v14 = vor.u32 %v5173_v10, %v5169_v63  ;;  %v5185_v61 = vshll.u32 %v4902_v56, 16  ;;  %v4905_v0 = vld [vmem:[#allocation2 + $0xa8] sm:$0xf] }
 0x23c   : > { %8220 = vmatprep.subr.bf16.mxu1 %v8405_v2  ;;  %v7138_v60 = vcombine.low %v5146_v6, %v5156_v54  ;;  %v5165_v22 = vrot.slane %v5164_v13, 4  ;;  %v5191_v11 = vshll.u32 %v10280_v25, 16  ;;  %v5195_v1 = vshrl.u32 %v10280_v25, 16  ;;  %v10298_v44 = vld [vmem:[#allocation2 + $0xac] sm:$0xf]  ;;  %v8397_v54 = vld [vmem:[#allocation2 + $0x84] sm:$0xff]  }
 0x23d   : > { %11347 = vst [vmem:[#allocation19_spill] sm:$0xff] %v10287_v19  ;;  %v10293_v35 = vpop.f32.mrf.mxu0  ;;  %v5175_v51 = vrot.slane %v5174_v14, 4  ;;  %v5184_v36 = vrot.slane %v5182_v24, 4  ;;  %v5187_v33 = vrot.slane %v5185_v61, 5  ;;  %v5201_v45 = vshll.u32 %v10289_v41, 16  ;;  %11349 = vst [vmem:[#allocation21_spill] sm:$0xff] %v10298_v44 }
 0x23e   : > { %v7856_v47 = vpop.f32.mrf.mxu1  ;;  %8191 = vmatmul.mubr.bf16.gmra.mxu0 %v7138_v60  ;;  %v5170_v56 = vsel %vm8607_vm2, %v5165_v22, %v5169_v63  ;;  %v5193_v10 = vrot.slane %v5191_v11, 5  ;;  %v5197_v6 = vrot.slane %v5195_v1, 4  ;;  %v10307_v14 = vld [vmem:[#allocation2 + $0xb0] sm:$0x1]  ;;  %8221 = vmatpush3.bf16.msra.mxu1 %v8405_v2  ;;  %v5206_v27 = vshrl.u32 %v4905_v0, 16 }
 0x23f   : > { %v10300_v26 = vpop.f32.mrf.mxu0  ;;  %v10305_v13 = vadd.f32 %v10197_v62, %v7856_v47  ;;  %11351 = vst [vmem:[#allocation23_spill] sm:$0xff] %v10307_v14  ;;  %v5180_v24 = vsel %vm8607_vm2, %v5175_v51, %v5179_v30  ;;  %v5188_v61 = vor.u32 %v5187_v33, %v5184_v36  ;;  %v5203_v19 = vrot.slane %v5201_v45, 5  ;;  %v4908_v51 = vld [vmem:[#allocation2 + $0xb4] sm:$0xf] }
 0x240   : > { %v1991_v60 = vpop.f32.mrf.mxu1  ;;  %v7139_v63 = vcombine.low %v5170_v56, %v5180_v24  ;;  %v5198_v22 = vor.u32 %v5197_v6, %v5193_v10  ;;  %v5209_v11 = vshll.u32 %v4905_v0, 16  ;;  %v5215_v62 = vshll.u32 %v10298_v44, 16  ;;  %v10321_v0 = vld [vmem:[#allocation2 + $0xb8] sm:$0xf] }
 0x241   : > { %11350 = vst [vmem:[#allocation22_spill] sm:$0xff] %v10305_v13  ;;  %v10311_v41 = vpop.f32.mrf.mxu0  ;;  %8143 = vmatmul.mubr.bf16.gmra.mxu1 %v8397_v54  ;;  %v5189_v1 = vrot.slane %v5188_v61, 4  ;;  %v5208_v47 = vrot.slane %v5206_v27, 4  ;;  %v5219_v2 = vshrl.u32 %v10298_v44, 16  ;;  %v5225_v13 = vshll.u32 %v10307_v14, 16  ;;  %11354 = vst [vmem:[#allocation26_spill] sm:$0xff] %v10321_v0 }
 0x242   : > { %8146 = vmatprep.mubr.bf16.mxu1 %v8398_v46  ;;  %v7857_v30 = vpop.f32.mrf.mxu1  ;;  %8194 = vmatprep.mubr.bf16.mxu0 %v7139_v63  ;;  %v5199_v33 = vrot.slane %v5198_v22, 4  ;;  %v5211_v45 = vrot.slane %v5209_v11, 5  ;;  %v5217_v56 = vrot.slane %v5215_v62, 5  ;;  %v10319_v6 = vadd.f32 %v10202_v32, %v1991_v60  ;;  %v10330_v61 = vld [vmem:[#allocation2 + $0xbc] sm:$0x1] }
 0x243   : > { %v10316_v36 = vpop.f32.mrf.mxu0  ;;  %v5194_v27 = vsel %vm8607_vm2, %v5189_v1, %v5193_v10  ;;  %v5221_v54 = vrot.slane %v5219_v2, 4  ;;  %v10326_v24 = vadd.f32 %v10213_v3, %v7857_v30  ;;  %11357 = vst [vmem:[#allocation29_spill] sm:$0xff] %v10330_v61  ;;  %v5227_v11 = vrot.slane %v5225_v13, 5  ;;  %v8400_v1 = vld [vmem:[#allocation2 + $0x9c] sm:$0xff]  }
 0x244   : > { %11352 = vst [vmem:[#allocation24_spill] sm:$0xff] %v10316_v36  ;;  %11353 = vst [vmem:[#allocation25_spill] sm:$0xff] %v10319_v6  ;;  %v10328_v46 = vpop.f32.mrf.mxu1  ;;  %v5204_v63 = vsel %vm8607_vm2, %v5199_v33, %v5203_v19  ;;  %v5212_v22 = vor.u32 %v5211_v45, %v5208_v47  ;;  %v5230_v32 = vshrl.u32 %v4908_v51, 16  ;;  %v5233_v6 = vshll.u32 %v4908_v51, 16  ;;  %v4911_v3 = vld [vmem:[#allocation2 + $0xc0] sm:$0xf] }
 0x245   : > { %11355 = vst [vmem:[#allocation27_spill] sm:$0xff] %v10326_v24  ;;  %11356 = vst [vmem:[#allocation28_spill] sm:$0xff] %v10328_v46  ;;  %v10334_v60 = vpop.f32.mrf.mxu0  ;;  %v7140_v62 = vcombine.low %v5194_v27, %v5204_v63  ;;  %v5222_v36 = vor.u32 %v5221_v54, %v5217_v56  ;;  %v5239_v10 = vshll.u32 %v10321_v0, 16  ;;  %v5243_v24 = vshrl.u32 %v10321_v0, 16  ;;  %v10339_v19 = vld [vmem:[#allocation2 + $0xc4] sm:$0xf] }
 0x246   : > { %v5213_v2 = vrot.slane %v5212_v22, 4  ;;  %v5232_v30 = vrot.slane %v5230_v32, 4  ;;  %v5249_v46 = vshll.u32 %v10330_v61, 16  ;;  %v5235_v33 = vrot.slane %v5233_v6, 5  ;;  %v8401_v27 = vld [vmem:[#allocation2 + $0xa8] sm:$0xff]  }
 0x247   : > { %v7860_v14 = vpop.f32.mrf.mxu1  ;;  %v10341_v13 = vpop.f32.mrf.mxu0  ;;  %8195 = vmatmul.mubr.bf16.gmra.mxu0 %v7140_v62  ;;  %v5223_v47 = vrot.slane %v5222_v36, 4  ;;  %v5241_v45 = vrot.slane %v5239_v10, 5  ;;  %v5245_v63 = vrot.slane %v5243_v24, 4  ;;  %v10348_v32 = vld [vmem:[#allocation2 + $0xc8] sm:$0x1]  ;;  %v5254_v44 = vshrl.u32 %v4911_v3, 16 }
 0x248   : > { %v10344_v51 = vadd.f32 %v10253_v58, %v7860_v14  ;;  %v5218_v54 = vsel %vm8607_vm2, %v5213_v2, %v5217_v56  ;;  %v5251_v22 = vrot.slane %v5249_v46, 5  ;;  %v5236_v6 = vor.u32 %v5235_v33, %v5232_v30 }
 0x249   : > { %8147 = vmatmul.mubr.bf16.gmra.mxu1 %v8400_v1  ;;  %v2007_v61 = vpop.f32.mrf.mxu1  ;;  %v10350_v0 = vpop.f32.mrf.mxu0  ;;  %v5228_v36 = vsel %vm8607_vm2, %v5223_v47, %v5227_v11  ;;  %v5257_v62 = vshll.u32 %v4911_v3, 16  ;;  %v5263_v58 = vshll.u32 %v10339_v19, 16  ;;  %v5246_v10 = vor.u32 %v5245_v63, %v5241_v45  ;;  %v8404_v63 = vld [vmem:[#allocation2 + $0xc0] sm:$0xff]  }
 0x24a   : > { %11358 = vst [vmem:[#allocation30_spill] sm:$0xff] %v10344_v51  ;;  %8150 = vmatprep.mubr.bf16.mxu1 %v8401_v27  ;;  %v7141_v14 = vcombine.low %v5218_v54, %v5228_v36  ;;  %v5256_v56 = vrot.slane %v5254_v44, 4  ;;  %v5267_v24 = vshrl.u32 %v10339_v19, 16  ;;  %v5237_v2 = vrot.slane %v5236_v6, 4  ;;  %v4914_v27 = vld [vmem:[#allocation2 + $0xcc] sm:$0xf] }
 0x24b   : > { %v7861_v46 = vpop.f32.mrf.mxu1  ;;  %v10356_v1 = vpop.f32.mrf.mxu0  ;;  %v5259_v51 = vrot.slane %v5257_v62, 5  ;;  %v5265_v25 = vrot.slane %v5263_v58, 5  ;;  %v5273_v42 = vshll.u32 %v10348_v32, 16  ;;  %v5247_v11 = vrot.slane %v5246_v10, 4  ;;  %v10378_v10 = vld [vmem:[#allocation2 + $0xd0] sm:$0xf] }
 0x24c   : > { %11359 = vst [vmem:[#allocation31_spill] sm:$0xff] %v10356_v1  ;;  %8198 = vmatprep.mubr.bf16.mxu0 %v7141_v14  ;;  %v5269_v30 = vrot.slane %v5267_v24, 4  ;;  %v10360_v3 = vadd.f32 %v10262_v52, %v2007_v61  ;;  %v10363_v47 = vadd.f32 %v10268_v23, %v7861_v46  ;;  %v5242_v36 = vsel %vm8607_vm2, %v5237_v2, %v5241_v45  ;;  %v8403_v23 = vld [vmem:[#allocation2 + $0xb4] sm:$0xff]  }
 0x24d   : > { %v10365_v44 = vpop.f32.mrf.mxu1  ;;  %v10367_v33 = vpop.f32.mrf.mxu0  ;;  %v5260_v6 = vor.u32 %v5259_v51, %v5256_v56  ;;  %v5252_v52 = vsel %vm8607_vm2, %v5247_v11, %v5251_v22  ;;  %v5275_v62 = vrot.slane %v5273_v42, 5  ;;  %v5689_v14 = vrot.slane %v10012_v20, 5  ;;  %v5623_v1 = vld [vmem:[#allocation2 + $0x18] sm:$0xe] }
 0x24e   : > { %v5270_v61 = vor.u32 %v5269_v30, %v5265_v25  ;;  %v7142_v24 = vcombine.low %v5242_v36, %v5252_v52  ;;  %v5692_v45 = vrot.slane %v10017_v17, 5  ;;  %v5278_v51 = vshrl.u32 %v4914_v27, 16  ;;  %v10389_v36 = vld [vmem:[#allocation2 + $0xd4] sm:$0x1] }
 0x24f   : > { %v10375_v58 = vpop.f32.mrf.mxu0  ;;  %v5261_v46 = vrot.slane %v5260_v6, 4  ;;  %v5691_v2 = vrot.slane %v5689_v14, 4  ;;  %v5281_v6 = vshll.u32 %v4914_v27, 16  ;;  %v5287_v52 = vshll.u32 %v10378_v10, 16 }
 0x250   : > { %v7864_v54 = vpop.f32.mrf.mxu1  ;;  %v5271_v22 = vrot.slane %v5270_v61, 4  ;;  %8199 = vmatmul.mubr.bf16.gmra.mxu0 %v7142_v24  ;;  %v5280_v17 = vrot.slane %v5278_v51, 4  ;;  %v7153_v61 = vrot.slane %v5623_v1, 9 }
 0x251   : > { %v10383_v42 = vadd.f32 %v10293_v35, %v7864_v54  ;;  %8151 = vmatmul.mubr.bf16.gmra.mxu1 %v8403_v23  ;;  %v10385_v11 = vpop.f32.mrf.mxu0  ;;  %v5266_v20 = vsel %vm8607_vm2, %v5261_v46, %v5265_v25  ;;  %v5291_v23 = vshrl.u32 %v10378_v10, 16  ;;  %v5624_v25 = vld [vmem:[#allocation2 + $0x24] sm:$0xe]  ;;  %v5693_v51 = vsel %vm9250_vm14, %v5691_v2, %v5692_v45 }
 0x252   : > { %8154 = vmatprep.mubr.bf16.mxu1 %v8404_v63  ;;  %v2023_v30 = vpop.f32.mrf.mxu1  ;;  %v5276_v35 = vsel %vm8607_vm2, %v5271_v22, %v5275_v62  ;;  %v5283_v27 = vrot.slane %v5281_v6, 5  ;;  %v5289_v56 = vrot.slane %v5287_v52, 5  ;;  %v8406_v62 = vld [vmem:[#allocation2 + $0xcc] sm:$0xff]   ;;  %v5297_v22 = vshll.u32 %v10389_v36, 16 }
 0x253   : > { %11360 = vst [vmem:[#allocation32_spill] sm:$0xff] %v10383_v42  ;;  %v10395_v54 = vadd.f32 %v10300_v26, %v2023_v30  ;;  %v10398_v24 = vpop.f32.mrf.mxu0  ;;  %v7143_v63 = vcombine.low %v5266_v20, %v5276_v35  ;;  %v5690_v26 = vsel %vm9250_vm14, %v7153_v61, %v5689_v14  ;;  %v5293_v1 = vrot.slane %v5291_v23, 4 }
 0x254   : > { %11361 = vst [vmem:[#allocation33_spill] sm:$0xff] %v10398_v24  ;;  %v7865_v46 = vpop.f32.mrf.mxu1  ;;  %v5284_v35 = vor.u32 %v5283_v27, %v5280_v17  ;;  %v7154_v24 = vrot.slane %v5624_v25, 9  ;;  %v11363_v45 = vrot.slane %v10043_v59, 5  ;;  %v10417_v6 = vadd.f32 %v9963_v9, %v10086_v34  ;;  %v5626_v59 = vld [vmem:[#allocation2 + $0x3c] sm:$0xe] }
 0x255   : > { %v10403_v42 = vadd.f32 %v10311_v41, %v7865_v46  ;;  %v10408_v30 = vpop.f32.mrf.mxu0  ;;  %8202 = vmatprep.mubr.bf16.mxu0 %v7143_v63  ;;  %v5703_v41 = vrot.slane %v10076_v40, 5  ;;  %v7185_v14 = vcombine.low %v5690_v26, %v5693_v51  ;;  %v5294_v52 = vor.u32 %v5293_v1, %v5289_v56  ;;  %v5625_v46 = vld [vmem:[#allocation2 + $0x30] sm:$0xe] }
 0x256   : > { %v10410_v20 = vpop.f32.mrf.mxu1  ;;  %v5698_v2 = vrot.slane %v11363_v45, 4  ;;  %v5299_v61 = vrot.slane %v5297_v22, 5  ;;  %v11364_v17 = vmov %v11363_v45  ;;  %v11365_v27 = vrot.slane %v10054_v8, 5 }
 0x257   : > { %11362 = vst [vmem:[#allocation34_spill] sm:$0xff] %v10403_v42  ;;  %v10419_v23 = vpop.f32.mrf.mxu0  ;;  %v5285_v42 = vrot.slane %v5284_v35, 4  ;;  %v5697_v25 = vsel %vm9250_vm14, %v7154_v24, %v11364_v17  ;;  %v5705_v9 = vrot.slane %v5703_v41, 4  ;;  %v5295_v51 = vrot.slane %v5294_v52, 4  ;;  %v5628_v17 = vld [vmem:[#allocation2 + $0x54] sm:$0xe] }
 0x258   : > { %v7868_v63 = vpop.f32.mrf.mxu1  ;;  %v5700_v40 = vsel %vm9250_vm14, %v5698_v2, %v11365_v27  ;;  %v5706_v1 = vrot.slane %v10082_v49, 5  ;;  %v5727_v35 = vrot.slane %v10139_v38, 5  ;;  %v7155_v45 = vrot.slane %v5625_v46, 9 }
 0x259   : > { %v10430_v34 = vadd.f32 %v10334_v60, %v7868_v63  ;;  %8155 = vmatmul.mubr.bf16.gmra.mxu1 %v8406_v62  ;;  %v7186_v26 = vcombine.low %v5697_v25, %v5700_v40  ;;  %v10433_v22 = vpop.f32.mrf.mxu0  ;;  %v5290_v8 = vsel %vm8607_vm2, %v5285_v42, %v5289_v56  ;;  %v5710_v2 = vrot.slane %v10091_v21, 5  ;;  %v5627_v60 = vld [vmem:[#allocation2 + $0x48] sm:$0xe] }
 0x25a   : > { %8222 = vmatprep.mubr.bf16.mxu1 %v7185_v14  ;;  %v2039_v24 = vpop.f32.mrf.mxu1  ;;  %v5300_v49 = vsel %vm8607_vm2, %v5295_v51, %v5299_v61  ;;  %v5707_v52 = vsel %vm9250_vm14, %v5705_v9, %v5706_v1  ;;  %v5717_v38 = vrot.slane %v10110_v43, 5  ;;  %v5741_v14 = vrot.slane %v10186_v16, 5  ;;  %v5629_v43 = vld [vmem:[#allocation2 + $0x60] sm:$0xe] }
 0x25b   : > { %v10440_v62 = vadd.f32 %v10341_v13, %v2039_v24  ;;  %v10446_v63 = vpop.f32.mrf.mxu0  ;;  %v7144_v56 = vcombine.low %v5290_v8, %v5300_v49  ;;  %v7156_v46 = vrot.slane %v5626_v59, 9  ;;  %v5712_v21 = vrot.slane %v5710_v2, 4 }
 0x25c   : > { %11366 = vst [vmem:[#allocation35_spill] sm:$0xff] %v10446_v63  ;;  %v7869_v42 = vpop.f32.mrf.mxu1  ;;  %v5704_v57 = vsel %vm9250_vm14, %v7155_v45, %v5703_v41  ;;  %v7157_v25 = vrot.slane %v5627_v60, 9  ;;  %v5720_v27 = vrot.slane %v10120_v31, 5  ;;  %v5724_v41 = vrot.slane %v10131_v28, 5  ;;  %v8431_v60 = vld [vmem:[%s8521_s12] sm:$0xff]  }
 0x25d   : > { %v10451_v13 = vadd.f32 %v10350_v0, %v7869_v42  ;;  %v10455_v61 = vpop.f32.mrf.mxu0  ;;  %8203 = vmatmul.mubr.bf16.gmra.mxu0 %v7144_v56  ;;  %v7187_v9 = vcombine.low %v5704_v57, %v5707_v52  ;;  %v5711_v51 = vsel %vm9250_vm14, %v7156_v46, %v5710_v2  ;;  %v11368_v0 = vrot.slane %v10098_v50, 5  ;;  %v5631_v57 = vld [vmem:[#allocation2 + $0x78] sm:$0xe] }
 0x25e   : > { %v10458_v40 = vpop.f32.mrf.mxu1  ;;  %v10471_v31 = vsel %vm9250_vm14, %v7157_v25, %v5717_v38  ;;  %v5719_v24 = vrot.slane %v5717_v38, 4  ;;  %v7158_v8 = vrot.slane %v5628_v17, 9  ;;  %v5731_v45 = vrot.slane %v10160_v4, 5  ;;  %6375 = vmatprep.mubr.bf16.mxu0 %v8431_v60 }
 0x25f   : > { %11367 = vst [vmem:[#allocation36_spill] sm:$0xff] %v10451_v13  ;;  %v5714_v1 = vsel %vm9250_vm14, %v5712_v21, %v11368_v0  ;;  %v10467_v59 = vpop.f32.mrf.mxu0  ;;  %v5726_v50 = vrot.slane %v5724_v41, 4  ;;  %v7159_v52 = vrot.slane %v5629_v43, 9  ;;  %v5734_v56 = vrot.slane %v10162_v29, 5  ;;  %v5630_v21 = vld [vmem:[#allocation2 + $0x6c] sm:$0xe] }
 0x260   : > { %v7936_v2 = vpop.f32.mrf.mxu1  ;;  %v7188_v49 = vcombine.low %v5711_v51, %v5714_v1  ;;  %v5721_v42 = vsel %vm9250_vm14, %v5719_v24, %v5720_v27  ;;  %v10485_v4 = vsel %vm9250_vm14, %v7158_v8, %v5724_v41  ;;  %v5733_v38 = vrot.slane %v5731_v45, 4  ;;  %v5633_v41 = vld [vmem:[#allocation2 + $0x90] sm:$0xe] }
 0x261   : > { %v10477_v28 = vadd.f32 %v7936_v2, %v10118_v55  ;;  %8223 = vmatmul.mubr.bf16.vlgmr.msra.gmra.mxu1 %v7186_v26  ;;  %v10481_v46 = vpop.f32.mrf.mxu0  ;;  %v10489_v29 = vsel %vm9250_vm14, %v5726_v50, %v5727_v35  ;;  %v10493_v55 = vsel %vm9250_vm14, %v7159_v52, %v5731_v45  ;;  %v5738_v26 = vrot.slane %v10178_v48, 5  ;;  %v5632_v2 = vld [vmem:[#allocation2 + $0x84] sm:$0xe] }
 0x262   : > { %8226 = vmatprep.mubr.bf16.mxu1 %v7187_v9  ;;  %v2685_v17 = vpop.f32.mrf.mxu1  ;;  %v5745_v25 = vrot.slane %v10204_v7, 5  ;;  %v10506_v35 = vsel %vm9250_vm14, %v5733_v38, %v5734_v56  ;;  %v5748_v51 = vrot.slane %v10211_v5, 5  ;;  %v7189_v48 = vcombine.low %v10471_v31, %v5721_v42  ;;  %v11379_v7 = vld [vmem:[#allocation7_spill] sm:$0xff] }
 0x263   : > { %v10498_v27 = vadd.f32 %v2685_v17, %v10129_v53  ;;  %v10500_v43 = vpop.f32.mrf.mxu0  ;;  %v7160_v1 = vrot.slane %v5630_v21, 9  ;;  %v5740_v53 = vrot.slane %v5738_v26, 4  ;;  %v7161_v45 = vrot.slane %v5631_v57, 9 }
 0x264   : > { %11369 = vst [vmem:[#allocation37_spill] sm:$0xff] %v10500_v43  ;;  %v7937_v0 = vpop.f32.mrf.mxu1  ;;  %v5747_v60 = vrot.slane %v5745_v25, 4  ;;  %v5752_v50 = vrot.slane %v10229_v37, 5  ;;  %v5759_v56 = vrot.slane %v10251_v39, 5  ;;  %v7162_v39 = vrot.slane %v5632_v2, 9  ;;  %v11374_v2 = vld [vmem:[#allocation20_spill] sm:$0xff] }
 0x265   : > { %v10513_v24 = vadd.f32 %v7937_v0, %v10137_v15  ;;  %v10515_v8 = vpop.f32.mrf.mxu0  ;;  %v10520_v31 = vsel %vm9250_vm14, %v7160_v1, %v5738_v26  ;;  %v10526_v52 = vsel %vm9250_vm14, %v5740_v53, %v5741_v14  ;;  %v5755_v15 = vrot.slane %v10238_v18, 5  ;;  %v11371_v26 = vld [vmem:[#allocation5_spill] sm:$0xff]  ;;  %v11372_v53 = vld [vmem:[#allocation14_spill] sm:$0xff] }
 0x266   : > { %v2688_v5 = vpop.f32.mrf.mxu1  ;;  %v10539_v21 = vsel %vm9250_vm14, %v7161_v45, %v5745_v25  ;;  %v10543_v16 = vsel %vm9250_vm14, %v5747_v60, %v5748_v51  ;;  %v7163_v17 = vrot.slane %v5633_v41, 9  ;;  %v5761_v1 = vrot.slane %v5759_v56, 4  ;;  %v5634_v45 = vld [vmem:[#allocation2 + $0x9c] sm:$0xe] }
 0x267   : > { %v10531_v42 = vadd.f32 %v2688_v5, %v10417_v6  ;;  %v10533_v38 = vpop.f32.mrf.mxu0  ;;  %v5754_v6 = vrot.slane %v5752_v50, 4  ;;  %v5762_v25 = vrot.slane %v11372_v53, 5  ;;  %v11373_v5 = vld [vmem:[#allocation17_spill] sm:$0xff]  ;;  %v10554_v60 = vsel %vm9250_vm14, %v7162_v39, %v5752_v50 }
 0x268   : > { %v7940_v14 = vpop.f32.mrf.mxu1  ;;  %v5766_v37 = vrot.slane %v11373_v5, 5 }
 0x269   : > { %11370 = vst [vmem:[#allocation38_spill] sm:$0xff] %v10531_v42  ;;  %v2818_v57 = vadd.f32 %v7940_v14, %v11371_v26  ;;  %8227 = vmatmul.mubr.bf16.gmra.mxu1 %v7188_v49  ;;  %v10548_v0 = vpop.f32.mrf.mxu0  ;;  %v10558_v41 = vsel %vm9250_vm14, %v5754_v6, %v5755_v15  ;;  %v5769_v49 = vrot.slane %v11374_v2, 5  ;;  %v11375_v14 = vld [vmem:[#allocation6_spill] sm:$0xff]  ;;  %v10572_v50 = vsel %vm9250_vm14, %v5761_v1, %v5762_v25  ;;  %v11378_v2 = vld [vmem:[#allocation3_spill] sm:$0xff]  ;;  %v11382_v42 = vld [vmem:[#allocation8_spill] sm:$0xff] }
 0x26a   : > { %8230 = vmatprep.mubr.bf16.mxu1 %v7189_v48  ;;  %v2701_v51 = vpop.f32.mrf.mxu1  ;;  %v10568_v48 = vsel %vm9250_vm14, %v7163_v17, %v5759_v56  ;;  %v7164_v6 = vrot.slane %v5634_v45, 9  ;;  %v5768_v5 = vrot.slane %v5766_v37, 4  ;;  %v11380_v56 = vld [vmem:[#allocation26_spill] sm:$0xff]  ;;  %v11381_v45 = vld [vmem:[#allocation29_spill] sm:$0xff] }
 0x26b   : > { %v2816_v26 = vadd.f32 %v2701_v51, %v11375_v14  ;;  %v10562_v18 = vpop.f32.mrf.mxu0  ;;  %v11377_v51 = vld [vmem:[#allocation4_spill] sm:$0xff]  ;;  %v5780_v17 = vrot.slane %v11380_v56, 5  ;;  %v5783_v15 = vrot.slane %v11381_v45, 5 }
 0x26c   : > { %11376 = vst [vmem:[#allocation5_spill] sm:$0xff] %v10562_v18  ;;  %v7941_v39 = vpop.f32.mrf.mxu1  ;;  %v2252_v14 = vadd.f32 %v11378_v2, %v11377_v51  ;;  %v5636_v18 = vld [vmem:[#allocation2 + $0xb4] sm:$0xe]  ;;  %v10584_v1 = vsel %vm9250_vm14, %v7164_v6, %v5766_v37  ;;  %v10588_v25 = vsel %vm9250_vm14, %v5768_v5, %v5769_v49  ;;  %v11383_v37 = vcombine.low %v10485_v4, %v10489_v29 }
 0x26d   : > { %v2819_v9 = vadd.f32 %v7941_v39, %v11379_v7  ;;  %v10579_v53 = vpop.f32.mrf.mxu0  ;;  %v7196_v7 = vcombine.low %v10584_v1, %v10588_v25  ;;  %v7166_v2 = vrot.slane %v5636_v18, 9  ;;  %v5782_v56 = vrot.slane %v5780_v17, 4  ;;  %v11404_v1 = vld [vmem:[#allocation18_spill] sm:$0xff] }
 0x26e   : > { %v2704_v43 = vpop.f32.mrf.mxu1  ;;  %v11384_v6 = vcombine.low %v10493_v55, %v10506_v35  ;;  %v10619_v4 = vadd.f32 %v10367_v33, %v10477_v28  ;;  %v10623_v29 = vadd.f32 %v10375_v58, %v10498_v27  ;;  %v10638_v58 = vadd.f32 %v10408_v30, %v2818_v57 }
 0x26f   : > { %v10591_v63 = vadd.f32 %v2704_v43, %v2252_v14  ;;  %v10593_v51 = vpop.f32.mrf.mxu0  ;;  %v8407_v43 = vld [vmem:[%s11301_s3 + $0x78] sm:$0xff]   ;;  %v10611_v18 = vsel %vm9250_vm14, %v7166_v2, %v5780_v17  ;;  %v11385_v14 = vld [vmem:[#allocation9_spill] sm:$0xff]  ;;  %v10641_v27 = vadd.f32 %v10419_v23, %v2816_v26  ;;  %v10644_v2 = vadd.f32 %v10433_v22, %v2819_v9 }
 0x270   : > { %v7944_v39 = vpop.f32.mrf.mxu1  ;;  %7662 = vmatprep.subr.bf16.mxu0 %v8407_v43  ;;  %v11387_v43 = vld [vmem:[#allocation12_spill] sm:$0xff]  ;;  %v11388_v9 = vld [vmem:[#allocation13_spill] sm:$0xff] }
 0x271   : > { %v2822_v13 = vadd.f32 %v7944_v39, %v11382_v42  ;;  %8231 = vmatmul.mubr.bf16.gmra.mxu1 %v11383_v37  ;;  %v10601_v49 = vpop.f32.mrf.mxu0  ;;  %v10615_v42 = vsel %vm9250_vm14, %v5782_v56, %v5783_v15  ;;  %v10632_v15 = vadd.f32 %v10385_v11, %v10513_v24  ;;  %v11386_v39 = vld [vmem:[#allocation11_spill] sm:$0xff] }
 0x272   : > { %8234 = vmatprep.mubr.bf16.mxu1 %v11384_v6  ;;  %v2717_v5 = vpop.f32.mrf.mxu1  ;;  %v8408_v56 = vld [vmem:[%s11301_s3 + $0x38] sm:$0xff]   ;;  %v11389_v6 = vcombine.low %v10520_v31, %v10526_v52  ;;  %v11392_v52 = vld [vmem:[#allocation16_spill] sm:$0xff] }
 0x273   : > { %v2820_v55 = vadd.f32 %v2717_v5, %v11385_v14  ;;  %v10626_v35 = vpop.f32.mrf.mxu0  ;;  %v10650_v11 = vadd.f32 %v10455_v61, %v2822_v13  ;;  %7663 = vmatpush3.bf16.msra.mxu0 %v8408_v56  ;;  %v11390_v61 = vcombine.low %v10539_v21, %v10543_v16  ;;  %v11391_v5 = vld [vmem:[#allocation15_spill] sm:$0xff] }
 0x274   : > { %v7945_v45 = vpop.f32.mrf.mxu1  ;;  %v11393_v56 = vld [vmem:[#allocation19_spill] sm:$0xff] }
 0x275   : > { %v2823_v33 = vadd.f32 %v7945_v45, %v11386_v39  ;;  %v10635_v28 = vpop.f32.mrf.mxu0  ;;  %v10653_v24 = vadd.f32 %v10467_v59, %v2820_v55  ;;  %v8409_v45 = vld [vmem:[%s11301_s3 + $0x70] sm:$0xff]  }
 0x276   : > { %v2720_v37 = vpop.f32.mrf.mxu1  ;;  %7664 = vmatprep.subr.bf16.mxu0 %v8409_v45 }
 0x277   : > { %v10656_v30 = vadd.f32 %v2720_v37, %v11387_v43  ;;  %v10658_v57 = vpop.f32.mrf.mxu0  ;;  %v10661_v23 = vadd.f32 %v10481_v46, %v2823_v33 }
 0x278   : > { %v7948_v22 = vpop.f32.mrf.mxu1 }
 0x279   : > { %v2826_v26 = vadd.f32 %v7948_v22, %v11388_v9  ;;  %8235 = vmatmul.mubr.bf16.gmra.mxu1 %v11389_v6  ;;  %v10667_v13 = vpop.f32.mrf.mxu0 }
 0x27a   : > { %8238 = vmatprep.mubr.bf16.mxu1 %v11390_v61  ;;  %v2733_v59 = vpop.f32.mrf.mxu1  ;;  %v11395_v61 = vld [vmem:[#allocation22_spill] sm:$0xff] }
 0x27b   : > { %v2824_v14 = vadd.f32 %v2733_v59, %v11391_v5  ;;  %v10673_v55 = vpop.f32.mrf.mxu0  ;;  %v10676_v46 = vadd.f32 %v10515_v8, %v2826_v26  ;;  %v11394_v8 = vld [vmem:[#allocation21_spill] sm:$0xff]  ;;  %v8410_v26 = vld [vmem:[%s11301_s3 + $0x30] sm:$0xff]   ;;  %v11396_v59 = vcombine.low %v10554_v60, %v10558_v41  ;;  %v11397_v5 = vld [vmem:[#allocation23_spill] sm:$0xff] }
 0x27c   : > { %v7949_v31 = vpop.f32.mrf.mxu1  ;;  %v5773_v22 = vrot.slane %v11394_v8, 5  ;;  %7665 = vmatpush3.bf16.msra.mxu0 %v8410_v26  ;;  %v11400_v60 = vld [vmem:[#allocation28_spill] sm:$0xff]  ;;  %v11401_v41 = vld [vmem:[#allocation10_spill] sm:$0xff] }
 0x27d   : > { %v2827_v39 = vadd.f32 %v7949_v31, %v11392_v52  ;;  %v10682_v33 = vpop.f32.mrf.mxu0  ;;  %v10685_v21 = vadd.f32 %v10533_v38, %v2824_v14  ;;  %v5776_v14 = vrot.slane %v11397_v5, 5  ;;  %v5635_v52 = vld [vmem:[#allocation2 + $0xa8] sm:$0xe]  ;;  %v11402_v5 = vld [vmem:[#allocation27_spill] sm:$0xff] }
 0x27e   : > { %v2736_v16 = vpop.f32.mrf.mxu1  ;;  %v7165_v17 = vrot.slane %v5635_v52, 9  ;;  %v5787_v52 = vrot.slane %v10339_v19, 5 }
 0x27f   : > { %v10688_v37 = vadd.f32 %v2736_v16, %v11393_v56  ;;  %v10690_v43 = vpop.f32.mrf.mxu0  ;;  %v10694_v9 = vadd.f32 %v10548_v0, %v2827_v39  ;;  %v11398_v0 = vcombine.low %v10568_v48, %v10572_v50  ;;  %v11399_v39 = vld [vmem:[#allocation25_spill] sm:$0xff]  ;;  %v5775_v56 = vrot.slane %v5773_v22, 4 }
 0x280   : > { %v7952_v6 = vpop.f32.mrf.mxu1 }
 0x281   : > { %v2830_v38 = vadd.f32 %v7952_v6, %v11395_v61  ;;  %8239 = vmatmul.mubr.bf16.gmra.mxu1 %v11396_v59  ;;  %v10704_v45 = vpop.f32.mrf.mxu0  ;;  %v2300_v61 = vadd.f32 %v11401_v41, %v11400_v60  ;;  %v5777_v48 = vsel %vm9250_vm14, %v5775_v56, %v5776_v14  ;;  %v8412_v56 = vld [vmem:[%s11301_s3 + $0x28] sm:$0xff]   ;;  %v11403_v41 = vld [vmem:[#allocation30_spill] sm:$0xff] }
 0x282   : > { %8242 = vmatprep.mubr.bf16.mxu1 %v11398_v0  ;;  %v2749_v31 = vpop.f32.mrf.mxu1 }
 0x283   : > { %v2828_v16 = vadd.f32 %v2749_v31, %v11399_v39  ;;  %v10710_v8 = vpop.f32.mrf.mxu0  ;;  %v10713_v6 = vadd.f32 %v10579_v53, %v2830_v38  ;;  %v8411_v53 = vld [vmem:[%s11301_s3 + $0x68] sm:$0xff]   ;;  %v5774_v39 = vsel %vm9250_vm14, %v7165_v17, %v5773_v22  ;;  %v5790_v17 = vrot.slane %v10348_v32, 5 }
 0x284   : > { %v7953_v59 = vpop.f32.mrf.mxu1  ;;  %7666 = vmatprep.subr.bf16.mxu0 %v8411_v53  ;;  %v5638_v53 = vld [vmem:[#allocation2 + $0xcc] sm:$0xe]  ;;  %v2316_v32 = vadd.f32 %v11404_v1, %v10365_v44  ;;  %v8413_v44 = vld [vmem:[%s11301_s3 + $0x60] sm:$0xff]  }
 0x285   : > { %v2831_v26 = vadd.f32 %v7953_v59, %v11402_v5  ;;  %v10720_v50 = vpop.f32.mrf.mxu0  ;;  %v10723_v0 = vadd.f32 %v10593_v51, %v2828_v16  ;;  %v7197_v16 = vcombine.low %v5774_v39, %v5777_v48  ;;  %v5794_v59 = vrot.slane %v10378_v10, 5  ;;  %7667 = vmatpush3.bf16.msra.mxu0 %v8412_v56 }
 0x286   : > { %v2752_v38 = vpop.f32.mrf.mxu1  ;;  %v7168_v56 = vrot.slane %v5638_v53, 9  ;;  %7668 = vmatprep.subr.bf16.mxu0 %v8413_v44 }
 0x287   : > { %v10728_v31 = vadd.f32 %v2752_v38, %v2300_v61  ;;  %v10732_v60 = vpop.f32.mrf.mxu0  ;;  %v10736_v14 = vadd.f32 %v10601_v49, %v2831_v26  ;;  %v5637_v49 = vld [vmem:[#allocation2 + $0xc0] sm:$0xe]  ;;  %v5789_v26 = vrot.slane %v5787_v52, 4 }
 0x288   : > { %v7956_v51 = vpop.f32.mrf.mxu1  ;;  %v7167_v39 = vrot.slane %v5637_v49, 9 }
 0x289   : > { %v2834_v61 = vadd.f32 %v7956_v51, %v11403_v41  ;;  %8243 = vmatmul.mubr.bf16.gmra.mxu1 %v7196_v7  ;;  %v10746_v22 = vpop.f32.mrf.mxu0  ;;  %v5791_v10 = vsel %vm9250_vm14, %v5789_v26, %v5790_v17  ;;  %v5796_v41 = vrot.slane %v5794_v59, 4 }
 0x28a   : > { %8246 = vmatprep.mubr.bf16.mxu1 %v7197_v16  ;;  %v2765_v19 = vpop.f32.mrf.mxu1 }
 0x28b   : > { %v2832_v5 = vadd.f32 %v2765_v19, %v10360_v3  ;;  %v10750_v48 = vpop.f32.mrf.mxu0  ;;  %v10753_v38 = vadd.f32 %v10635_v28, %v2834_v61  ;;  %v5797_v28 = vrot.slane %v10389_v36, 5  ;;  %v11406_v36 = vcombine.low %v10611_v18, %v10615_v42 }
 0x28c   : > { %v7957_v25 = vpop.f32.mrf.mxu1 }
 0x28d   : > { %v2835_v7 = vadd.f32 %v7957_v25, %v10363_v47  ;;  %v10760_v51 = vpop.f32.mrf.mxu0  ;;  %v10763_v3 = vadd.f32 %v10658_v57, %v2832_v5  ;;  %v5788_v47 = vsel %vm9250_vm14, %v7167_v39, %v5787_v52  ;;  %v11405_v5 = vld [vmem:[#allocation32_spill] sm:$0xff]  ;;  %v5795_v52 = vsel %vm9250_vm14, %v7168_v56, %v5794_v59  ;;  %v11408_v59 = vld [vmem:[#allocation34_spill] sm:$0xff] }
 0x28e   : > { %v2768_v16 = vpop.f32.mrf.mxu1  ;;  %v7199_v49 = vcombine.low %v5788_v47, %v5791_v10  ;;  %v11407_v39 = vld [vmem:[#allocation24_spill] sm:$0xff] }
 0x28f   : > { %v10769_v61 = vadd.f32 %v2768_v16, %v2316_v32  ;;  %v10773_v17 = vpop.f32.mrf.mxu0  ;;  %v10776_v19 = vadd.f32 %v10667_v13, %v2835_v7  ;;  %v5798_v13 = vsel %vm9250_vm14, %v5796_v41, %v5797_v28  ;;  %v8414_v32 = vld [vmem:[%s11301_s3 + $0x20] sm:$0xff]   ;;  %v2332_v10 = vadd.f32 %v11407_v39, %v10410_v20  ;;  %v8416_v20 = vld [vmem:[%s11301_s3 + $0x18] sm:$0xff]  }
 0x290   : > { %7669 = vmatpush3.bf16.msra.mxu0 %v8414_v32  ;;  %v7200_v12 = vcombine.low %v5795_v52, %v5798_v13  ;;  %v8418_v52 = vld [vmem:[%s11301_s3 + $0x10] sm:$0xff]  }
 0x291   : > { %v7960_v57 = vpop.f32.mrf.mxu1  ;;  %8247 = vmatmul.mubr.bf16.gmra.mxu1 %v11406_v36  ;;  %v10782_v53 = vpop.f32.mrf.mxu0 }
 0x292   : > { %v2838_v26 = vadd.f32 %v7960_v57, %v11405_v5  ;;  %8250 = vmatprep.mubr.bf16.mxu1 %v7199_v49  ;;  %v8415_v57 = vld [vmem:[%s11301_s3 + $0x58] sm:$0xff]  }
 0x293   : > { %v2781_v1 = vpop.f32.mrf.mxu1  ;;  %v10792_v7 = vpop.f32.mrf.mxu0  ;;  %7670 = vmatprep.subr.bf16.mxu0 %v8415_v57 }
 0x294   : > { %v2836_v25 = vadd.f32 %v2781_v1, %v10395_v54  ;;  %v10795_v18 = vadd.f32 %v10682_v33, %v2838_v26  ;;  %7671 = vmatpush3.bf16.msra.mxu0 %v8416_v20 }
 0x295   : > { %v7961_v42 = vpop.f32.mrf.mxu1  ;;  %v8084_v56 = vpop.f32.mrf.mxu0 }
 0x296   : > { %v2839_v16 = vadd.f32 %v7961_v42, %v11408_v59  ;;  %v10801_v41 = vadd.f32 %v10690_v43, %v2836_v25  ;;  %v8417_v43 = vld [vmem:[%s11301_s3 + $0x50] sm:$0xff]   ;;  %v11410_v25 = vld [vmem:[#allocation36_spill] sm:$0xff] }
 0x297   : > { %v2784_v28 = vpop.f32.mrf.mxu1  ;;  %v4339_v54 = vpop.f32.mrf.mxu0  ;;  %7672 = vmatprep.subr.bf16.mxu0 %v8417_v43  ;;  %v8419_v43 = vld [vmem:[%s11301_s3 + $0x48] sm:$0xff]  }
 0x298   : > { %v10803_v44 = vadd.f32 %v2784_v28, %v2332_v10  ;;  %v10806_v47 = vadd.f32 %v10704_v45, %v2839_v16  ;;  %7673 = vmatpush3.bf16.msra.mxu0 %v8418_v52 }
 0x299   : > { %v7964_v33 = vpop.f32.mrf.mxu1  ;;  %8251 = vmatmul.mubr.bf16.gmra.mxu1 %v7200_v12  ;;  %v8085_v5 = vpop.f32.mrf.mxu0  ;;  %7674 = vmatprep.subr.bf16.mxu0 %v8419_v43 }
 0x29a   : > { %v2842_v49 = vadd.f32 %v7964_v33, %v10430_v34  ;;  %v11409_v34 = vld [vmem:[#allocation31_spill] sm:$0xff] }
 0x29b   : > { %v2797_v26 = vpop.f32.mrf.mxu1  ;;  %v10819_v36 = vpop.f32.mrf.mxu0  ;;  %v2348_v32 = vadd.f32 %v11409_v34, %v10458_v40 }
 0x29c   : > { %v2840_v45 = vadd.f32 %v2797_v26, %v10440_v62  ;;  %v10822_v1 = vadd.f32 %v10720_v50, %v2842_v49  ;;  %v11411_v26 = vld [vmem:[#allocation38_spill] sm:$0xff] }
 0x29d   : > { %v7965_v13 = vpop.f32.mrf.mxu1  ;;  %v8088_v39 = vpop.f32.mrf.mxu0 }
 0x29e   : > { %v2843_v42 = vadd.f32 %v7965_v13, %v11410_v25  ;;  %v10831_v62 = vadd.f32 %v10732_v60, %v2840_v45  ;;  %v11412_v45 = vld [vmem:[#allocation33_spill] sm:$0xff] }
 0x29f   : > { %v2800_v10 = vpop.f32.mrf.mxu1  ;;  %v4355_v50 = vpop.f32.mrf.mxu0  ;;  %v3199_v52 = vadd.f32 %v11412_v45, %v11411_v26 }
 0x2a0   : > { %v10833_v59 = vadd.f32 %v2800_v10, %v2348_v32  ;;  %v10836_v16 = vadd.f32 %v10746_v22, %v2843_v42  ;;  %v8420_v22 = vld [vmem:[%s11301_s3 + $0x8] sm:$0xff]  }
 0x2a1   : > { %v8032_v12 = vpop.f32.mrf.mxu1  ;;  %v8089_v33 = vpop.f32.mrf.mxu0  ;;  %7675 = vmatpush3.bf16.msra.mxu0 %v8420_v22  ;;  %v11413_v22 = vld [vmem:[#allocation35_spill] sm:$0xff] }
 0x2a2   : > { %v3954_v28 = vadd.f32 %v8032_v12, %v10619_v4 }
 0x2a3   : > { %v3825_v57 = vpop.f32.mrf.mxu1  ;;  %v10840_v20 = vpop.f32.mrf.mxu0 }
 0x2a4   : > { %v3952_v40 = vadd.f32 %v3825_v57, %v10623_v29  ;;  %v10843_v60 = vadd.f32 %v10760_v51, %v3954_v28 }
 0x2a5   : > { %v8033_v49 = vpop.f32.mrf.mxu1  ;;  %v8092_v29 = vpop.f32.mrf.mxu0 }
 0x2a6   : > { %v3955_v4 = vadd.f32 %v8033_v49, %v10632_v15  ;;  %v10855_v13 = vadd.f32 %v10773_v17, %v3952_v40  ;;  %v3203_v49 = vadd.f32 %v11413_v22, %v10591_v63  ;;  %v11414_v22 = vld [vmem:[#allocation37_spill] sm:$0xff] }
 0x2a7   : > { %v3828_v51 = vpop.f32.mrf.mxu1  ;;  %v4371_v32 = vpop.f32.mrf.mxu0 }
 0x2a8   : > { %v10857_v34 = vadd.f32 %v3828_v51, %v3199_v52  ;;  %v10860_v25 = vadd.f32 %v10782_v53, %v3955_v4 }
 0x2a9   : > { %v8036_v42 = vpop.f32.mrf.mxu1  ;;  %v8093_v15 = vpop.f32.mrf.mxu0 }
 0x2aa   : > { %v3958_v10 = vadd.f32 %v8036_v42, %v10638_v58  ;;  %v8421_v58 = vld [vmem:[%s11301_s3 + $0x40] sm:$0xff]  }
 0x2ab   : > { %v3841_v12 = vpop.f32.mrf.mxu1  ;;  %v10864_v57 = vpop.f32.mrf.mxu0  ;;  %7676 = vmatprep.subr.bf16.mxu0 %v8421_v58 }
 0x2ac   : > { %v3956_v28 = vadd.f32 %v3841_v12, %v10641_v27  ;;  %v10866_v17 = vadd.f32 %v8084_v56, %v3958_v10  ;;  %v8422_v27 = vld [vmem:[%s11301_s3] sm:$0xff]  }
 0x2ad   : > { %v8037_v40 = vpop.f32.mrf.mxu1  ;;  %v8096_v26 = vpop.f32.mrf.mxu0  ;;  %7677 = vmatpush3.bf16.msra.mxu0 %v8422_v27 }
 0x2ae   : > { %v3959_v43 = vadd.f32 %v8037_v40, %v10644_v2  ;;  %v10871_v53 = vadd.f32 %v4339_v54, %v3956_v28 }
 0x2af   : > { %v3844_v4 = vpop.f32.mrf.mxu1  ;;  %v4387_v45 = vpop.f32.mrf.mxu0 }
 0x2b0   : > { %v10879_v56 = vadd.f32 %v3844_v4, %v3203_v49  ;;  %v10881_v52 = vadd.f32 %v8085_v5, %v3959_v43  ;;  %v3207_v49 = vadd.f32 %v11414_v22, %v10656_v30 }
 0x2b1   : > { %v8040_v2 = vpop.f32.mrf.mxu1  ;;  %v8097_v54 = vpop.f32.mrf.mxu0 }
 0x2b2   : > { %v3962_v63 = vadd.f32 %v8040_v2, %v10650_v11 }
 0x2b3   : > { %v3857_v51 = vpop.f32.mrf.mxu1  ;;  %v4390_v10 = vpop.f32.mrf.mxu0 }
 0x2b4   : > { %v3960_v42 = vadd.f32 %v3857_v51, %v10653_v24  ;;  %v10885_v12 = vadd.f32 %v8088_v39, %v3962_v63 }
 0x2b5   : > { %v8041_v28 = vpop.f32.mrf.mxu1  ;;  %v8100_v5 = vpop.f32.mrf.mxu0 }
 0x2b6   : > { %v3963_v40 = vadd.f32 %v8041_v28, %v10661_v23  ;;  %v10890_v43 = vadd.f32 %v4355_v50, %v3960_v42  ;;  %v11415_v50 = vld [vmem:[#allocation5_spill] sm:$0xff] }
 0x2b7   : > { %v3860_v4 = vpop.f32.mrf.mxu1  ;;  %v4403_v11 = vpop.f32.mrf.mxu0  ;;  %v3211_v42 = vadd.f32 %v11415_v50, %v10688_v37 }
 0x2b8   : > { %v10892_v58 = vadd.f32 %v3860_v4, %v3207_v49  ;;  %v10894_v27 = vadd.f32 %v8089_v33, %v3963_v40 }
 0x2b9   : > { %v8044_v2 = vpop.f32.mrf.mxu1  ;;  %v8101_v39 = vpop.f32.mrf.mxu0 }
 0x2ba   : > { %v3966_v24 = vadd.f32 %v8044_v2, %v10676_v46 }
 0x2bb   : > { %v3873_v63 = vpop.f32.mrf.mxu1  ;;  %v4406_v22 = vpop.f32.mrf.mxu0 }
 0x2bc   : > { %v3964_v51 = vadd.f32 %v3873_v63, %v10685_v21  ;;  %v10898_v23 = vadd.f32 %v8092_v29, %v3966_v24 }
 0x2bd   : > { %v8045_v28 = vpop.f32.mrf.mxu1  ;;  %v8104_v21 = vpop.f32.mrf.mxu0 }
 0x2be   : > { %v3967_v30 = vadd.f32 %v8045_v28, %v10694_v9  ;;  %v10903_v49 = vadd.f32 %v4371_v32, %v3964_v51  ;;  %v3215_v32 = vadd.f32 %v10626_v35, %v10728_v31 }
 0x2bf   : > { %v3876_v33 = vpop.f32.mrf.mxu1  ;;  %v4419_v51 = vpop.f32.mrf.mxu0 }
 0x2c0   : > { %v10905_v40 = vadd.f32 %v3876_v33, %v3211_v42  ;;  %v10907_v4 = vadd.f32 %v8093_v15, %v3967_v30 }
 0x2c1   : > { %v8048_v46 = vpop.f32.mrf.mxu1  ;;  %v8105_v33 = vpop.f32.mrf.mxu0 }
 0x2c2   : > { %v3970_v2 = vadd.f32 %v8048_v46, %v10713_v6 }
 0x2c3   : > { %v3889_v29 = vpop.f32.mrf.mxu1  ;;  %v4422_v31 = vpop.f32.mrf.mxu0 }
 0x2c4   : > { %v3968_v24 = vadd.f32 %v3889_v29, %v10723_v0  ;;  %v10911_v63 = vadd.f32 %v8096_v26, %v3970_v2 }
 0x2c5   : > { %v8049_v9 = vpop.f32.mrf.mxu1 }
 0x2c6   : > { %v3971_v37 = vadd.f32 %v8049_v9, %v10736_v14  ;;  %v10916_v28 = vadd.f32 %v4387_v45, %v3968_v24  ;;  %v3219_v45 = vadd.f32 %v10673_v55, %v10769_v61  ;;  %v8108_v9 = vpop.f32.mrf.mxu0  ;;  %v3223_v61 = vadd.f32 %v10710_v8, %v10803_v44 }
 0x2c7   : > { %v3892_v15 = vpop.f32.mrf.mxu1  ;;  %v3227_v44 = vadd.f32 %v10750_v48, %v10833_v59 }
 0x2c8   : > { %v3969_v30 = vadd.f32 %v3892_v15, %v3215_v32  ;;  %v10918_v50 = vadd.f32 %v8097_v54, %v3971_v37 }
 0x2c9   : > { %v8052_v6 = vpop.f32.mrf.mxu1 }
 0x2ca   : > { %v3974_v42 = vadd.f32 %v8052_v6, %v10753_v38  ;;  %v10921_v0 = vadd.f32 %v4390_v10, %v3969_v30  ;;  %v4435_v30 = vpop.f32.mrf.mxu0 }
 0x2cb   : > { %v3905_v26 = vpop.f32.mrf.mxu1 }
 0x2cc   : > { %v3972_v46 = vadd.f32 %v3905_v26, %v10763_v3  ;;  %v10924_v14 = vadd.f32 %v8100_v5, %v3974_v42 }
 0x2cd   : > { %v8053_v2 = vpop.f32.mrf.mxu1 }
 0x2ce   : > { %v3975_v35 = vadd.f32 %v8053_v2, %v10776_v19  ;;  %v10929_v54 = vadd.f32 %v4403_v11, %v3972_v46 }
 0x2cf   : > { %v3908_v29 = vpop.f32.mrf.mxu1 }
 0x2d0   : > { %v3973_v24 = vadd.f32 %v3908_v29, %v3219_v45  ;;  %v10931_v38 = vadd.f32 %v8101_v39, %v3975_v35 }
 0x2d1   : > { %v8056_v10 = vpop.f32.mrf.mxu1 }
 0x2d2   : > { %v3978_v37 = vadd.f32 %v8056_v10, %v10795_v18  ;;  %v10934_v3 = vadd.f32 %v4406_v22, %v3973_v24  ;;  %v8109_v18 = vpop.f32.mrf.mxu0 }
 0x2d3   : > { %v3921_v5 = vpop.f32.mrf.mxu1 }
 0x2d4   : > { %v3976_v32 = vadd.f32 %v3921_v5, %v10801_v41  ;;  %v10937_v19 = vadd.f32 %v8104_v21, %v3978_v37 }
 0x2d5   : > { %v8057_v15 = vpop.f32.mrf.mxu1 }
 0x2d6   : > { %v3979_v55 = vadd.f32 %v8057_v15, %v10806_v47  ;;  %v10942_v11 = vadd.f32 %v4419_v51, %v3976_v32  ;;  %v4438_v47 = vpop.f32.mrf.mxu0 }
 0x2d7   : > { %v3924_v39 = vpop.f32.mrf.mxu1 }
 0x2d8   : > { %v3977_v6 = vadd.f32 %v3924_v39, %v3223_v61  ;;  %v10944_v42 = vadd.f32 %v8105_v33, %v3979_v55  ;;  %v10959_v29 = vpop.f32.mrf.mxu0 }
 0x2d9   : > { %v8060_v22 = vpop.f32.mrf.mxu1 }
 0x2da   : > { %v10946_v26 = vadd.f32 %v4422_v31, %v3977_v6  ;;  %v3982_v41 = vadd.f32 %v8060_v22, %v10822_v1 }
 0x2db   : > { %v3937_v21 = vpop.f32.mrf.mxu1 }
 0x2dc   : > { %v3980_v46 = vadd.f32 %v3937_v21, %v10831_v62  ;;  %v10950_v2 = vadd.f32 %v8108_v9, %v3982_v41  ;;  %v10969_v9 = vpop.f32.mrf.mxu0 }
 0x2dd   : > { %v8061_v35 = vpop.f32.mrf.mxu1 }
 0x2de   : > { %v3983_v8 = vadd.f32 %v8061_v35, %v10836_v16  ;;  %v10955_v51 = vadd.f32 %v4435_v30, %v3980_v46  ;;  %v10976_v5 = vpop.f32.mrf.mxu0 }
 0x2df   : > { %v3940_v33 = vpop.f32.mrf.mxu1 }
 0x2e0   : > { %v3981_v45 = vadd.f32 %v3940_v33, %v3227_v44  ;;  %v10957_v31 = vadd.f32 %v8109_v18, %v3983_v8 }
 0x2e1   : > { %v8128_v1 = vpop.f32.mrf.mxu1 }
 0x2e2   : > { %v10962_v62 = vadd.f32 %v8128_v1, %v10843_v60  ;;  %v10964_v24 = vadd.f32 %v4438_v47, %v3981_v45 }
 0x2e3   : > { %v4710_v10 = vpop.f32.mrf.mxu1 }
 0x2e4   : > { %v10967_v16 = vadd.f32 %v4710_v10, %v10855_v13  ;;  %v10984_v13 = vpop.f32.mrf.mxu0 }
 0x2e5   : > { %v8129_v48 = vpop.f32.mrf.mxu1 }
 0x2e6   : > { %v10972_v59 = vadd.f32 %v8129_v48, %v10860_v25  ;;  %v4455_v25 = vadd.f32 %v10819_v36, %v10879_v56  ;;  %v10993_v18 = vpop.f32.mrf.mxu0  ;;  %v4459_v36 = vadd.f32 %v10840_v20, %v10892_v58  ;;  %v4463_v20 = vadd.f32 %v10864_v57, %v10905_v40 }
 0x2e7   : > { %v10974_v37 = vpop.f32.mrf.mxu1 }
 0x2e8   : > { %v11001_v21 = vpop.f32.mrf.mxu0 }
 0x2e9   : > { %v8132_v32 = vpop.f32.mrf.mxu1 }
 0x2ea   : > { %v10979_v60 = vadd.f32 %v8132_v32, %v10866_v17  ;;  %v11010_v35 = vpop.f32.mrf.mxu0 }
 0x2eb   : > { %v4726_v15 = vpop.f32.mrf.mxu1 }
 0x2ec   : > { %v10982_v30 = vadd.f32 %v4726_v15, %v10871_v53  ;;  %v11018_v33 = vpop.f32.mrf.mxu0 }
 0x2ed   : > { %v8133_v55 = vpop.f32.mrf.mxu1 }
 0x2ee   : > { %v10987_v61 = vadd.f32 %v8133_v55, %v10881_v52  ;;  %v11027_v10 = vpop.f32.mrf.mxu0 }
 0x2ef   : > { %v4729_v39 = vpop.f32.mrf.mxu1 }
 0x2f0   : > { %v10991_v6 = vadd.f32 %v4729_v39, %v4455_v25  ;;  %v11035_v15 = vpop.f32.mrf.mxu0 }
 0x2f1   : > { %v8136_v17 = vpop.f32.mrf.mxu1 }
 0x2f2   : > { %v10996_v22 = vadd.f32 %v8136_v17, %v10885_v12  ;;  %v11043_v25 = vpop.f32.mrf.mxu0 }
 0x2f3   : > { %v4742_v53 = vpop.f32.mrf.mxu1 }
 0x2f4   : > { %v10999_v41 = vadd.f32 %v4742_v53, %v10890_v43  ;;  %v11051_v53 = vpop.f32.mrf.mxu0 }
 0x2f5   : > { %v8137_v52 = vpop.f32.mrf.mxu1 }
 0x2f6   : > { %v11004_v46 = vadd.f32 %v8137_v52, %v10894_v27 }
 0x2f7   : > { %v4745_v56 = vpop.f32.mrf.mxu1 }
 0x2f8   : > { %v11008_v47 = vadd.f32 %v4745_v56, %v4459_v36  ;;  %v11059_v56 = vpop.f32.mrf.mxu0 }
 0x2f9   : > { %v8140_v12 = vpop.f32.mrf.mxu1 }
 0x2fa   : > { %v11013_v8 = vadd.f32 %v8140_v12, %v10898_v23 }
 0x2fb   : > { %v4758_v43 = vpop.f32.mrf.mxu1 }
 0x2fc   : > { %v11016_v44 = vadd.f32 %v4758_v43, %v10903_v49 }
 0x2fd   : > { %v8141_v27 = vpop.f32.mrf.mxu1 }
 0x2fe   : > { %v11021_v45 = vadd.f32 %v8141_v27, %v10907_v4  ;;  %v11067_v27 = vpop.f32.mrf.mxu0 }
 0x2ff   : > { %v4761_v58 = vpop.f32.mrf.mxu1 }
 0x300   : > { %v11025_v1 = vadd.f32 %v4761_v58, %v4463_v20 }
 0x301   : > { %v8144_v23 = vpop.f32.mrf.mxu1 }
 0x302   : > { %v11030_v48 = vadd.f32 %v8144_v23, %v10911_v63  ;;  %v11075_v23 = vpop.f32.mrf.mxu0 }
 0x303   : > { %v4774_v49 = vpop.f32.mrf.mxu1 }
 0x304   : > { %v11033_v32 = vadd.f32 %v4774_v49, %v10916_v28 }
 0x305   : > { %v8145_v4 = vpop.f32.mrf.mxu1 }
 0x306   : > { %v11038_v55 = vadd.f32 %v8145_v4, %v10918_v50 }
 0x307   : > { %v4777_v57 = vpop.f32.mrf.mxu1 }
 0x308   : > { %v11041_v40 = vadd.f32 %v4777_v57, %v10921_v0  ;;  %v11083_v57 = vpop.f32.mrf.mxu0 }
 0x309   : > { %v8148_v39 = vpop.f32.mrf.mxu1 }
 0x30a   : > { %v11046_v63 = vadd.f32 %v8148_v39, %v10924_v14 }
 0x30b   : > { %v4790_v17 = vpop.f32.mrf.mxu1 }
 0x30c   : > { %v11049_v28 = vadd.f32 %v4790_v17, %v10929_v54 }
 0x30d   : > { %v8149_v52 = vpop.f32.mrf.mxu1 }
 0x30e   : > { %v11054_v50 = vadd.f32 %v8149_v52, %v10931_v38 }
 0x30f   : > { %v4793_v36 = vpop.f32.mrf.mxu1 }
 0x310   : > { %v11057_v0 = vadd.f32 %v4793_v36, %v10934_v3  ;;  %v11095_v36 = vpop.f32.mrf.mxu0 }
 0x311   : > { %v8152_v12 = vpop.f32.mrf.mxu1 }
 0x312   : > { %v11062_v14 = vadd.f32 %v8152_v12, %v10937_v19 }
 0x313   : > { %v4806_v43 = vpop.f32.mrf.mxu1 }
 0x314   : > { %v11065_v54 = vadd.f32 %v4806_v43, %v10942_v11 }
 0x315   : > { %v8153_v20 = vpop.f32.mrf.mxu1 }
 0x316   : > { %v11070_v38 = vadd.f32 %v8153_v20, %v10944_v42  ;;  %v11103_v20 = vld [vmem:[%s11303_s5] ss:$0 sm:$0xff] }
 0x317   : > { %v4809_v58 = vpop.f32.mrf.mxu1 }
 0x318   : > { %v11073_v3 = vadd.f32 %v4809_v58, %v10946_v26  ;;  %v4451_v26 = vadd.f32 %v10792_v7, %v10857_v34 }
 0x319   : > { %v8156_v49 = vpop.f32.mrf.mxu1 }
 0x31a   : > { %v11078_v19 = vadd.f32 %v8156_v49, %v10950_v2  ;;  %v5593_v2 = vadd.f32 %v10959_v29, %v10962_v62  ;;  %v4838_v12 = vadd.f32 %v10974_v37, %v4451_v26  ;;  %v11107_v29 = vpop.f32.mrf.mxu0 }
 0x31b   : > { %v4822_v4 = vpop.f32.mrf.mxu1 }
 0x31c   : > { %v11081_v11 = vadd.f32 %v4822_v4, %v10955_v51  ;;  %v5592_v49 = vadd.f32 %v10984_v13, %v4838_v12  ;;  %v11115_v26 = vpop.f32.mrf.mxu0 }
 0x31d   : > { %v8157_v39 = vpop.f32.mrf.mxu1 }
 0x31e   : > { %v11086_v42 = vadd.f32 %v8157_v39, %v10957_v31  ;;  %v5591_v31 = vadd.f32 %v10969_v9, %v10967_v16 }
 0x31f   : > { %v4825_v17 = vpop.f32.mrf.mxu1 }
 0x320   : > { %v11091_v52 = vadd.f32 %v4825_v17, %v10964_v24  ;;  %v5594_v24 = vadd.f32 %v10976_v5, %v10972_v59  ;;  %v5597_v17 = vadd.f32 %v10993_v18, %v10979_v60  ;;  %v5595_v5 = vadd.f32 %v11001_v21, %v10982_v30  ;;  %v11122_v60 = vpop.f32.mrf.mxu0 }
 0x321   : > { %v8224_v51 = vpop.f32.mrf.mxu1 }
 0x322   : > { %v6091_v43 = vadd.f32 %v8224_v51, %v5593_v2 }
 0x323   : > { %v5962_v7 = vpop.f32.mrf.mxu1 }
 0x324   : > { %v6089_v34 = vadd.f32 %v5962_v7, %v5591_v31  ;;  %v6130_v58 = vadd.f32 %v11103_v20, %v6091_v43  ;;  %v5598_v31 = vadd.f32 %v11010_v35, %v10987_v61 }
 0x325   : > { %v8225_v62 = vpop.f32.mrf.mxu1 }
 0x326   : > { %v6092_v37 = vadd.f32 %v8225_v62, %v5594_v24  ;;  %v6128_v16 = vadd.f32 %v11103_v20, %v6089_v34  ;;  %v6162_v2 = vmax.f32 %v6130_v58, 0.0  ;;  %v5596_v58 = vadd.f32 %v11018_v33, %v10991_v6 }
 0x327   : > { %v5965_v4 = vpop.f32.mrf.mxu1 }
 0x328   : > { %v6131_v9 = vadd.f32 %v11103_v20, %v6092_v37  ;;  %v6090_v39 = vadd.f32 %v5965_v4, %v5592_v49  ;;  %v6160_v7 = vmax.f32 %v6128_v16, 0.0  ;;  %v5601_v16 = vadd.f32 %v11027_v10, %v10996_v22 }
 0x329   : > { %v8228_v59 = vpop.f32.mrf.mxu1 }
 0x32a   : > { %v6163_v51 = vmax.f32 %v6131_v9, 0.0  ;;  %v6129_v43 = vadd.f32 %v11103_v20, %v6090_v39  ;;  %v6095_v13 = vadd.f32 %v8228_v59, %v5597_v17  ;;  %v11131_v9 = vpop.f32.mrf.mxu0  ;;  %v5599_v17 = vadd.f32 %v11035_v15, %v10999_v41  ;;  %v8432_v59 = vld [vmem:[%s8521_s12 + $0x8] sm:$0xff]  }
 0x32b   : > { %v5978_v12 = vpop.f32.mrf.mxu1 }
 0x32c   : > { %v6193_v34 = vpack.c.bf16 %v6163_v51, %v6162_v2  ;;  %v6161_v24 = vmax.f32 %v6129_v43, 0.0  ;;  %v6093_v62 = vadd.f32 %v5978_v12, %v5595_v5  ;;  %v6134_v30 = vadd.f32 %v11103_v20, %v6095_v13 }
 0x32d   : > { %v8229_v18 = vpop.f32.mrf.mxu1  ;;  %v5602_v43 = vadd.f32 %v11043_v25, %v11004_v46 }
 0x32e   : > { %v6192_v37 = vpack.c.bf16 %v6161_v24, %v6160_v7  ;;  %v6096_v21 = vadd.f32 %v8229_v18, %v5598_v31  ;;  %v6132_v4 = vadd.f32 %v11103_v20, %v6093_v62  ;;  %v6166_v5 = vmax.f32 %v6134_v30, 0.0  ;;  %v11141_v31 = vpop.f32.mrf.mxu0 }
 0x32f   : > { %v5981_v49 = vpop.f32.mrf.mxu1  ;;  %v5600_v62 = vadd.f32 %v11051_v53, %v11008_v47  ;;  %v5605_v30 = vadd.f32 %v11059_v56, %v11013_v8 }
 0x330   : > { %v6135_v61 = vadd.f32 %v11103_v20, %v6096_v21  ;;  %v6094_v35 = vadd.f32 %v5981_v49, %v5596_v58  ;;  %6376 = vmatmul.mubr.bf16.vlgmr.msra.gmra.mxu0 %v6192_v37  ;;  %v6164_v13 = vmax.f32 %v6132_v4, 0.0  ;;  %v11150_v21 = vpop.f32.mrf.mxu0  ;;  %v5603_v49 = vadd.f32 %v11067_v27, %v11016_v44  ;;  %v8433_v4 = vld [vmem:[%s8521_s12 + $0x10] sm:$0xff]  }
 0x331   : > { %v8232_v39 = vpop.f32.mrf.mxu1  ;;  %6383 = vmatprep.mubr.bf16.mxu0 %v8432_v59 }
 0x332   : > { %v6167_v6 = vmax.f32 %v6135_v61, 0.0  ;;  %v6133_v33 = vadd.f32 %v11103_v20, %v6094_v35  ;;  %v6099_v2 = vadd.f32 %v8232_v39, %v5601_v16  ;;  %v5547_v59 = vpop.f32.mrf.mxu0 }
 0x333   : > { %v5994_v51 = vpop.f32.mrf.mxu1 }
 0x334   : > { %v11139_v12 = vpack.c.bf16 %v6167_v6, %v6166_v5  ;;  %v6165_v22 = vmax.f32 %v6133_v33, 0.0  ;;  %v6097_v10 = vadd.f32 %v5994_v51, %v5599_v17  ;;  %v6138_v7 = vadd.f32 %v11103_v20, %v6099_v2 }
 0x335   : > { %v8233_v41 = vpop.f32.mrf.mxu1  ;;  %v5604_v33 = vadd.f32 %v11083_v57, %v11025_v1 }
 0x336   : > { %v6194_v15 = vpack.c.bf16 %v6165_v22, %v6164_v13  ;;  %v6100_v24 = vadd.f32 %v8233_v41, %v5602_v43  ;;  %v6136_v37 = vadd.f32 %v11103_v20, %v6097_v10  ;;  %v6170_v61 = vmax.f32 %v6138_v7, 0.0  ;;  %v8200_v13 = vpop.f32.mrf.mxu0  ;;  %v8434_v41 = vld [vmem:[%s8521_s12 + $0x18] sm:$0xff]  }
 0x337   : > { %v5997_v18 = vpop.f32.mrf.mxu1  ;;  %v5609_v43 = vadd.f32 %v11095_v36, %v11030_v48  ;;  %v5607_v10 = vadd.f32 %v11107_v29, %v11033_v32 }
 0x338   : > { %v6139_v46 = vadd.f32 %v11103_v20, %v6100_v24  ;;  %v6098_v25 = vadd.f32 %v5997_v18, %v5600_v62  ;;  %6384 = vmatmul.mubr.bf16.gmra.mxu0 %v6193_v34  ;;  %v5606_v34 = vadd.f32 %v11075_v23, %v11021_v45  ;;  %v6168_v39 = vmax.f32 %v6136_v37, 0.0  ;;  %v5560_v32 = vpop.f32.mrf.mxu0 }
 0x339   : > { %v8236_v58 = vpop.f32.mrf.mxu1  ;;  %6391 = vmatprep.mubr.bf16.mxu0 %v8433_v4 }
 0x33a   : > { %v6171_v47 = vmax.f32 %v6139_v46, 0.0  ;;  %v6137_v53 = vadd.f32 %v11103_v20, %v6098_v25  ;;  %v6103_v35 = vadd.f32 %v8236_v58, %v5605_v30 }
 0x33b   : > { %v6010_v16 = vpop.f32.mrf.mxu1 }
 0x33c   : > { %v11158_v17 = vpack.c.bf16 %v6171_v47, %v6170_v61  ;;  %v6169_v8 = vmax.f32 %v6137_v53, 0.0  ;;  %v6101_v56 = vadd.f32 %v6010_v16, %v5603_v49  ;;  %v6142_v27 = vadd.f32 %v11103_v20, %v6103_v35  ;;  %v8201_v47 = vpop.f32.mrf.mxu0  ;;  %v8435_v16 = vld [vmem:[%s8521_s12 + $0x20] sm:$0xff]  }
 0x33d   : > { %v8237_v5 = vpop.f32.mrf.mxu1  ;;  %v5608_v49 = vadd.f32 %v11122_v60, %v11041_v40  ;;  %v5613_v61 = vadd.f32 %v11131_v9, %v11046_v63  ;;  %v5611_v35 = vadd.f32 %v11141_v31, %v11049_v28 }
 0x33e   : > { %v11160_v44 = vpack.c.bf16 %v6169_v8, %v6168_v39  ;;  %v6104_v6 = vadd.f32 %v8237_v5, %v5606_v34  ;;  %v6140_v2 = vadd.f32 %v11103_v20, %v6101_v56  ;;  %v6174_v7 = vmax.f32 %v6142_v27, 0.0  ;;  %v5563_v28 = vpop.f32.mrf.mxu0 }
 0x33f   : > { %v6013_v51 = vpop.f32.mrf.mxu1 }
 0x340   : > { %v6143_v45 = vadd.f32 %v11103_v20, %v6104_v6  ;;  %v6102_v23 = vadd.f32 %v6013_v51, %v5604_v33  ;;  %6392 = vmatmul.mubr.bf16.gmra.mxu0 %v6194_v15  ;;  %v6172_v62 = vmax.f32 %v6140_v2, 0.0  ;;  %v5610_v15 = vadd.f32 %v11115_v26, %v11038_v55 }
 0x341   : > { %v8240_v22 = vpop.f32.mrf.mxu1  ;;  %6399 = vmatprep.mubr.bf16.mxu0 %v8434_v41  ;;  %v5612_v51 = vadd.f32 %v5547_v59, %v11057_v0  ;;  %v8436_v41 = vld [vmem:[%s8521_s12 + $0x28] sm:$0xff]  }
 0x342   : > { %v6175_v24 = vmax.f32 %v6143_v45, 0.0  ;;  %v6141_v1 = vadd.f32 %v11103_v20, %v6102_v23  ;;  %v6107_v57 = vadd.f32 %v8240_v22, %v5609_v43  ;;  %v8204_v45 = vpop.f32.mrf.mxu0  ;;  %v5617_v43 = vadd.f32 %v8200_v13, %v11062_v14 }
 0x343   : > { %v6026_v18 = vpop.f32.mrf.mxu1 }
 0x344   : > { %v11175_v37 = vpack.c.bf16 %v6175_v24, %v6174_v7  ;;  %v6173_v48 = vmax.f32 %v6141_v1, 0.0  ;;  %v6146_v36 = vadd.f32 %v11103_v20, %v6107_v57  ;;  %v6105_v46 = vadd.f32 %v6026_v18, %v5607_v10  ;;  %v5576_v0 = vpop.f32.mrf.mxu0 }
 0x345   : > { %v8241_v29 = vpop.f32.mrf.mxu1  ;;  %v5615_v10 = vadd.f32 %v5560_v32, %v11065_v54  ;;  %v5618_v18 = vadd.f32 %v8201_v47, %v11070_v38  ;;  %v5616_v32 = vadd.f32 %v5563_v28, %v11073_v3  ;;  %v8438_v28 = vld [vmem:[%s8521_s12 + $0x38] sm:$0xff]  }
 0x346   : > { %v11178_v25 = vpack.c.bf16 %v6173_v48, %v6172_v62  ;;  %v6144_v30 = vadd.f32 %v11103_v20, %v6105_v46  ;;  %v6108_v58 = vadd.f32 %v8241_v29, %v5610_v15  ;;  %v6178_v34 = vmax.f32 %v6146_v36, 0.0  ;;  %v8205_v29 = vpop.f32.mrf.mxu0 }
 0x347   : > { %v6029_v4 = vpop.f32.mrf.mxu1  ;;  %v5622_v3 = vadd.f32 %v8205_v29, %v11086_v42 }
 0x348   : > { %v6147_v55 = vadd.f32 %v11103_v20, %v6108_v58  ;;  %v6106_v26 = vadd.f32 %v6029_v4, %v5608_v49  ;;  %6400 = vmatmul.mubr.bf16.gmra.mxu0 %v11139_v12  ;;  %v6176_v8 = vmax.f32 %v6144_v30, 0.0  ;;  %v5614_v12 = vadd.f32 %v11150_v21, %v11054_v50 }
 0x349   : > { %v8244_v53 = vpop.f32.mrf.mxu1  ;;  %6407 = vmatprep.mubr.bf16.mxu0 %v8435_v16  ;;  %v5621_v58 = vadd.f32 %v8204_v45, %v11078_v19  ;;  %v5619_v4 = vadd.f32 %v5576_v0, %v11081_v11  ;;  %v5579_v16 = vpop.f32.mrf.mxu0 }
 0x34a   : > { %v6179_v39 = vmax.f32 %v6147_v55, 0.0  ;;  %v6145_v40 = vadd.f32 %v11103_v20, %v6106_v26  ;;  %v6111_v60 = vadd.f32 %v8244_v53, %v5613_v61  ;;  %v8437_v26 = vld [vmem:[%s8521_s12 + $0x30] sm:$0xff]  }
 0x34b   : > { %v6042_v56 = vpop.f32.mrf.mxu1 }
 0x34c   : > { %v11193_v5 = vpack.c.bf16 %v6179_v39, %v6178_v34  ;;  %v6177_v63 = vmax.f32 %v6145_v40, 0.0  ;;  %v6150_v9 = vadd.f32 %v11103_v20, %v6111_v60  ;;  %v6109_v27 = vadd.f32 %v6042_v56, %v5611_v35 }
 0x34d   : > { %v8245_v31 = vpop.f32.mrf.mxu1 }
 0x34e   : > { %v11196_v6 = vpack.c.bf16 %v6177_v63, %v6176_v8  ;;  %v6148_v33 = vadd.f32 %v11103_v20, %v6109_v27  ;;  %v6112_v2 = vadd.f32 %v8245_v31, %v5614_v12  ;;  %v6182_v7 = vmax.f32 %v6150_v9, 0.0 }
 0x34f   : > { %v6045_v23 = vpop.f32.mrf.mxu1  ;;  %v5620_v8 = vadd.f32 %v5579_v16, %v11091_v52 }
 0x350   : > { %v6151_v50 = vadd.f32 %v11103_v20, %v6112_v2  ;;  %v6110_v21 = vadd.f32 %v6045_v23, %v5612_v51  ;;  %6408 = vmatmul.mubr.bf16.gmra.mxu0 %v11160_v44  ;;  %v6180_v59 = vmax.f32 %v6148_v33, 0.0 }
 0x351   : > { %v8248_v22 = vpop.f32.mrf.mxu1  ;;  %6415 = vmatprep.mubr.bf16.mxu0 %v8436_v41 }
 0x352   : > { %v6183_v24 = vmax.f32 %v6151_v50, 0.0  ;;  %v6149_v1 = vadd.f32 %v11103_v20, %v6110_v21  ;;  %v6115_v57 = vadd.f32 %v8248_v22, %v5617_v43  ;;  %v8439_v50 = vld [vmem:[%s8521_s12 + $0x40] sm:$0xff]   ;;  %v8441_v21 = vld [vmem:[%s8521_s12 + $0x50] sm:$0xff]  }
 0x353   : > { %v6058_v62 = vpop.f32.mrf.mxu1  ;;  %v8443_v43 = vld [vmem:[%s8521_s12 + $0x60] sm:$0xff]   ;;  %v8445_v22 = vld [vmem:[%s8521_s12 + $0x70] sm:$0xff]  }
 0x354   : > { %v6203_v15 = vpack.c.bf16 %v6183_v24, %v6182_v7  ;;  %v6181_v48 = vmax.f32 %v6149_v1, 0.0  ;;  %v6154_v14 = vadd.f32 %v11103_v20, %v6115_v57  ;;  %v6113_v44 = vadd.f32 %v6058_v62, %v5615_v10  ;;  %v11238_v7 = vld [vmem:[%s11304_s6] ss:$0 sm:$0xff] }
 0x355   : > { %v8249_v13 = vpop.f32.mrf.mxu1 }
 0x356   : > { %v6202_v54 = vpack.c.bf16 %v6181_v48, %v6180_v59  ;;  %v6152_v36 = vadd.f32 %v11103_v20, %v6113_v44  ;;  %v6116_v46 = vadd.f32 %v8249_v13, %v5618_v18  ;;  %v6186_v61 = vmax.f32 %v6154_v14, 0.0 }
 0x357   : > { %v6061_v30 = vpop.f32.mrf.mxu1 }
 0x358   : > { %v6155_v49 = vadd.f32 %v11103_v20, %v6116_v46  ;;  %v6114_v38 = vadd.f32 %v6061_v30, %v5616_v32  ;;  %6416 = vmatmul.mubr.bf16.gmra.mxu0 %v11158_v17  ;;  %v6184_v19 = vmax.f32 %v6152_v36, 0.0 }
 0x359   : > { %v8252_v55 = vpop.f32.mrf.mxu1  ;;  %6423 = vmatprep.mubr.bf16.mxu0 %v8437_v26 }
 0x35a   : > { %v6187_v47 = vmax.f32 %v6155_v49, 0.0  ;;  %v6153_v53 = vadd.f32 %v11103_v20, %v6114_v38  ;;  %v6119_v35 = vadd.f32 %v8252_v55, %v5621_v58 }
 0x35b   : > { %v6074_v34 = vpop.f32.mrf.mxu1 }
 0x35c   : > { %v6205_v39 = vpack.c.bf16 %v6187_v47, %v6186_v61  ;;  %v6185_v40 = vmax.f32 %v6153_v53, 0.0  ;;  %v6158_v17 = vadd.f32 %v11103_v20, %v6119_v35  ;;  %v6117_v60 = vadd.f32 %v6074_v34, %v5619_v4 }
 0x35d   : > { %v8253_v11 = vpop.f32.mrf.mxu1 }
 0x35e   : > { %v6204_v56 = vpack.c.bf16 %v6185_v40, %v6184_v19  ;;  %v6156_v12 = vadd.f32 %v11103_v20, %v6117_v60  ;;  %v6120_v63 = vadd.f32 %v8253_v11, %v5622_v3  ;;  %v6190_v31 = vmax.f32 %v6158_v17, 0.0 }
 0x35f   : > { %v6077_v9 = vpop.f32.mrf.mxu1 }
 0x360   : > { %v6159_v42 = vadd.f32 %v11103_v20, %v6120_v63  ;;  %v6118_v27 = vadd.f32 %v6077_v9, %v5620_v8  ;;  %6424 = vmatmul.mubr.bf16.gmra.mxu0 %v11178_v25  ;;  %v6188_v2 = vmax.f32 %v6156_v12, 0.0  ;;  %v8440_v25 = vld [vmem:[%s8521_s12 + $0x48] sm:$0xff]  }
 0x361   : > { %6431 = vmatprep.mubr.bf16.mxu0 %v8438_v28 }
 0x362   : > { %v6191_v33 = vmax.f32 %v6159_v42, 0.0  ;;  %v6157_v52 = vadd.f32 %v11103_v20, %v6118_v27  ;;  %v8442_v20 = vld [vmem:[%s8521_s12 + $0x58] sm:$0xff]  }
 0x364   : > { %v6207_v51 = vpack.c.bf16 %v6191_v33, %v6190_v31  ;;  %v6189_v45 = vmax.f32 %v6157_v52, 0.0 }
 0x366   : > { %v6206_v23 = vpack.c.bf16 %v6189_v45, %v6188_v2 }
 0x368   : > { %6432 = vmatmul.mubr.bf16.gmra.mxu0 %v11175_v37  ;;  %v8444_v37 = vld [vmem:[%s8521_s12 + $0x68] sm:$0xff]  }
 0x369   : > { %6439 = vmatprep.mubr.bf16.mxu0 %v8439_v50 }
 0x370   : > { %6440 = vmatmul.mubr.bf16.gmra.mxu0 %v11196_v6  ;;  %v8446_v6 = vld [vmem:[%s8521_s12 + $0x78] sm:$0xff]  }
 0x371   : > { %6447 = vmatprep.mubr.bf16.mxu0 %v8440_v25 }
 0x378   : > { %6448 = vmatmul.mubr.bf16.gmra.mxu0 %v11193_v5 }
 0x379   : > { %6455 = vmatprep.mubr.bf16.mxu0 %v8441_v21 }
 0x380   : > { %6456 = vmatmul.mubr.bf16.gmra.mxu0 %v6202_v54 }
 0x381   : > { %6463 = vmatprep.mubr.bf16.mxu0 %v8442_v20 }
 0x388   : > { %6464 = vmatmul.mubr.bf16.gmra.mxu0 %v6203_v15 }
 0x389   : > { %6471 = vmatprep.mubr.bf16.mxu0 %v8443_v43 }
 0x390   : > { %6472 = vmatmul.mubr.bf16.gmra.mxu0 %v6204_v56 }
 0x391   : > { %6479 = vmatprep.mubr.bf16.mxu0 %v8444_v37 }
 0x398   : > { %6480 = vmatmul.mubr.bf16.gmra.mxu0 %v6205_v39 }
 0x399   : > { %6487 = vmatprep.mubr.bf16.mxu0 %v8445_v22 }
 0x3a0   : > { %6488 = vmatmul.mubr.bf16.gmra.mxu0 %v6206_v23 }
 0x3a1   : > { %6495 = vmatprep.mubr.bf16.mxu0 %v8446_v6 }
 0x3a8   : > { %6496 = vmatmul.mubr.bf16.gmra.mxu0 %v6207_v51 }
 0x3f0   : > { %v7678_v5 = vpop.f32.mrf.mxu0 }
 0x3f2   : > { %v7679_v10 = vpop.f32.mrf.mxu0 }
 0x3f3   : > { %v7680_v41 = vadd.f32 %v7679_v10, %v7678_v5 }
 0x3f4   : > { %v7681_v24 = vpop.f32.mrf.mxu0 }
 0x3f5   : > { %v6378_v57 = vadd.f32 %v7680_v41, %v11238_v7 }
 0x3f6   : > { %v7682_v1 = vpop.f32.mrf.mxu0 }
 0x3f7   : > { %v7683_v0 = vadd.f32 %v7682_v1, %v7681_v24  ;;  %v6504_v15 = vmax.f32 %v6378_v57, 0.0 }
 0x3f8   : > { %v7684_v59 = vpop.f32.mrf.mxu0 }
 0x3f9   : > { %v6381_v62 = vadd.f32 %v7683_v0, %v11238_v7 }
 0x3fa   : > { %v7685_v18 = vpop.f32.mrf.mxu0 }
 0x3fb   : > { %v6505_v48 = vmax.f32 %v6381_v62, 0.0  ;;  %v7686_v14 = vadd.f32 %v7685_v18, %v7684_v59 }
 0x3fc   : > { %v7687_v44 = vpop.f32.mrf.mxu0 }
 0x3fd   : > { %v7330_v13 = vpack.c.bf16 %v6505_v48, %v6504_v15  ;;  %v6386_v36 = vadd.f32 %v7686_v14, %v11238_v7 }
 0x3fe   : > { %v7688_v54 = vpop.f32.mrf.mxu0 }
 0x3ff   : > { %7331 = vst [vmem:[%s11247_s18] sm:$0xff] %v7330_v13   ;;  %v7689_v46 = vadd.f32 %v7688_v54, %v7687_v44  ;;  %v6506_v58 = vmax.f32 %v6386_v36, 0.0 }
 0x400   : > { %v7690_v32 = vpop.f32.mrf.mxu0 }
 0x401   : > { %v6389_v29 = vadd.f32 %v7689_v46, %v11238_v7 }
 0x402   : > { %v7691_v30 = vpop.f32.mrf.mxu0 }
 0x403   : > { %v6507_v49 = vmax.f32 %v6389_v29, 0.0  ;;  %v7692_v38 = vadd.f32 %v7691_v30, %v7690_v32 }
 0x404   : > { %v7693_v4 = vpop.f32.mrf.mxu0 }
 0x405   : > { %v7335_v55 = vpack.c.bf16 %v6507_v49, %v6506_v58  ;;  %v6394_v61 = vadd.f32 %v7692_v38, %v11238_v7 }
 0x406   : > { %v7694_v26 = vpop.f32.mrf.mxu0 }
 0x407   : > { %7407 = vst [vmem:[%s11247_s18 + $0x8] sm:$0xff] %v7335_v55   ;;  %v7695_v47 = vadd.f32 %v7694_v26, %v7693_v4  ;;  %v6508_v16 = vmax.f32 %v6394_v61, 0.0 }
 0x408   : > { %v7696_v53 = vpop.f32.mrf.mxu0 }
 0x409   : > { %v6397_v35 = vadd.f32 %v7695_v47, %v11238_v7 }
 0x40a   : > { %v7697_v3 = vpop.f32.mrf.mxu0 }
 0x40b   : > { %v6509_v19 = vmax.f32 %v6397_v35, 0.0  ;;  %v7698_v34 = vadd.f32 %v7697_v3, %v7696_v53 }
 0x40c   : > { %v7699_v39 = vpop.f32.mrf.mxu0 }
 0x40d   : > { %v7340_v40 = vpack.c.bf16 %v6509_v19, %v6508_v16  ;;  %v6402_v60 = vadd.f32 %v7698_v34, %v11238_v7 }
 0x40e   : > { %v7700_v17 = vpop.f32.mrf.mxu0 }
 0x40f   : > { %7408 = vst [vmem:[%s11247_s18 + $0x10] sm:$0xff] %v7340_v40   ;;  %v7701_v11 = vadd.f32 %v7700_v17, %v7699_v39  ;;  %v6510_v63 = vmax.f32 %v6402_v60, 0.0 }
 0x410   : > { %v7702_v8 = vpop.f32.mrf.mxu0 }
 0x411   : > { %v6405_v56 = vadd.f32 %v7701_v11, %v11238_v7 }
 0x412   : > { %v7703_v12 = vpop.f32.mrf.mxu0 }
 0x413   : > { %v6511_v9 = vmax.f32 %v6405_v56, 0.0  ;;  %v7704_v42 = vadd.f32 %v7703_v12, %v7702_v8 }
 0x414   : > { %v7705_v27 = vpop.f32.mrf.mxu0 }
 0x415   : > { %v7345_v28 = vpack.c.bf16 %v6511_v9, %v6510_v63  ;;  %v6410_v33 = vadd.f32 %v7704_v42, %v11238_v7 }
 0x416   : > { %v7706_v31 = vpop.f32.mrf.mxu0 }
 0x417   : > { %7409 = vst [vmem:[%s11247_s18 + $0x18] sm:$0xff] %v7345_v28   ;;  %v7707_v52 = vadd.f32 %v7706_v31, %v7705_v27  ;;  %v6512_v23 = vmax.f32 %v6410_v33, 0.0 }
 0x418   : > { %v7708_v2 = vpop.f32.mrf.mxu0 }
 0x419   : > { %v6413_v51 = vadd.f32 %v7707_v52, %v11238_v7 }
 0x41a   : > { %v7709_v45 = vpop.f32.mrf.mxu0 }
 0x41b   : > { %v6513_v50 = vmax.f32 %v6413_v51, 0.0  ;;  %v7710_v25 = vadd.f32 %v7709_v45, %v7708_v2 }
 0x41c   : > { %v7711_v21 = vpop.f32.mrf.mxu0 }
 0x41d   : > { %v7350_v20 = vpack.c.bf16 %v6513_v50, %v6512_v23  ;;  %v6418_v37 = vadd.f32 %v7710_v25, %v11238_v7 }
 0x41e   : > { %v7712_v43 = vpop.f32.mrf.mxu0 }
 0x41f   : > { %7410 = vst [vmem:[%s11247_s18 + $0x20] sm:$0xff] %v7350_v20   ;;  %v7713_v22 = vadd.f32 %v7712_v43, %v7711_v21  ;;  %v6514_v41 = vmax.f32 %v6418_v37, 0.0 }
 0x420   : > { %v7714_v6 = vpop.f32.mrf.mxu0 }
 0x421   : > { %v6421_v5 = vadd.f32 %v7713_v22, %v11238_v7 }
 0x422   : > { %v7715_v10 = vpop.f32.mrf.mxu0 }
 0x423   : > { %v6515_v24 = vmax.f32 %v6421_v5, 0.0  ;;  %v7716_v1 = vadd.f32 %v7715_v10, %v7714_v6 }
 0x424   : > { %v7717_v57 = vpop.f32.mrf.mxu0 }
 0x425   : > { %v7355_v0 = vpack.c.bf16 %v6515_v24, %v6514_v41  ;;  %v6426_v62 = vadd.f32 %v7716_v1, %v11238_v7 }
 0x426   : > { %v7718_v59 = vpop.f32.mrf.mxu0 }
 0x427   : > { %7411 = vst [vmem:[%s11247_s18 + $0x28] sm:$0xff] %v7355_v0   ;;  %v7719_v18 = vadd.f32 %v7718_v59, %v7717_v57  ;;  %v6516_v44 = vmax.f32 %v6426_v62, 0.0 }
 0x428   : > { %v7720_v15 = vpop.f32.mrf.mxu0 }
 0x429   : > { %v6429_v48 = vadd.f32 %v7719_v18, %v11238_v7 }
 0x42a   : > { %v7721_v14 = vpop.f32.mrf.mxu0 }
 0x42b   : > { %v6517_v13 = vmax.f32 %v6429_v48, 0.0  ;;  %v7722_v54 = vadd.f32 %v7721_v14, %v7720_v15 }
 0x42c   : > { %v7723_v36 = vpop.f32.mrf.mxu0 }
 0x42d   : > { %v7360_v46 = vpack.c.bf16 %v6517_v13, %v6516_v44  ;;  %v6434_v29 = vadd.f32 %v7722_v54, %v11238_v7 }
 0x42e   : > { %v7724_v32 = vpop.f32.mrf.mxu0 }
 0x42f   : > { %7412 = vst [vmem:[%s11247_s18 + $0x30] sm:$0xff] %v7360_v46   ;;  %v7725_v30 = vadd.f32 %v7724_v32, %v7723_v36  ;;  %v6518_v4 = vmax.f32 %v6434_v29, 0.0 }
 0x430   : > { %v7726_v58 = vpop.f32.mrf.mxu0 }
 0x431   : > { %v6437_v49 = vadd.f32 %v7725_v30, %v11238_v7 }
 0x432   : > { %v7727_v38 = vpop.f32.mrf.mxu0 }
 0x433   : > { %v6519_v55 = vmax.f32 %v6437_v49, 0.0  ;;  %v7728_v26 = vadd.f32 %v7727_v38, %v7726_v58 }
 0x434   : > { %v7729_v61 = vpop.f32.mrf.mxu0 }
 0x435   : > { %v7365_v47 = vpack.c.bf16 %v6519_v55, %v6518_v4  ;;  %v6442_v35 = vadd.f32 %v7728_v26, %v11238_v7 }
 0x436   : > { %v7730_v53 = vpop.f32.mrf.mxu0 }
 0x437   : > { %7413 = vst [vmem:[%s11247_s18 + $0x38] sm:$0xff] %v7365_v47   ;;  %v7731_v3 = vadd.f32 %v7730_v53, %v7729_v61  ;;  %v6520_v39 = vmax.f32 %v6442_v35, 0.0 }
 0x438   : > { %v7732_v16 = vpop.f32.mrf.mxu0 }
 0x439   : > { %v6445_v19 = vadd.f32 %v7731_v3, %v11238_v7 }
 0x43a   : > { %v7733_v34 = vpop.f32.mrf.mxu0 }
 0x43b   : > { %v6521_v40 = vmax.f32 %v6445_v19, 0.0  ;;  %v7734_v17 = vadd.f32 %v7733_v34, %v7732_v16 }
 0x43c   : > { %v7735_v60 = vpop.f32.mrf.mxu0 }
 0x43d   : > { %v7370_v11 = vpack.c.bf16 %v6521_v40, %v6520_v39  ;;  %v6450_v56 = vadd.f32 %v7734_v17, %v11238_v7 }
 0x43e   : > { %v7736_v8 = vpop.f32.mrf.mxu0 }
 0x43f   : > { %7414 = vst [vmem:[%s11247_s18 + $0x40] sm:$0xff] %v7370_v11   ;;  %v7737_v12 = vadd.f32 %v7736_v8, %v7735_v60  ;;  %v6522_v27 = vmax.f32 %v6450_v56, 0.0 }
 0x440   : > { %v7738_v63 = vpop.f32.mrf.mxu0 }
 0x441   : > { %v6453_v9 = vadd.f32 %v7737_v12, %v11238_v7 }
 0x442   : > { %v7739_v42 = vpop.f32.mrf.mxu0 }
 0x443   : > { %v6523_v28 = vmax.f32 %v6453_v9, 0.0  ;;  %v7740_v31 = vadd.f32 %v7739_v42, %v7738_v63 }
 0x444   : > { %v7741_v33 = vpop.f32.mrf.mxu0 }
 0x445   : > { %v7375_v52 = vpack.c.bf16 %v6523_v28, %v6522_v27  ;;  %v6458_v51 = vadd.f32 %v7740_v31, %v11238_v7 }
 0x446   : > { %v7742_v2 = vpop.f32.mrf.mxu0 }
 0x447   : > { %7415 = vst [vmem:[%s11247_s18 + $0x48] sm:$0xff] %v7375_v52   ;;  %v7743_v45 = vadd.f32 %v7742_v2, %v7741_v33  ;;  %v6524_v21 = vmax.f32 %v6458_v51, 0.0 }
 0x448   : > { %v7744_v23 = vpop.f32.mrf.mxu0 }
 0x449   : > { %v6461_v50 = vadd.f32 %v7743_v45, %v11238_v7 }
 0x44a   : > { %v7745_v25 = vpop.f32.mrf.mxu0 }
 0x44b   : > { %v6525_v20 = vmax.f32 %v6461_v50, 0.0  ;;  %v7746_v43 = vadd.f32 %v7745_v25, %v7744_v23 }
 0x44c   : > { %v7747_v37 = vpop.f32.mrf.mxu0 }
 0x44d   : > { %v7380_v22 = vpack.c.bf16 %v6525_v20, %v6524_v21  ;;  %v6466_v5 = vadd.f32 %v7746_v43, %v11238_v7 }
 0x44e   : > { %v7748_v6 = vpop.f32.mrf.mxu0 }
 0x44f   : > { %7416 = vst [vmem:[%s11247_s18 + $0x50] sm:$0xff] %v7380_v22   ;;  %v7749_v10 = vadd.f32 %v7748_v6, %v7747_v37  ;;  %v6526_v57 = vmax.f32 %v6466_v5, 0.0 }
 0x450   : > { %v7750_v41 = vpop.f32.mrf.mxu0 }
 0x451   : > { %v6469_v24 = vadd.f32 %v7749_v10, %v11238_v7 }
 0x452   : > { %v7751_v1 = vpop.f32.mrf.mxu0 }
 0x453   : > { %v6527_v0 = vmax.f32 %v6469_v24, 0.0  ;;  %v7752_v59 = vadd.f32 %v7751_v1, %v7750_v41 }
 0x454   : > { %v7753_v62 = vpop.f32.mrf.mxu0 }
 0x455   : > { %v7385_v18 = vpack.c.bf16 %v6527_v0, %v6526_v57  ;;  %v6474_v48 = vadd.f32 %v7752_v59, %v11238_v7 }
 0x456   : > { %v7754_v15 = vpop.f32.mrf.mxu0 }
 0x457   : > { %7417 = vst [vmem:[%s11247_s18 + $0x58] sm:$0xff] %v7385_v18   ;;  %v7755_v14 = vadd.f32 %v7754_v15, %v7753_v62  ;;  %v6528_v36 = vmax.f32 %v6474_v48, 0.0 }
 0x458   : > { %v7756_v44 = vpop.f32.mrf.mxu0 }
 0x459   : > { %v6477_v13 = vadd.f32 %v7755_v14, %v11238_v7 }
 0x45a   : > { %v7757_v54 = vpop.f32.mrf.mxu0 }
 0x45b   : > { %v6529_v46 = vmax.f32 %v6477_v13, 0.0  ;;  %v7758_v32 = vadd.f32 %v7757_v54, %v7756_v44 }
 0x45c   : > { %v7759_v29 = vpop.f32.mrf.mxu0 }
 0x45d   : > { %v7390_v30 = vpack.c.bf16 %v6529_v46, %v6528_v36  ;;  %v6482_v49 = vadd.f32 %v7758_v32, %v11238_v7 }
 0x45e   : > { %v7760_v58 = vpop.f32.mrf.mxu0 }
 0x45f   : > { %7418 = vst [vmem:[%s11247_s18 + $0x60] sm:$0xff] %v7390_v30   ;;  %v7761_v38 = vadd.f32 %v7760_v58, %v7759_v29  ;;  %v6530_v61 = vmax.f32 %v6482_v49, 0.0 }
 0x460   : > { %v7762_v4 = vpop.f32.mrf.mxu0 }
 0x461   : > { %v6485_v55 = vadd.f32 %v7761_v38, %v11238_v7 }
 0x462   : > { %v7763_v26 = vpop.f32.mrf.mxu0 }
 0x463   : > { %v6531_v47 = vmax.f32 %v6485_v55, 0.0  ;;  %v7764_v53 = vadd.f32 %v7763_v26, %v7762_v4 }
 0x464   : > { %v7765_v35 = vpop.f32.mrf.mxu0 }
 0x465   : > { %v7395_v3 = vpack.c.bf16 %v6531_v47, %v6530_v61  ;;  %v6490_v19 = vadd.f32 %v7764_v53, %v11238_v7 }
 0x466   : > { %v7766_v16 = vpop.f32.mrf.mxu0 }
 0x467   : > { %7419 = vst [vmem:[%s11247_s18 + $0x68] sm:$0xff] %v7395_v3   ;;  %v7767_v34 = vadd.f32 %v7766_v16, %v7765_v35  ;;  %v6532_v60 = vmax.f32 %v6490_v19, 0.0 }
 0x468   : > { %v7768_v39 = vpop.f32.mrf.mxu0 }
 0x469   : > { %v6493_v40 = vadd.f32 %v7767_v34, %v11238_v7 }
 0x46a   : > { %v7769_v17 = vpop.f32.mrf.mxu0 }
 0x46b   : > { %v6533_v11 = vmax.f32 %v6493_v40, 0.0  ;;  %v7770_v8 = vadd.f32 %v7769_v17, %v7768_v39 }
 0x46c   : > { %v7771_v56 = vpop.f32.mrf.mxu0 }
 0x46d   : > { %v7400_v12 = vpack.c.bf16 %v6533_v11, %v6532_v60  ;;  %v6498_v9 = vadd.f32 %v7770_v8, %v11238_v7 }
 0x46e   : > { %v7772_v63 = vpop.f32.mrf.mxu0 }
 0x46f   : > { %7420 = vst [vmem:[%s11247_s18 + $0x70] sm:$0xff] %v7400_v12   ;;  %v7773_v42 = vadd.f32 %v7772_v63, %v7771_v56  ;;  %v6534_v28 = vmax.f32 %v6498_v9, 0.0 }
 0x471   : > { %v6501_v27 = vadd.f32 %v7773_v42, %v11238_v7 }
 0x473   : > { %v6535_v31 = vmax.f32 %v6501_v27, 0.0 }
 0x475   : > { %v7405_v33 = vpack.c.bf16 %v6535_v31, %v6534_v28 }
 0x477   : > { %7421 = vst [vmem:[%s11247_s18 + $0x78] sm:$0xff] %v7405_v33  }
 0x478 PF: > { %s17_s24 = sadd.s32 1, %s8453_s24  }
 0x479   : > { %p14_p4 = scmp.ge.s32.totalorder %s17_s24, 4  }
 0x47b   :  { %16 = sbr.rel (!%p14_p4) target bundleno = 1 (0x1), region = 89 }

</bundles_post_ra>
